<compile_context>
chip_gen: v6e
topology: v6e:2x2x1
jax: 0.10.0
libtpu: 0.0.40
codegen_flags: <defaults>
</compile_context>

<pallas_src>
import functools
import math

import jax
import jax.numpy as jnp
from jax.experimental import pallas as pl
from jax.experimental.pallas import tpu as pltpu

_LN_EPS = 1e-12          # the module explicitly uses nn.LayerNorm(d_model, eps=1e-12)
_NEG_INF = -1e30         # finite "-inf": fully-masked rows -> uniform attn instead of NaN
_VMEM_LIMIT = 32 * 1024 * 1024

# packed-vector slab row indices (encoder layers)
_ENC_LN1_G, _ENC_LN1_B, _ENC_B1, _ENC_B2, _ENC_LN2_G, _ENC_LN2_B = range(6)
# packed-vector slab row indices (decoder layers)
(_DEC_LN1_G, _DEC_LN1_B, _DEC_LN2_G, _DEC_LN2_B,
 _DEC_B1, _DEC_B2, _DEC_LN3_G, _DEC_LN3_B) = range(8)


def _compiler_params():
    return pltpu.CompilerParams(dimension_semantics=("parallel",),
                                vmem_limit_bytes=_VMEM_LIMIT)


# ----------------------------- in-kernel helpers ----------------------------

def _layernorm(x, g, b, eps=_LN_EPS):
    mean = jnp.mean(x, axis=-1, keepdims=True)
    var = jnp.mean(jnp.square(x - mean), axis=-1, keepdims=True)
    return (x - mean) * jax.lax.rsqrt(var + eps) * g + b


def _project_heads(x, w_ref):
    """x: [S, D] f32, w_ref: [G, D, dh] bf16 -> [G, S, dh] f32 via one batched matmul."""
    g = w_ref.shape[0]
    xb = jnp.broadcast_to(x.astype(jnp.bfloat16)[None], (g,) + x.shape)
    return jax.lax.dot_general(xb, w_ref[...], (((2,), (1,)), ((0,), (0,))),
                               preferred_element_type=jnp.float32)


def _attention(q, k, v, bias, wo_ref, att_ref, *, scale):
    """Batched-over-heads attention.

    q: [H, Sq, dh], k/v: [H, Sk, dh] (f32), bias: additive mask broadcastable to
    [H, Sq, Sk] (0.0 keep / -1e30 masked), wo_ref: [H, dh, D] bf16.
    Writes probabilities to att_ref[0] ([H, Sq, Sk]) and returns the output
    projection [Sq, D] (f32).
    """
    s = jax.lax.dot_general(q.astype(jnp.bfloat16), k.astype(jnp.bfloat16),
                            (((2,), (2,)), ((0,), (0,))),
                            preferred_element_type=jnp.float32) * scale + bias
    m = jnp.max(s, axis=-1, keepdims=True)
    e = jnp.exp(s - m)
    p = e / jnp.sum(e, axis=-1, keepdims=True)       # exact divide (user-facing matrix)
    att_ref[0] = p
    ctx = jax.lax.dot_general(p.astype(jnp.bfloat16), v.astype(jnp.bfloat16),
                              (((2,), (1,)), ((0,), (0,))),
                              preferred_element_type=jnp.float32)      # [H, Sq, dh]
    # concat_h(ctx_h) @ Wo == sum_h ctx_h @ Wo_h  (no lane concat / reshape needed)
    out = jax.lax.dot_general(ctx.astype(jnp.bfloat16), wo_ref[...],
                              (((2,), (1,)), ((0,), (0,))),
                              preferred_element_type=jnp.float32)      # [H, Sq, D]
    return jnp.sum(out, axis=0)


# ----------------------------- fused layer kernels ---------------------------

def _encoder_layer_kernel(x_ref, mask_ref, wqkv_ref, wo_ref, w1_ref, w2_ref, vec_ref,
                          y_ref, att_ref, *, num_heads):
    H = num_heads
    D = x_ref.shape[-1]
    F = w1_ref.shape[-1]
    dh = D // H
    scale = 1.0 / math.sqrt(dh)

    x = x_ref[0]                                                       # [S, D]
    # additive mask bias computed ONCE per layer (1.0 == masked out)
    bias = jnp.where(mask_ref[0, 0] > 0.0, _NEG_INF, 0.0)[None]        # [1, 1, S]

    qkv = _project_heads(x, wqkv_ref)                                  # [3H, S, dh]
    att_out = _attention(qkv[:H], qkv[H:2 * H], qkv[2 * H:], bias,
                         wo_ref, att_ref, scale=scale)

    ln1_g = vec_ref[_ENC_LN1_G:_ENC_LN1_G + 1, :D]
    ln1_b = vec_ref[_ENC_LN1_B:_ENC_LN1_B + 1, :D]
    b1 = vec_ref[_ENC_B1:_ENC_B1 + 1, :F]
    b2 = vec_ref[_ENC_B2:_ENC_B2 + 1, :D]
    ln2_g = vec_ref[_ENC_LN2_G:_ENC_LN2_G + 1, :D]
    ln2_b = vec_ref[_ENC_LN2_B:_ENC_LN2_B + 1, :D]

    # dropout: identity (eval mode)
    h1 = _layernorm(att_out + x, ln1_g, ln1_b)
    f = jnp.maximum(jnp.dot(h1.astype(jnp.bfloat16), w1_ref[...],
                            preferred_element_type=jnp.float32) + b1, 0.0)
    f2 = jnp.dot(f.astype(jnp.bfloat16), w2_ref[...],
                 preferred_element_type=jnp.float32) + b2
    y_ref[0] = _layernorm(f2 + h1, ln2_g, ln2_b)


def _decoder_layer_kernel(x_ref, enc_ref, dmask_ref, emask_ref,
                          wqkv1_ref, wo1_ref, wq2_ref, wkv2_ref, wo2_ref,
                          w1_ref, w2_ref, vec_ref,
                          y_ref, att1_ref, att2_ref, *, num_heads):
    H = num_heads
    D = x_ref.shape[-1]
    F = w1_ref.shape[-1]
    dh = D // H
    scale = 1.0 / math.sqrt(dh)

    x = x_ref[0]                                                       # [Sd, D]
    enc = enc_ref[0]                                                   # [Se, D]
    dbias = jnp.where(dmask_ref[0, 0] > 0.0, _NEG_INF, 0.0)[None]      # [1, Sd, Sd]
    ebias = jnp.where(emask_ref[0, 0] > 0.0, _NEG_INF, 0.0)[None]      # [1, 1, Se]

    ln1_g = vec_ref[_DEC_LN1_G:_DEC_LN1_G + 1, :D]
    ln1_b = vec_ref[_DEC_LN1_B:_DEC_LN1_B + 1, :D]
    ln2_g = vec_ref[_DEC_LN2_G:_DEC_LN2_G + 1, :D]
    ln2_b = vec_ref[_DEC_LN2_B:_DEC_LN2_B + 1, :D]
    b1 = vec_ref[_DEC_B1:_DEC_B1 + 1, :F]
    b2 = vec_ref[_DEC_B2:_DEC_B2 + 1, :D]
    ln3_g = vec_ref[_DEC_LN3_G:_DEC_LN3_G + 1, :D]
    ln3_b = vec_ref[_DEC_LN3_B:_DEC_LN3_B + 1, :D]

    # --- block 1: masked self-attention ---
    qkv1 = _project_heads(x, wqkv1_ref)                                # [3H, Sd, dh]
    a1 = _attention(qkv1[:H], qkv1[H:2 * H], qkv1[2 * H:], dbias,
                    wo1_ref, att1_ref, scale=scale)
    h1 = _layernorm(a1 + x, ln1_g, ln1_b)

    # --- block 2: cross-attention over encoder output ---
    q2 = _project_heads(h1, wq2_ref)                                   # [H, Sd, dh]
    kv2 = _project_heads(enc, wkv2_ref)                                # [2H, Se, dh]
    a2 = _attention(q2, kv2[:H], kv2[H:], ebias, wo2_ref, att2_ref, scale=scale)
    h2 = _layernorm(a2 + h1, ln2_g, ln2_b)

    # --- FFN ---
    f = jnp.maximum(jnp.dot(h2.astype(jnp.bfloat16), w1_ref[...],
                            preferred_element_type=jnp.float32) + b1, 0.0)
    f2 = jnp.dot(f.astype(jnp.bfloat16), w2_ref[...],
                 preferred_element_type=jnp.float32) + b2
    y_ref[0] = _layernorm(f2 + h2, ln3_g, ln3_b)


def _final_kernel(x_ref, w_ref, b_ref, logit_ref, prob_ref):
    # w/b are pre-padded to a multiple of 128 lanes; padded bias columns are
    # -1e30 so exp() underflows to exactly 0 and the softmax over the real
    # vocab is exact.  Padded columns are sliced off outside the kernel.
    x = x_ref[0]                                                       # [S, D]
    logits = jnp.dot(x.astype(jnp.bfloat16), w_ref[...],
                     preferred_element_type=jnp.float32) + b_ref[...]
    logit_ref[0] = logits
    m = jnp.max(logits, axis=-1, keepdims=True)
    e = jnp.exp(logits - m)
    prob_ref[0] = e / jnp.sum(e, axis=-1, keepdims=True)               # exact divide


# ----------------------------- pallas_call wrappers ---------------------------

def encoder_layer_forward(p, x, padding_mask, num_heads):
    B, S, D = x.shape
    H = num_heads
    dh = D // H
    F = p['w1'].shape[1]
    R, W = p['vecs'].shape
    kern = functools.partial(_encoder_layer_kernel, num_heads=H)
    y, att = pl.pallas_call(
        kern,
        out_shape=(jax.ShapeDtypeStruct((B, S, D), jnp.float32),
                   jax.ShapeDtypeStruct((B, H, S, S), jnp.float32)),
        grid=(B,),
        in_specs=[
            pl.BlockSpec((1, S, D), lambda b: (b, 0, 0)),              # x
            pl.BlockSpec((1, 1, 1, S), lambda b: (b, 0, 0, 0)),        # padding mask
            pl.BlockSpec((3 * H, D, dh), lambda b: (0, 0, 0)),         # wqkv  (bf16)
            pl.BlockSpec((H, dh, D), lambda b: (0, 0, 0)),             # wo    (bf16)
            pl.BlockSpec((D, F), lambda b: (0, 0)),                    # w1    (bf16)
            pl.BlockSpec((F, D), lambda b: (0, 0)),                    # w2    (bf16)
            pl.BlockSpec((R, W), lambda b: (0, 0)),                    # packed vectors
        ],
        out_specs=(pl.BlockSpec((1, S, D), lambda b: (b, 0, 0)),
                   pl.BlockSpec((1, H, S, S), lambda b: (b, 0, 0, 0))),
        compiler_params=_compiler_params(),
    )(x, padding_mask, p['wqkv'], p['wo'], p['w1'], p['w2'], p['vecs'])
    return y, att


def decoder_layer_forward(p, x, enc_out, enc_padding_mask, dec_combined_mask,
                          num_heads):
    B, Sd, D = x.shape
    Se = enc_out.shape[1]
    H = num_heads
    dh = D // H
    F = p['w1'].shape[1]
    R, W = p['vecs'].shape
    kern = functools.partial(_decoder_layer_kernel, num_heads=H)
    y, att1, att2 = pl.pallas_call(
        kern,
        out_shape=(jax.ShapeDtypeStruct((B, Sd, D), jnp.float32),
                   jax.ShapeDtypeStruct((B, H, Sd, Sd), jnp.float32),
                   jax.ShapeDtypeStruct((B, H, Sd, Se), jnp.float32)),
        grid=(B,),
        in_specs=[
            pl.BlockSpec((1, Sd, D), lambda b: (b, 0, 0)),             # x
            pl.BlockSpec((1, Se, D), lambda b: (b, 0, 0)),             # enc_out
            pl.BlockSpec((1, 1, Sd, Sd), lambda b: (b, 0, 0, 0)),      # dec combined mask
            pl.BlockSpec((1, 1, 1, Se), lambda b: (b, 0, 0, 0)),       # enc padding mask
            pl.BlockSpec((3 * H, D, dh), lambda b: (0, 0, 0)),         # wqkv1 (bf16)
            pl.BlockSpec((H, dh, D), lambda b: (0, 0, 0)),             # wo1   (bf16)
            pl.BlockSpec((H, D, dh), lambda b: (0, 0, 0)),             # wq2   (bf16)
            pl.BlockSpec((2 * H, D, dh), lambda b: (0, 0, 0)),         # wkv2  (bf16)
            pl.BlockSpec((H, dh, D), lambda b: (0, 0, 0)),             # wo2   (bf16)
            pl.BlockSpec((D, F), lambda b: (0, 0)),                    # w1    (bf16)
            pl.BlockSpec((F, D), lambda b: (0, 0)),                    # w2    (bf16)
            pl.BlockSpec((R, W), lambda b: (0, 0)),                    # packed vectors
        ],
        out_specs=(pl.BlockSpec((1, Sd, D), lambda b: (b, 0, 0)),
                   pl.BlockSpec((1, H, Sd, Sd), lambda b: (b, 0, 0, 0)),
                   pl.BlockSpec((1, H, Sd, Se), lambda b: (b, 0, 0, 0))),
        compiler_params=_compiler_params(),
    )(x, enc_out, dec_combined_mask, enc_padding_mask,
      p['wqkv1'], p['wo1'], p['wq2'], p['wkv2'], p['wo2'],
      p['w1'], p['w2'], p['vecs'])
    return y, att1, att2


def final_linear_softmax(x, w, b, vocab_size):
    B, S, D = x.shape
    Vp = w.shape[1]                        # padded to a multiple of 128
    logits_p, probs_p = pl.pallas_call(
        _final_kernel,
        out_shape=(jax.ShapeDtypeStruct((B, S, Vp), jnp.float32),
                   jax.ShapeDtypeStruct((B, S, Vp), jnp.float32)),
        grid=(B,),
        in_specs=[pl.BlockSpec((1, S, D), lambda b: (b, 0, 0)),
                  pl.BlockSpec((D, Vp), lambda b: (0, 0)),
                  pl.BlockSpec((1, Vp), lambda b: (0, 0))],
        out_specs=(pl.BlockSpec((1, S, Vp), lambda b: (b, 0, 0)),
                   pl.BlockSpec((1, S, Vp), lambda b: (b, 0, 0))),
        compiler_params=_compiler_params(),
    )(x, w, b)
    return logits_p[:, :, :vocab_size], probs_p[:, :, :vocab_size]


# ----------------------------- model forwards --------------------------------

def encoder_forward(p, x_ids, padding_mask, num_heads):
    S = x_ids.shape[1]
    attention = {}
    x = jnp.take(p['embedding'], x_ids, axis=0)
    x = x + p['pos_embedding'][:S][None, :, :]
    # dropout: identity (eval mode)
    for i, lp in enumerate(p['layers']):
        x, att = encoder_layer_forward(lp, x, padding_mask, num_heads)
        attention['encoder_layer' + str(i + 1)] = att
    return x, attention


def decoder_forward(p, x_ids, enc_out, enc_padding_mask, dec_combined_mask,
                    num_heads):
    S = x_ids.shape[1]
    attention = {}
    x = jnp.take(p['embedding'], x_ids, axis=0)
    x = x + p['pos_embedding'][:S][None, :, :]
    # dropout: identity (eval mode)
    for i, lp in enumerate(p['layers']):
        x, att_1, att_2 = decoder_layer_forward(lp, x, enc_out, enc_padding_mask,
                                                dec_combined_mask, num_heads)
        attention['decoder_layer{}_block1'.format(i + 1)] = att_1
        attention['decoder_layer{}_block2'.format(i + 1)] = att_2
    return x, attention


def transformer_forward(params, enc_ids, dec_ids, enc_padding_mask,
                        dec_combined_mask, num_heads, target_vocab_size):
    enc_out, enc_att = encoder_forward(params['encoder'], enc_ids,
                                       enc_padding_mask, num_heads)
    dec_out, dec_att = decoder_forward(params['decoder'], dec_ids, enc_out,
                                       enc_padding_mask, dec_combined_mask,
                                       num_heads)
    y_logits, y = final_linear_softmax(dec_out, params['final_w'],
                                       params['final_b'], target_vocab_size)
    return y_logits, y, {**enc_att, **dec_att}


# ----------------------------- parameter init ---------------------------------

class KeyGen:
    def __init__(self, seed):
        self.key = jax.random.PRNGKey(seed)

    def __call__(self):
        self.key, sub = jax.random.split(self.key)
        return sub


def _linear(kg, d_in, d_out):
    return jax.random.normal(kg(), (d_in, d_out), jnp.float32) * (1.0 / math.sqrt(d_in))


def _pack_vecs(rows, width):
    out = []
    for r in rows:
        r = jnp.ravel(r).astype(jnp.float32)
        out.append(jnp.pad(r, (0, width - r.shape[0])))
    return jnp.stack(out, axis=0)


def _mha_head_weights(kg, d_model, num_heads):
    dh = d_model // num_heads
    wq, wk, wv, wo = [_linear(kg, d_model, d_model) for _ in range(4)]
    def to_heads_in(w):                       # [D, D] -> [H, D, dh]
        return w.reshape(d_model, num_heads, dh).transpose(1, 0, 2)
    return ([to_heads_in(w) for w in (wq, wk, wv)],
            wo.reshape(num_heads, dh, d_model))          # [H, dh, D]


def init_encoder_layer(kg, d_model, num_heads, d_ff):
    (wq_h, wk_h, wv_h), wo_h = _mha_head_weights(kg, d_model, num_heads)
    w1 = _linear(kg, d_model, d_ff)
    w2 = _linear(kg, d_ff, d_model)
    fmax = max(d_model, d_ff)
    vecs = _pack_vecs([
        jnp.ones((d_model,)), jnp.zeros((d_model,)),     # ln1 gamma, beta
        jnp.zeros((d_ff,)), jnp.zeros((d_model,)),       # b1, b2
        jnp.ones((d_model,)), jnp.zeros((d_model,)),     # ln2 gamma, beta
    ], fmax)
    return {
        'wqkv': jnp.concatenate([wq_h, wk_h, wv_h], axis=0).astype(jnp.bfloat16),
        'wo': wo_h.astype(jnp.bfloat16),
        'w1': w1.astype(jnp.bfloat16),
        'w2': w2.astype(jnp.bfloat16),
        'vecs': vecs,
    }


def init_decoder_layer(kg, d_model, num_heads, d_ff):
    (wq1, wk1, wv1), wo1 = _mha_head_weights(kg, d_model, num_heads)
    (wq2, wk2, wv2), wo2 = _mha_head_weights(kg, d_model, num_heads)
    w1 = _linear(kg, d_model, d_ff)
    w2 = _linear(kg, d_ff, d_model)
    fmax = max(d_model, d_ff)
    vecs = _pack_vecs([
        jnp.ones((d_model,)), jnp.zeros((d_model,)),     # ln1
        jnp.ones((d_model,)), jnp.zeros((d_model,)),     # ln2
        jnp.zeros((d_ff,)), jnp.zeros((d_model,)),       # b1, b2
        jnp.ones((d_model,)), jnp.zeros((d_model,)),     # ln3
    ], fmax)
    return {
        'wqkv1': jnp.concatenate([wq1, wk1, wv1], axis=0).astype(jnp.bfloat16),
        'wo1': wo1.astype(jnp.bfloat16),
        'wq2': wq2.astype(jnp.bfloat16),
        'wkv2': jnp.concatenate([wk2, wv2], axis=0).astype(jnp.bfloat16),
        'wo2': wo2.astype(jnp.bfloat16),
        'w1': w1.astype(jnp.bfloat16),
        'w2': w2.astype(jnp.bfloat16),
        'vecs': vecs,
    }


def init_embedding(kg, vocab, d_model, padding_idx=0):
    e = jax.random.normal(kg(), (vocab, d_model), jnp.float32) * 0.1
    return e.at[padding_idx].set(0.0)   # mimic nn.Embedding padding_idx (also on pos emb, as in the module)


def init_transformer(kg, num_enc_layers, num_dec_layers, d_model, num_heads,
                     d_ff, max_in_len, max_tgt_len, in_vocab, tgt_vocab,
                     padding_idx=0):
    assert d_model % num_heads == 0
    enc = {
        'embedding': init_embedding(kg, in_vocab, d_model, padding_idx),
        'pos_embedding': init_embedding(kg, max_in_len, d_model, padding_idx),
        'layers': [init_encoder_layer(kg, d_model, num_heads, d_ff)
                   for _ in range(num_enc_layers)],
    }
    dec = {
        'embedding': init_embedding(kg, tgt_vocab, d_model, padding_idx),
        'pos_embedding': init_embedding(kg, max_tgt_len, d_model, padding_idx),
        'layers': [init_decoder_layer(kg, d_model, num_heads, d_ff)
                   for _ in range(num_dec_layers)],
    }
    # lane-dense (multiple-of-128) padded vocab projection
    v_pad = ((tgt_vocab + 127) // 128) * 128
    final_w = jnp.zeros((d_model, v_pad), jnp.float32).at[:, :tgt_vocab].set(
        _linear(kg, d_model, tgt_vocab))
    final_b = jnp.full((1, v_pad), _NEG_INF, jnp.float32).at[:, :tgt_vocab].set(0.0)
    return {
        'encoder': enc,
        'decoder': dec,
        'final_w': final_w.astype(jnp.bfloat16),
        'final_b': final_b,
    }


# ---------------------------------- main --------------------------------------

if __name__ == "__main__":
    num_enc_layers = 2
    num_dec_layers = 2
    d_model = 32
    num_heads = 4
    d_ff = 64
    max_in_len = 16
    max_tgt_len = 16
    in_vocab = 11
    tgt_vocab = 13
    B, S_enc, S_dec = 2, 8, 8

    kg = KeyGen(42)
    params = init_transformer(kg, num_enc_layers, num_dec_layers, d_model,
                              num_heads, d_ff, max_in_len, max_tgt_len,
                              in_vocab, tgt_vocab)

    ikey = jax.random.PRNGKey(0)
    k1, k2 = jax.random.split(ikey)
    enc_in = jax.random.randint(k1, (B, S_enc), 1, in_vocab, dtype=jnp.int32)
    dec_in = jax.random.randint(k2, (B, S_dec), 1, tgt_vocab, dtype=jnp.int32)
    # mark last position of each sequence as padding (token id 0)
    enc_in = enc_in.at[:, -1].set(0)
    dec_in = dec_in.at[:, -1].set(0)

    enc_padding_mask = (enc_in == 0).astype(jnp.float32).reshape(B, 1, 1, S_enc)
    dec_padding = (dec_in == 0).astype(jnp.float32).reshape(B, 1, 1, S_dec)
    causal = jnp.triu(jnp.ones((S_dec, S_dec), jnp.float32), k=1)
    dec_combined_mask = jnp.maximum(causal.reshape(1, 1, S_dec, S_dec),
                                    dec_padding)          # [B, 1, S_dec, S_dec]

    fwd = jax.jit(functools.partial(transformer_forward, num_heads=num_heads,
                                    target_vocab_size=tgt_vocab))
    y_logits, y, attention = fwd(params, enc_in, dec_in,
                                 enc_padding_mask, dec_combined_mask)
    jax.block_until_ready((y_logits, y, attention))

    assert y_logits.shape == (B, S_dec, tgt_vocab)
    assert y.shape == (B, S_dec, tgt_vocab)
    assert attention['encoder_layer1'].shape == (B, num_heads, S_enc, S_enc)
    assert attention['decoder_layer1_block1'].shape == (B, num_heads, S_dec, S_dec)
    assert attention['decoder_layer2_block2'].shape == (B, num_heads, S_dec, S_enc)
    assert bool(jnp.isfinite(y_logits).all())
    assert bool(jnp.all(jnp.abs(jnp.sum(y, axis=-1) - 1.0) < 1e-3))
    print("KERNEL_OK")
</pallas_src>

<mosaic_0001>
module attributes {stable_mosaic.version = 11 : i64} {
  func.func @_encoder_layer_kernel(%arg0: i32, %arg1: memref<1x8x32xf32, #tpu.memory_space<vmem>>, %arg2: memref<1x1x1x8xf32, #tpu.memory_space<vmem>>, %arg3: memref<12x32x8xbf16, #tpu.memory_space<vmem>>, %arg4: memref<4x8x32xbf16, #tpu.memory_space<vmem>>, %arg5: memref<32x64xbf16, #tpu.memory_space<vmem>>, %arg6: memref<64x32xbf16, #tpu.memory_space<vmem>>, %arg7: memref<6x64xf32, #tpu.memory_space<vmem>>, %arg8: memref<1x8x32xf32, #tpu.memory_space<vmem>>, %arg9: memref<1x4x8x8xf32, #tpu.memory_space<vmem>>) attributes {dimension_semantics = [#tpu.dimension_semantics<parallel>], iteration_bounds = array<i64: 2>, scalar_prefetch = 0 : i64, scratch_operands = 0 : i64, tpu.core_type = #tpu.core_type<tc>, window_params = [{transform_indices = @transform_0, window_bounds = array<i64: 1, 8, 32>}, {transform_indices = @transform_1, window_bounds = array<i64: 1, 1, 1, 8>}, {pipeline_mode = #tpu.pipeline_mode<synchronous>, transform_indices = @transform_2, window_bounds = array<i64: 12, 32, 8>}, {pipeline_mode = #tpu.pipeline_mode<synchronous>, transform_indices = @transform_3, window_bounds = array<i64: 4, 8, 32>}, {pipeline_mode = #tpu.pipeline_mode<synchronous>, transform_indices = @transform_4, window_bounds = array<i64: 32, 64>}, {pipeline_mode = #tpu.pipeline_mode<synchronous>, transform_indices = @transform_5, window_bounds = array<i64: 64, 32>}, {pipeline_mode = #tpu.pipeline_mode<synchronous>, transform_indices = @transform_6, window_bounds = array<i64: 6, 64>}, {transform_indices = @transform_7, window_bounds = array<i64: 1, 8, 32>}, {transform_indices = @transform_8, window_bounds = array<i64: 1, 4, 8, 8>}]} {
    %c0 = arith.constant 0 : index
    %c0_0 = arith.constant 0 : index
    %c0_1 = arith.constant 0 : index
    %0 = vector.load %arg1[%c0, %c0_0, %c0_1] : memref<1x8x32xf32, #tpu.memory_space<vmem>>, vector<1x8x32xf32>
    %1 = vector.shape_cast %0 : vector<1x8x32xf32> to vector<8x32xf32>
    %c0_2 = arith.constant 0 : index
    %c0_3 = arith.constant 0 : index
    %c0_4 = arith.constant 0 : index
    %c0_5 = arith.constant 0 : index
    %2 = vector.load %arg2[%c0_2, %c0_3, %c0_4, %c0_5] : memref<1x1x1x8xf32, #tpu.memory_space<vmem>>, vector<1x1x1x8xf32>
    %3 = vector.shape_cast %2 : vector<1x1x1x8xf32> to vector<1x8xf32>
    %cst = arith.constant 0.000000e+00 : f32
    %4 = vector.broadcast %cst : f32 to vector<1x8xf32>
    %5 = arith.cmpf ogt, %3, %4 : vector<1x8xf32>
    %cst_6 = arith.constant -1.000000e+30 : f32
    %cst_7 = arith.constant 0.000000e+00 : f32
    %6 = vector.broadcast %cst_6 : f32 to vector<1x8xf32>
    %7 = vector.broadcast %cst_7 : f32 to vector<1x8xf32>
    %8 = arith.select %5, %6, %7 : vector<1x8xi1>, vector<1x8xf32>
    %9 = vector.shape_cast %8 : vector<1x8xf32> to vector<1x1x8xf32>
    %10 = arith.truncf %1 : vector<8x32xf32> to vector<8x32xbf16>
    %11 = vector.shape_cast %10 : vector<8x32xbf16> to vector<1x8x32xbf16>
    %12 = vector.shape_cast %11 : vector<1x8x32xbf16> to vector<1x8x32xbf16>
    %13 = vector.broadcast %12 : vector<1x8x32xbf16> to vector<12x8x32xbf16>
    %c0_8 = arith.constant 0 : index
    %c0_9 = arith.constant 0 : index
    %c0_10 = arith.constant 0 : index
    %14 = vector.load %arg3[%c0_8, %c0_9, %c0_10] : memref<12x32x8xbf16, #tpu.memory_space<vmem>>, vector<12x32x8xbf16>
    %cst_11 = arith.constant dense<0.000000e+00> : vector<12x8x8xf32>
    %15 = tpu.matmul %13, %14, %cst_11 {dimension_numbers = #tpu.dot_dimension_numbers<[2], [1], [1], [2], [0, 0, 0, 1, 1, 2], [0], [0]>} : vector<12x8x32xbf16>, vector<12x32x8xbf16>, vector<12x8x8xf32> -> vector<12x8x8xf32>
    %16 = vector.extract_strided_slice %15 {offsets = [0, 0, 0], sizes = [4, 8, 8], strides = [1, 1, 1]} : vector<12x8x8xf32> to vector<4x8x8xf32>
    %17 = vector.extract_strided_slice %15 {offsets = [4, 0, 0], sizes = [4, 8, 8], strides = [1, 1, 1]} : vector<12x8x8xf32> to vector<4x8x8xf32>
    %18 = vector.extract_strided_slice %15 {offsets = [8, 0, 0], sizes = [4, 8, 8], strides = [1, 1, 1]} : vector<12x8x8xf32> to vector<4x8x8xf32>
    %19 = arith.truncf %16 : vector<4x8x8xf32> to vector<4x8x8xbf16>
    %20 = arith.truncf %17 : vector<4x8x8xf32> to vector<4x8x8xbf16>
    %cst_12 = arith.constant dense<0.000000e+00> : vector<4x8x8xf32>
    %21 = tpu.matmul %19, %20, %cst_12 {dimension_numbers = #tpu.dot_dimension_numbers<[2], [2], [1], [1], [0, 0, 0, 1, 1, 1], [0], [0]>} : vector<4x8x8xbf16>, vector<4x8x8xbf16>, vector<4x8x8xf32> -> vector<4x8x8xf32>
    %cst_13 = arith.constant 0.353553385 : f32
    %22 = vector.broadcast %cst_13 : f32 to vector<4x8x8xf32>
    %23 = arith.mulf %21, %22 : vector<4x8x8xf32>
    %24 = vector.broadcast %9 : vector<1x1x8xf32> to vector<4x8x8xf32>
    %25 = arith.addf %23, %24 : vector<4x8x8xf32>
    %cst_14 = arith.constant dense<0xFF800000> : vector<4x8xf32>
    %26 = vector.multi_reduction <maximumf>, %25, %cst_14 [2] : vector<4x8x8xf32> to vector<4x8xf32>
    %27 = vector.shape_cast %26 : vector<4x8xf32> to vector<4x8x1xf32>
    %28 = vector.broadcast %27 : vector<4x8x1xf32> to vector<4x8x8xf32>
    %29 = arith.subf %25, %28 : vector<4x8x8xf32>
    %30 = math.exp %29 : vector<4x8x8xf32>
    %cst_15 = arith.constant dense<0.000000e+00> : vector<4x8xf32>
    %31 = vector.multi_reduction <add>, %30, %cst_15 [2] : vector<4x8x8xf32> to vector<4x8xf32>
    %32 = vector.shape_cast %31 : vector<4x8xf32> to vector<4x8x1xf32>
    %33 = vector.broadcast %32 : vector<4x8x1xf32> to vector<4x8x8xf32>
    %34 = arith.divf %30, %33 : vector<4x8x8xf32>
    %c0_16 = arith.constant 0 : index
    %c0_17 = arith.constant 0 : index
    %c0_18 = arith.constant 0 : index
    %c0_19 = arith.constant 0 : index
    %35 = vector.load %arg9[%c0_16, %c0_17, %c0_18, %c0_19] : memref<1x4x8x8xf32, #tpu.memory_space<vmem>>, vector<1x4x8x8xf32>
    %36 = vector.shape_cast %35 : vector<1x4x8x8xf32> to vector<4x8x8xf32>
    %37 = vector.shape_cast %34 : vector<4x8x8xf32> to vector<1x4x8x8xf32>
    tpu.vector_store %arg9[%c0_16, %c0_17, %c0_18, %c0_19], %37 {strides = array<i32>} : memref<1x4x8x8xf32, #tpu.memory_space<vmem>>, vector<1x4x8x8xf32>,
    %38 = arith.truncf %34 : vector<4x8x8xf32> to vector<4x8x8xbf16>
    %39 = arith.truncf %18 : vector<4x8x8xf32> to vector<4x8x8xbf16>
    %cst_20 = arith.constant dense<0.000000e+00> : vector<4x8x8xf32>
    %40 = tpu.matmul %38, %39, %cst_20 {dimension_numbers = #tpu.dot_dimension_numbers<[2], [1], [1], [2], [0, 0, 0, 1, 1, 2], [0], [0]>} : vector<4x8x8xbf16>, vector<4x8x8xbf16>, vector<4x8x8xf32> -> vector<4x8x8xf32>
    %41 = arith.truncf %40 : vector<4x8x8xf32> to vector<4x8x8xbf16>
    %c0_21 = arith.constant 0 : index
    %c0_22 = arith.constant 0 : index
    %c0_23 = arith.constant 0 : index
    %42 = vector.load %arg4[%c0_21, %c0_22, %c0_23] : memref<4x8x32xbf16, #tpu.memory_space<vmem>>, vector<4x8x32xbf16>
    %cst_24 = arith.constant dense<0.000000e+00> : vector<4x8x32xf32>
    %43 = tpu.matmul %41, %42, %cst_24 {dimension_numbers = #tpu.dot_dimension_numbers<[2], [1], [1], [2], [0, 0, 0, 1, 1, 2], [0], [0]>} : vector<4x8x8xbf16>, vector<4x8x32xbf16>, vector<4x8x32xf32> -> vector<4x8x32xf32>
    %cst_25 = arith.constant dense<0.000000e+00> : vector<8x32xf32>
    %44 = vector.multi_reduction <add>, %43, %cst_25 [0] : vector<4x8x32xf32> to vector<8x32xf32>
    %c0_26 = arith.constant 0 : index
    %c0_27 = arith.constant 0 : index
    %45 = vector.load %arg7[%c0_26, %c0_27] : memref<6x64xf32, #tpu.memory_space<vmem>>, vector<1x32xf32>
    %c1 = arith.constant 1 : index
    %c0_28 = arith.constant 0 : index
    %46 = vector.load %arg7[%c1, %c0_28] : memref<6x64xf32, #tpu.memory_space<vmem>>, vector<1x32xf32>
    %c2 = arith.constant 2 : index
    %c0_29 = arith.constant 0 : index
    %47 = vector.load %arg7[%c2, %c0_29] : memref<6x64xf32, #tpu.memory_space<vmem>>, vector<1x64xf32>
    %c3 = arith.constant 3 : index
    %c0_30 = arith.constant 0 : index
    %48 = vector.load %arg7[%c3, %c0_30] : memref<6x64xf32, #tpu.memory_space<vmem>>, vector<1x32xf32>
    %c4 = arith.constant 4 : index
    %c0_31 = arith.constant 0 : index
    %49 = vector.load %arg7[%c4, %c0_31] : memref<6x64xf32, #tpu.memory_space<vmem>>, vector<1x32xf32>
    %c5 = arith.constant 5 : index
    %c0_32 = arith.constant 0 : index
    %50 = vector.load %arg7[%c5, %c0_32] : memref<6x64xf32, #tpu.memory_space<vmem>>, vector<1x32xf32>
    %51 = arith.addf %44, %1 : vector<8x32xf32>
    %cst_33 = arith.constant dense<0.000000e+00> : vector<8xf32>
    %52 = vector.multi_reduction <add>, %51, %cst_33 [1] : vector<8x32xf32> to vector<8xf32>
    %53 = vector.shape_cast %52 : vector<8xf32> to vector<8x1xf32>
    %cst_34 = arith.constant 3.200000e+01 : f32
    %54 = vector.broadcast %cst_34 : f32 to vector<8x1xf32>
    %55 = arith.divf %53, %54 : vector<8x1xf32>
    %56 = vector.broadcast %55 : vector<8x1xf32> to vector<8x32xf32>
    %57 = arith.subf %51, %56 : vector<8x32xf32>
    %58 = arith.mulf %57, %57 : vector<8x32xf32>
    %cst_35 = arith.constant dense<0.000000e+00> : vector<8xf32>
    %59 = vector.multi_reduction <add>, %58, %cst_35 [1] : vector<8x32xf32> to vector<8xf32>
    %60 = vector.shape_cast %59 : vector<8xf32> to vector<8x1xf32>
    %cst_36 = arith.constant 3.200000e+01 : f32
    %61 = vector.broadcast %cst_36 : f32 to vector<8x1xf32>
    %62 = arith.divf %60, %61 : vector<8x1xf32>
    %63 = vector.broadcast %55 : vector<8x1xf32> to vector<8x32xf32>
    %64 = arith.subf %51, %63 : vector<8x32xf32>
    %cst_37 = arith.constant 9.99999996E-13 : f32
    %65 = vector.broadcast %cst_37 : f32 to vector<8x1xf32>
    %66 = arith.addf %62, %65 : vector<8x1xf32>
    %67 = math.rsqrt %66 : vector<8x1xf32>
    %68 = vector.broadcast %67 : vector<8x1xf32> to vector<8x32xf32>
    %69 = arith.mulf %64, %68 : vector<8x32xf32>
    %70 = vector.broadcast %45 : vector<1x32xf32> to vector<8x32xf32>
    %71 = arith.mulf %69, %70 : vector<8x32xf32>
    %72 = vector.broadcast %46 : vector<1x32xf32> to vector<8x32xf32>
    %73 = arith.addf %71, %72 : vector<8x32xf32>
    %74 = arith.truncf %73 : vector<8x32xf32> to vector<8x32xbf16>
    %c0_38 = arith.constant 0 : index
    %c0_39 = arith.constant 0 : index
    %75 = vector.load %arg5[%c0_38, %c0_39] : memref<32x64xbf16, #tpu.memory_space<vmem>>, vector<32x64xbf16>
    %cst_40 = arith.constant dense<0.000000e+00> : vector<8x64xf32>
    %76 = tpu.matmul %74, %75, %cst_40 {dimension_numbers = #tpu.dot_dimension_numbers<[1], [0], [0], [1], [0, 0, 1, 1], [], []>} : vector<8x32xbf16>, vector<32x64xbf16>, vector<8x64xf32> -> vector<8x64xf32>
    %77 = vector.broadcast %47 : vector<1x64xf32> to vector<8x64xf32>
    %78 = arith.addf %76, %77 : vector<8x64xf32>
    %cst_41 = arith.constant 0.000000e+00 : f32
    %79 = vector.broadcast %cst_41 : f32 to vector<8x64xf32>
    %80 = arith.maximumf %78, %79 : vector<8x64xf32>
    %81 = arith.truncf %80 : vector<8x64xf32> to vector<8x64xbf16>
    %c0_42 = arith.constant 0 : index
    %c0_43 = arith.constant 0 : index
    %82 = vector.load %arg6[%c0_42, %c0_43] : memref<64x32xbf16, #tpu.memory_space<vmem>>, vector<64x32xbf16>
    %cst_44 = arith.constant dense<0.000000e+00> : vector<8x32xf32>
    %83 = tpu.matmul %81, %82, %cst_44 {dimension_numbers = #tpu.dot_dimension_numbers<[1], [0], [0], [1], [0, 0, 1, 1], [], []>} : vector<8x64xbf16>, vector<64x32xbf16>, vector<8x32xf32> -> vector<8x32xf32>
    %84 = vector.broadcast %48 : vector<1x32xf32> to vector<8x32xf32>
    %85 = arith.addf %83, %84 : vector<8x32xf32>
    %86 = arith.addf %85, %73 : vector<8x32xf32>
    %cst_45 = arith.constant dense<0.000000e+00> : vector<8xf32>
    %87 = vector.multi_reduction <add>, %86, %cst_45 [1] : vector<8x32xf32> to vector<8xf32>
    %88 = vector.shape_cast %87 : vector<8xf32> to vector<8x1xf32>
    %cst_46 = arith.constant 3.200000e+01 : f32
    %89 = vector.broadcast %cst_46 : f32 to vector<8x1xf32>
    %90 = arith.divf %88, %89 : vector<8x1xf32>
    %91 = vector.broadcast %90 : vector<8x1xf32> to vector<8x32xf32>
    %92 = arith.subf %86, %91 : vector<8x32xf32>
    %93 = arith.mulf %92, %92 : vector<8x32xf32>
    %cst_47 = arith.constant dense<0.000000e+00> : vector<8xf32>
    %94 = vector.multi_reduction <add>, %93, %cst_47 [1] : vector<8x32xf32> to vector<8xf32>
    %95 = vector.shape_cast %94 : vector<8xf32> to vector<8x1xf32>
    %cst_48 = arith.constant 3.200000e+01 : f32
    %96 = vector.broadcast %cst_48 : f32 to vector<8x1xf32>
    %97 = arith.divf %95, %96 : vector<8x1xf32>
    %98 = vector.broadcast %90 : vector<8x1xf32> to vector<8x32xf32>
    %99 = arith.subf %86, %98 : vector<8x32xf32>
    %cst_49 = arith.constant 9.99999996E-13 : f32
    %100 = vector.broadcast %cst_49 : f32 to vector<8x1xf32>
    %101 = arith.addf %97, %100 : vector<8x1xf32>
    %102 = math.rsqrt %101 : vector<8x1xf32>
    %103 = vector.broadcast %102 : vector<8x1xf32> to vector<8x32xf32>
    %104 = arith.mulf %99, %103 : vector<8x32xf32>
    %105 = vector.broadcast %49 : vector<1x32xf32> to vector<8x32xf32>
    %106 = arith.mulf %104, %105 : vector<8x32xf32>
    %107 = vector.broadcast %50 : vector<1x32xf32> to vector<8x32xf32>
    %108 = arith.addf %106, %107 : vector<8x32xf32>
    %c0_50 = arith.constant 0 : index
    %c0_51 = arith.constant 0 : index
    %c0_52 = arith.constant 0 : index
    %109 = vector.load %arg8[%c0_50, %c0_51, %c0_52] : memref<1x8x32xf32, #tpu.memory_space<vmem>>, vector<1x8x32xf32>
    %110 = vector.shape_cast %109 : vector<1x8x32xf32> to vector<8x32xf32>
    %111 = vector.shape_cast %108 : vector<8x32xf32> to vector<1x8x32xf32>
    tpu.vector_store %arg8[%c0_50, %c0_51, %c0_52], %111 {strides = array<i32>} : memref<1x8x32xf32, #tpu.memory_space<vmem>>, vector<1x8x32xf32>,
    return
  }
  func.func @transform_0(%arg0: i32) -> (i32, i32, i32) {
    %c0_i32 = arith.constant 0 : i32
    %c0_i32_0 = arith.constant 0 : i32
    %c0_i32_1 = arith.constant 0 : i32
    return %arg0, %c0_i32, %c0_i32_0 : i32, i32, i32
  }
  func.func @transform_1(%arg0: i32) -> (i32, i32, i32, i32) {
    %c0_i32 = arith.constant 0 : i32
    %c0_i32_0 = arith.constant 0 : i32
    %c0_i32_1 = arith.constant 0 : i32
    %c0_i32_2 = arith.constant 0 : i32
    return %arg0, %c0_i32, %c0_i32_0, %c0_i32_1 : i32, i32, i32, i32
  }
  func.func @transform_2(%arg0: i32) -> (i32, i32, i32) {
    %c0_i32 = arith.constant 0 : i32
    %c0_i32_0 = arith.constant 0 : i32
    %c0_i32_1 = arith.constant 0 : i32
    %c0_i32_2 = arith.constant 0 : i32
    return %c0_i32, %c0_i32_0, %c0_i32_1 : i32, i32, i32
  }
  func.func @transform_3(%arg0: i32) -> (i32, i32, i32) {
    %c0_i32 = arith.constant 0 : i32
    %c0_i32_0 = arith.constant 0 : i32
    %c0_i32_1 = arith.constant 0 : i32
    %c0_i32_2 = arith.constant 0 : i32
    return %c0_i32, %c0_i32_0, %c0_i32_1 : i32, i32, i32
  }
  func.func @transform_4(%arg0: i32) -> (i32, i32) {
    %c0_i32 = arith.constant 0 : i32
    %c0_i32_0 = arith.constant 0 : i32
    %c0_i32_1 = arith.constant 0 : i32
    return %c0_i32, %c0_i32_0 : i32, i32
  }
  func.func @transform_5(%arg0: i32) -> (i32, i32) {
    %c0_i32 = arith.constant 0 : i32
    %c0_i32_0 = arith.constant 0 : i32
    %c0_i32_1 = arith.constant 0 : i32
    return %c0_i32, %c0_i32_0 : i32, i32
  }
  func.func @transform_6(%arg0: i32) -> (i32, i32) {
    %c0_i32 = arith.constant 0 : i32
    %c0_i32_0 = arith.constant 0 : i32
    %c0_i32_1 = arith.constant 0 : i32
    return %c0_i32, %c0_i32_0 : i32, i32
  }
  func.func @transform_7(%arg0: i32) -> (i32, i32, i32) {
    %c0_i32 = arith.constant 0 : i32
    %c0_i32_0 = arith.constant 0 : i32
    %c0_i32_1 = arith.constant 0 : i32
    return %arg0, %c0_i32, %c0_i32_0 : i32, i32, i32
  }
  func.func @transform_8(%arg0: i32) -> (i32, i32, i32, i32) {
    %c0_i32 = arith.constant 0 : i32
    %c0_i32_0 = arith.constant 0 : i32
    %c0_i32_1 = arith.constant 0 : i32
    %c0_i32_2 = arith.constant 0 : i32
    return %arg0, %c0_i32, %c0_i32_0, %c0_i32_1 : i32, i32, i32, i32
  }
}

module attributes {stable_mosaic.version = 11 : i64} {
  func.func @_decoder_layer_kernel(%arg0: i32, %arg1: memref<1x8x32xf32, #tpu.memory_space<vmem>>, %arg2: memref<1x8x32xf32, #tpu.memory_space<vmem>>, %arg3: memref<1x1x8x8xf32, #tpu.memory_space<vmem>>, %arg4: memref<1x1x1x8xf32, #tpu.memory_space<vmem>>, %arg5: memref<12x32x8xbf16, #tpu.memory_space<vmem>>, %arg6: memref<4x8x32xbf16, #tpu.memory_space<vmem>>, %arg7: memref<4x32x8xbf16, #tpu.memory_space<vmem>>, %arg8: memref<8x32x8xbf16, #tpu.memory_space<vmem>>, %arg9: memref<4x8x32xbf16, #tpu.memory_space<vmem>>, %arg10: memref<32x64xbf16, #tpu.memory_space<vmem>>, %arg11: memref<64x32xbf16, #tpu.memory_space<vmem>>, %arg12: memref<8x64xf32, #tpu.memory_space<vmem>>, %arg13: memref<1x8x32xf32, #tpu.memory_space<vmem>>, %arg14: memref<1x4x8x8xf32, #tpu.memory_space<vmem>>, %arg15: memref<1x4x8x8xf32, #tpu.memory_space<vmem>>) attributes {dimension_semantics = [#tpu.dimension_semantics<parallel>], iteration_bounds = array<i64: 2>, scalar_prefetch = 0 : i64, scratch_operands = 0 : i64, tpu.core_type = #tpu.core_type<tc>, window_params = [{transform_indices = @transform_0, window_bounds = array<i64: 1, 8, 32>}, {transform_indices = @transform_1, window_bounds = array<i64: 1, 8, 32>}, {transform_indices = @transform_2, window_bounds = array<i64: 1, 1, 8, 8>}, {transform_indices = @transform_3, window_bounds = array<i64: 1, 1, 1, 8>}, {pipeline_mode = #tpu.pipeline_mode<synchronous>, transform_indices = @transform_4, window_bounds = array<i64: 12, 32, 8>}, {pipeline_mode = #tpu.pipeline_mode<synchronous>, transform_indices = @transform_5, window_bounds = array<i64: 4, 8, 32>}, {pipeline_mode = #tpu.pipeline_mode<synchronous>, transform_indices = @transform_6, window_bounds = array<i64: 4, 32, 8>}, {pipeline_mode = #tpu.pipeline_mode<synchronous>, transform_indices = @transform_7, window_bounds = array<i64: 8, 32, 8>}, {pipeline_mode = #tpu.pipeline_mode<synchronous>, transform_indices = @transform_8, window_bounds = array<i64: 4, 8, 32>}, {pipeline_mode = #tpu.pipeline_mode<synchronous>, transform_indices = @transform_9, window_bounds = array<i64: 32, 64>}, {pipeline_mode = #tpu.pipeline_mode<synchronous>, transform_indices = @transform_10, window_bounds = array<i64: 64, 32>}, {pipeline_mode = #tpu.pipeline_mode<synchronous>, transform_indices = @transform_11, window_bounds = array<i64: 8, 64>}, {transform_indices = @transform_12, window_bounds = array<i64: 1, 8, 32>}, {transform_indices = @transform_13, window_bounds = array<i64: 1, 4, 8, 8>}, {transform_indices = @transform_14, window_bounds = array<i64: 1, 4, 8, 8>}]} {
    %c0 = arith.constant 0 : index
    %c0_0 = arith.constant 0 : index
    %c0_1 = arith.constant 0 : index
    %0 = vector.load %arg1[%c0, %c0_0, %c0_1] : memref<1x8x32xf32, #tpu.memory_space<vmem>>, vector<1x8x32xf32>
    %1 = vector.shape_cast %0 : vector<1x8x32xf32> to vector<8x32xf32>
    %c0_2 = arith.constant 0 : index
    %c0_3 = arith.constant 0 : index
    %c0_4 = arith.constant 0 : index
    %2 = vector.load %arg2[%c0_2, %c0_3, %c0_4] : memref<1x8x32xf32, #tpu.memory_space<vmem>>, vector<1x8x32xf32>
    %3 = vector.shape_cast %2 : vector<1x8x32xf32> to vector<8x32xf32>
    %c0_5 = arith.constant 0 : index
    %c0_6 = arith.constant 0 : index
    %c0_7 = arith.constant 0 : index
    %c0_8 = arith.constant 0 : index
    %4 = vector.load %arg3[%c0_5, %c0_6, %c0_7, %c0_8] : memref<1x1x8x8xf32, #tpu.memory_space<vmem>>, vector<1x1x8x8xf32>
    %5 = vector.shape_cast %4 : vector<1x1x8x8xf32> to vector<8x8xf32>
    %cst = arith.constant 0.000000e+00 : f32
    %6 = vector.broadcast %cst : f32 to vector<8x8xf32>
    %7 = arith.cmpf ogt, %5, %6 : vector<8x8xf32>
    %cst_9 = arith.constant -1.000000e+30 : f32
    %cst_10 = arith.constant 0.000000e+00 : f32
    %8 = vector.broadcast %cst_9 : f32 to vector<8x8xf32>
    %9 = vector.broadcast %cst_10 : f32 to vector<8x8xf32>
    %10 = arith.select %7, %8, %9 : vector<8x8xi1>, vector<8x8xf32>
    %11 = vector.shape_cast %10 : vector<8x8xf32> to vector<1x8x8xf32>
    %c0_11 = arith.constant 0 : index
    %c0_12 = arith.constant 0 : index
    %c0_13 = arith.constant 0 : index
    %c0_14 = arith.constant 0 : index
    %12 = vector.load %arg4[%c0_11, %c0_12, %c0_13, %c0_14] : memref<1x1x1x8xf32, #tpu.memory_space<vmem>>, vector<1x1x1x8xf32>
    %13 = vector.shape_cast %12 : vector<1x1x1x8xf32> to vector<1x8xf32>
    %cst_15 = arith.constant 0.000000e+00 : f32
    %14 = vector.broadcast %cst_15 : f32 to vector<1x8xf32>
    %15 = arith.cmpf ogt, %13, %14 : vector<1x8xf32>
    %cst_16 = arith.constant -1.000000e+30 : f32
    %cst_17 = arith.constant 0.000000e+00 : f32
    %16 = vector.broadcast %cst_16 : f32 to vector<1x8xf32>
    %17 = vector.broadcast %cst_17 : f32 to vector<1x8xf32>
    %18 = arith.select %15, %16, %17 : vector<1x8xi1>, vector<1x8xf32>
    %19 = vector.shape_cast %18 : vector<1x8xf32> to vector<1x1x8xf32>
    %c0_18 = arith.constant 0 : index
    %c0_19 = arith.constant 0 : index
    %20 = vector.load %arg12[%c0_18, %c0_19] : memref<8x64xf32, #tpu.memory_space<vmem>>, vector<1x32xf32>
    %c1 = arith.constant 1 : index
    %c0_20 = arith.constant 0 : index
    %21 = vector.load %arg12[%c1, %c0_20] : memref<8x64xf32, #tpu.memory_space<vmem>>, vector<1x32xf32>
    %c2 = arith.constant 2 : index
    %c0_21 = arith.constant 0 : index
    %22 = vector.load %arg12[%c2, %c0_21] : memref<8x64xf32, #tpu.memory_space<vmem>>, vector<1x32xf32>
    %c3 = arith.constant 3 : index
    %c0_22 = arith.constant 0 : index
    %23 = vector.load %arg12[%c3, %c0_22] : memref<8x64xf32, #tpu.memory_space<vmem>>, vector<1x32xf32>
    %c4 = arith.constant 4 : index
    %c0_23 = arith.constant 0 : index
    %24 = vector.load %arg12[%c4, %c0_23] : memref<8x64xf32, #tpu.memory_space<vmem>>, vector<1x64xf32>
    %c5 = arith.constant 5 : index
    %c0_24 = arith.constant 0 : index
    %25 = vector.load %arg12[%c5, %c0_24] : memref<8x64xf32, #tpu.memory_space<vmem>>, vector<1x32xf32>
    %c6 = arith.constant 6 : index
    %c0_25 = arith.constant 0 : index
    %26 = vector.load %arg12[%c6, %c0_25] : memref<8x64xf32, #tpu.memory_space<vmem>>, vector<1x32xf32>
    %c7 = arith.constant 7 : index
    %c0_26 = arith.constant 0 : index
    %27 = vector.load %arg12[%c7, %c0_26] : memref<8x64xf32, #tpu.memory_space<vmem>>, vector<1x32xf32>
    %28 = arith.truncf %1 : vector<8x32xf32> to vector<8x32xbf16>
    %29 = vector.shape_cast %28 : vector<8x32xbf16> to vector<1x8x32xbf16>
    %30 = vector.shape_cast %29 : vector<1x8x32xbf16> to vector<1x8x32xbf16>
    %31 = vector.broadcast %30 : vector<1x8x32xbf16> to vector<12x8x32xbf16>
    %c0_27 = arith.constant 0 : index
    %c0_28 = arith.constant 0 : index
    %c0_29 = arith.constant 0 : index
    %32 = vector.load %arg5[%c0_27, %c0_28, %c0_29] : memref<12x32x8xbf16, #tpu.memory_space<vmem>>, vector<12x32x8xbf16>
    %cst_30 = arith.constant dense<0.000000e+00> : vector<12x8x8xf32>
    %33 = tpu.matmul %31, %32, %cst_30 {dimension_numbers = #tpu.dot_dimension_numbers<[2], [1], [1], [2], [0, 0, 0, 1, 1, 2], [0], [0]>} : vector<12x8x32xbf16>, vector<12x32x8xbf16>, vector<12x8x8xf32> -> vector<12x8x8xf32>
    %34 = vector.extract_strided_slice %33 {offsets = [0, 0, 0], sizes = [4, 8, 8], strides = [1, 1, 1]} : vector<12x8x8xf32> to vector<4x8x8xf32>
    %35 = vector.extract_strided_slice %33 {offsets = [4, 0, 0], sizes = [4, 8, 8], strides = [1, 1, 1]} : vector<12x8x8xf32> to vector<4x8x8xf32>
    %36 = vector.extract_strided_slice %33 {offsets = [8, 0, 0], sizes = [4, 8, 8], strides = [1, 1, 1]} : vector<12x8x8xf32> to vector<4x8x8xf32>
    %37 = arith.truncf %34 : vector<4x8x8xf32> to vector<4x8x8xbf16>
    %38 = arith.truncf %35 : vector<4x8x8xf32> to vector<4x8x8xbf16>
    %cst_31 = arith.constant dense<0.000000e+00> : vector<4x8x8xf32>
    %39 = tpu.matmul %37, %38, %cst_31 {dimension_numbers = #tpu.dot_dimension_numbers<[2], [2], [1], [1], [0, 0, 0, 1, 1, 1], [0], [0]>} : vector<4x8x8xbf16>, vector<4x8x8xbf16>, vector<4x8x8xf32> -> vector<4x8x8xf32>
    %cst_32 = arith.constant 0.353553385 : f32
    %40 = vector.broadcast %cst_32 : f32 to vector<4x8x8xf32>
    %41 = arith.mulf %39, %40 : vector<4x8x8xf32>
    %42 = vector.broadcast %11 : vector<1x8x8xf32> to vector<4x8x8xf32>
    %43 = arith.addf %41, %42 : vector<4x8x8xf32>
    %cst_33 = arith.constant dense<0xFF800000> : vector<4x8xf32>
    %44 = vector.multi_reduction <maximumf>, %43, %cst_33 [2] : vector<4x8x8xf32> to vector<4x8xf32>
    %45 = vector.shape_cast %44 : vector<4x8xf32> to vector<4x8x1xf32>
    %46 = vector.broadcast %45 : vector<4x8x1xf32> to vector<4x8x8xf32>
    %47 = arith.subf %43, %46 : vector<4x8x8xf32>
    %48 = math.exp %47 : vector<4x8x8xf32>
    %cst_34 = arith.constant dense<0.000000e+00> : vector<4x8xf32>
    %49 = vector.multi_reduction <add>, %48, %cst_34 [2] : vector<4x8x8xf32> to vector<4x8xf32>
    %50 = vector.shape_cast %49 : vector<4x8xf32> to vector<4x8x1xf32>
    %51 = vector.broadcast %50 : vector<4x8x1xf32> to vector<4x8x8xf32>
    %52 = arith.divf %48, %51 : vector<4x8x8xf32>
    %c0_35 = arith.constant 0 : index
    %c0_36 = arith.constant 0 : index
    %c0_37 = arith.constant 0 : index
    %c0_38 = arith.constant 0 : index
    %53 = vector.load %arg14[%c0_35, %c0_36, %c0_37, %c0_38] : memref<1x4x8x8xf32, #tpu.memory_space<vmem>>, vector<1x4x8x8xf32>
    %54 = vector.shape_cast %53 : vector<1x4x8x8xf32> to vector<4x8x8xf32>
    %55 = vector.shape_cast %52 : vector<4x8x8xf32> to vector<1x4x8x8xf32>
    tpu.vector_store %arg14[%c0_35, %c0_36, %c0_37, %c0_38], %55 {strides = array<i32>} : memref<1x4x8x8xf32, #tpu.memory_space<vmem>>, vector<1x4x8x8xf32>,
    %56 = arith.truncf %52 : vector<4x8x8xf32> to vector<4x8x8xbf16>
    %57 = arith.truncf %36 : vector<4x8x8xf32> to vector<4x8x8xbf16>
    %cst_39 = arith.constant dense<0.000000e+00> : vector<4x8x8xf32>
    %58 = tpu.matmul %56, %57, %cst_39 {dimension_numbers = #tpu.dot_dimension_numbers<[2], [1], [1], [2], [0, 0, 0, 1, 1, 2], [0], [0]>} : vector<4x8x8xbf16>, vector<4x8x8xbf16>, vector<4x8x8xf32> -> vector<4x8x8xf32>
    %59 = arith.truncf %58 : vector<4x8x8xf32> to vector<4x8x8xbf16>
    %c0_40 = arith.constant 0 : index
    %c0_41 = arith.constant 0 : index
    %c0_42 = arith.constant 0 : index
    %60 = vector.load %arg6[%c0_40, %c0_41, %c0_42] : memref<4x8x32xbf16, #tpu.memory_space<vmem>>, vector<4x8x32xbf16>
    %cst_43 = arith.constant dense<0.000000e+00> : vector<4x8x32xf32>
    %61 = tpu.matmul %59, %60, %cst_43 {dimension_numbers = #tpu.dot_dimension_numbers<[2], [1], [1], [2], [0, 0, 0, 1, 1, 2], [0], [0]>} : vector<4x8x8xbf16>, vector<4x8x32xbf16>, vector<4x8x32xf32> -> vector<4x8x32xf32>
    %cst_44 = arith.constant dense<0.000000e+00> : vector<8x32xf32>
    %62 = vector.multi_reduction <add>, %61, %cst_44 [0] : vector<4x8x32xf32> to vector<8x32xf32>
    %63 = arith.addf %62, %1 : vector<8x32xf32>
    %cst_45 = arith.constant dense<0.000000e+00> : vector<8xf32>
    %64 = vector.multi_reduction <add>, %63, %cst_45 [1] : vector<8x32xf32> to vector<8xf32>
    %65 = vector.shape_cast %64 : vector<8xf32> to vector<8x1xf32>
    %cst_46 = arith.constant 3.200000e+01 : f32
    %66 = vector.broadcast %cst_46 : f32 to vector<8x1xf32>
    %67 = arith.divf %65, %66 : vector<8x1xf32>
    %68 = vector.broadcast %67 : vector<8x1xf32> to vector<8x32xf32>
    %69 = arith.subf %63, %68 : vector<8x32xf32>
    %70 = arith.mulf %69, %69 : vector<8x32xf32>
    %cst_47 = arith.constant dense<0.000000e+00> : vector<8xf32>
    %71 = vector.multi_reduction <add>, %70, %cst_47 [1] : vector<8x32xf32> to vector<8xf32>
    %72 = vector.shape_cast %71 : vector<8xf32> to vector<8x1xf32>
    %cst_48 = arith.constant 3.200000e+01 : f32
    %73 = vector.broadcast %cst_48 : f32 to vector<8x1xf32>
    %74 = arith.divf %72, %73 : vector<8x1xf32>
    %75 = vector.broadcast %67 : vector<8x1xf32> to vector<8x32xf32>
    %76 = arith.subf %63, %75 : vector<8x32xf32>
    %cst_49 = arith.constant 9.99999996E-13 : f32
    %77 = vector.broadcast %cst_49 : f32 to vector<8x1xf32>
    %78 = arith.addf %74, %77 : vector<8x1xf32>
    %79 = math.rsqrt %78 : vector<8x1xf32>
    %80 = vector.broadcast %79 : vector<8x1xf32> to vector<8x32xf32>
    %81 = arith.mulf %76, %80 : vector<8x32xf32>
    %82 = vector.broadcast %20 : vector<1x32xf32> to vector<8x32xf32>
    %83 = arith.mulf %81, %82 : vector<8x32xf32>
    %84 = vector.broadcast %21 : vector<1x32xf32> to vector<8x32xf32>
    %85 = arith.addf %83, %84 : vector<8x32xf32>
    %86 = arith.truncf %85 : vector<8x32xf32> to vector<8x32xbf16>
    %87 = vector.shape_cast %86 : vector<8x32xbf16> to vector<1x8x32xbf16>
    %88 = vector.shape_cast %87 : vector<1x8x32xbf16> to vector<1x8x32xbf16>
    %89 = vector.broadcast %88 : vector<1x8x32xbf16> to vector<4x8x32xbf16>
    %c0_50 = arith.constant 0 : index
    %c0_51 = arith.constant 0 : index
    %c0_52 = arith.constant 0 : index
    %90 = vector.load %arg7[%c0_50, %c0_51, %c0_52] : memref<4x32x8xbf16, #tpu.memory_space<vmem>>, vector<4x32x8xbf16>
    %cst_53 = arith.constant dense<0.000000e+00> : vector<4x8x8xf32>
    %91 = tpu.matmul %89, %90, %cst_53 {dimension_numbers = #tpu.dot_dimension_numbers<[2], [1], [1], [2], [0, 0, 0, 1, 1, 2], [0], [0]>} : vector<4x8x32xbf16>, vector<4x32x8xbf16>, vector<4x8x8xf32> -> vector<4x8x8xf32>
    %92 = arith.truncf %3 : vector<8x32xf32> to vector<8x32xbf16>
    %93 = vector.shape_cast %92 : vector<8x32xbf16> to vector<1x8x32xbf16>
    %94 = vector.shape_cast %93 : vector<1x8x32xbf16> to vector<1x8x32xbf16>
    %95 = vector.broadcast %94 : vector<1x8x32xbf16> to vector<8x8x32xbf16>
    %c0_54 = arith.constant 0 : index
    %c0_55 = arith.constant 0 : index
    %c0_56 = arith.constant 0 : index
    %96 = vector.load %arg8[%c0_54, %c0_55, %c0_56] : memref<8x32x8xbf16, #tpu.memory_space<vmem>>, vector<8x32x8xbf16>
    %cst_57 = arith.constant dense<0.000000e+00> : vector<8x8x8xf32>
    %97 = tpu.matmul %95, %96, %cst_57 {dimension_numbers = #tpu.dot_dimension_numbers<[2], [1], [1], [2], [0, 0, 0, 1, 1, 2], [0], [0]>} : vector<8x8x32xbf16>, vector<8x32x8xbf16>, vector<8x8x8xf32> -> vector<8x8x8xf32>
    %98 = vector.extract_strided_slice %97 {offsets = [0, 0, 0], sizes = [4, 8, 8], strides = [1, 1, 1]} : vector<8x8x8xf32> to vector<4x8x8xf32>
    %99 = vector.extract_strided_slice %97 {offsets = [4, 0, 0], sizes = [4, 8, 8], strides = [1, 1, 1]} : vector<8x8x8xf32> to vector<4x8x8xf32>
    %100 = arith.truncf %91 : vector<4x8x8xf32> to vector<4x8x8xbf16>
    %101 = arith.truncf %98 : vector<4x8x8xf32> to vector<4x8x8xbf16>
    %cst_58 = arith.constant dense<0.000000e+00> : vector<4x8x8xf32>
    %102 = tpu.matmul %100, %101, %cst_58 {dimension_numbers = #tpu.dot_dimension_numbers<[2], [2], [1], [1], [0, 0, 0, 1, 1, 1], [0], [0]>} : vector<4x8x8xbf16>, vector<4x8x8xbf16>, vector<4x8x8xf32> -> vector<4x8x8xf32>
    %cst_59 = arith.constant 0.353553385 : f32
    %103 = vector.broadcast %cst_59 : f32 to vector<4x8x8xf32>
    %104 = arith.mulf %102, %103 : vector<4x8x8xf32>
    %105 = vector.broadcast %19 : vector<1x1x8xf32> to vector<4x8x8xf32>
    %106 = arith.addf %104, %105 : vector<4x8x8xf32>
    %cst_60 = arith.constant dense<0xFF800000> : vector<4x8xf32>
    %107 = vector.multi_reduction <maximumf>, %106, %cst_60 [2] : vector<4x8x8xf32> to vector<4x8xf32>
    %108 = vector.shape_cast %107 : vector<4x8xf32> to vector<4x8x1xf32>
    %109 = vector.broadcast %108 : vector<4x8x1xf32> to vector<4x8x8xf32>
    %110 = arith.subf %106, %109 : vector<4x8x8xf32>
    %111 = math.exp %110 : vector<4x8x8xf32>
    %cst_61 = arith.constant dense<0.000000e+00> : vector<4x8xf32>
    %112 = vector.multi_reduction <add>, %111, %cst_61 [2] : vector<4x8x8xf32> to vector<4x8xf32>
    %113 = vector.shape_cast %112 : vector<4x8xf32> to vector<4x8x1xf32>
    %114 = vector.broadcast %113 : vector<4x8x1xf32> to vector<4x8x8xf32>
    %115 = arith.divf %111, %114 : vector<4x8x8xf32>
    %c0_62 = arith.constant 0 : index
    %c0_63 = arith.constant 0 : index
    %c0_64 = arith.constant 0 : index
    %c0_65 = arith.constant 0 : index
    %116 = vector.load %arg15[%c0_62, %c0_63, %c0_64, %c0_65] : memref<1x4x8x8xf32, #tpu.memory_space<vmem>>, vector<1x4x8x8xf32>
    %117 = vector.shape_cast %116 : vector<1x4x8x8xf32> to vector<4x8x8xf32>
    %118 = vector.shape_cast %115 : vector<4x8x8xf32> to vector<1x4x8x8xf32>
    tpu.vector_store %arg15[%c0_62, %c0_63, %c0_64, %c0_65], %118 {strides = array<i32>} : memref<1x4x8x8xf32, #tpu.memory_space<vmem>>, vector<1x4x8x8xf32>,
    %119 = arith.truncf %115 : vector<4x8x8xf32> to vector<4x8x8xbf16>
    %120 = arith.truncf %99 : vector<4x8x8xf32> to vector<4x8x8xbf16>
    %cst_66 = arith.constant dense<0.000000e+00> : vector<4x8x8xf32>
    %121 = tpu.matmul %119, %120, %cst_66 {dimension_numbers = #tpu.dot_dimension_numbers<[2], [1], [1], [2], [0, 0, 0, 1, 1, 2], [0], [0]>} : vector<4x8x8xbf16>, vector<4x8x8xbf16>, vector<4x8x8xf32> -> vector<4x8x8xf32>
    %122 = arith.truncf %121 : vector<4x8x8xf32> to vector<4x8x8xbf16>
    %c0_67 = arith.constant 0 : index
    %c0_68 = arith.constant 0 : index
    %c0_69 = arith.constant 0 : index
    %123 = vector.load %arg9[%c0_67, %c0_68, %c0_69] : memref<4x8x32xbf16, #tpu.memory_space<vmem>>, vector<4x8x32xbf16>
    %cst_70 = arith.constant dense<0.000000e+00> : vector<4x8x32xf32>
    %124 = tpu.matmul %122, %123, %cst_70 {dimension_numbers = #tpu.dot_dimension_numbers<[2], [1], [1], [2], [0, 0, 0, 1, 1, 2], [0], [0]>} : vector<4x8x8xbf16>, vector<4x8x32xbf16>, vector<4x8x32xf32> -> vector<4x8x32xf32>
    %cst_71 = arith.constant dense<0.000000e+00> : vector<8x32xf32>
    %125 = vector.multi_reduction <add>, %124, %cst_71 [0] : vector<4x8x32xf32> to vector<8x32xf32>
    %126 = arith.addf %125, %85 : vector<8x32xf32>
    %cst_72 = arith.constant dense<0.000000e+00> : vector<8xf32>
    %127 = vector.multi_reduction <add>, %126, %cst_72 [1] : vector<8x32xf32> to vector<8xf32>
    %128 = vector.shape_cast %127 : vector<8xf32> to vector<8x1xf32>
    %cst_73 = arith.constant 3.200000e+01 : f32
    %129 = vector.broadcast %cst_73 : f32 to vector<8x1xf32>
    %130 = arith.divf %128, %129 : vector<8x1xf32>
    %131 = vector.broadcast %130 : vector<8x1xf32> to vector<8x32xf32>
    %132 = arith.subf %126, %131 : vector<8x32xf32>
    %133 = arith.mulf %132, %132 : vector<8x32xf32>
    %cst_74 = arith.constant dense<0.000000e+00> : vector<8xf32>
    %134 = vector.multi_reduction <add>, %133, %cst_74 [1] : vector<8x32xf32> to vector<8xf32>
    %135 = vector.shape_cast %134 : vector<8xf32> to vector<8x1xf32>
    %cst_75 = arith.constant 3.200000e+01 : f32
    %136 = vector.broadcast %cst_75 : f32 to vector<8x1xf32>
    %137 = arith.divf %135, %136 : vector<8x1xf32>
    %138 = vector.broadcast %130 : vector<8x1xf32> to vector<8x32xf32>
    %139 = arith.subf %126, %138 : vector<8x32xf32>
    %cst_76 = arith.constant 9.99999996E-13 : f32
    %140 = vector.broadcast %cst_76 : f32 to vector<8x1xf32>
    %141 = arith.addf %137, %140 : vector<8x1xf32>
    %142 = math.rsqrt %141 : vector<8x1xf32>
    %143 = vector.broadcast %142 : vector<8x1xf32> to vector<8x32xf32>
    %144 = arith.mulf %139, %143 : vector<8x32xf32>
    %145 = vector.broadcast %22 : vector<1x32xf32> to vector<8x32xf32>
    %146 = arith.mulf %144, %145 : vector<8x32xf32>
    %147 = vector.broadcast %23 : vector<1x32xf32> to vector<8x32xf32>
    %148 = arith.addf %146, %147 : vector<8x32xf32>
    %149 = arith.truncf %148 : vector<8x32xf32> to vector<8x32xbf16>
    %c0_77 = arith.constant 0 : index
    %c0_78 = arith.constant 0 : index
    %150 = vector.load %arg10[%c0_77, %c0_78] : memref<32x64xbf16, #tpu.memory_space<vmem>>, vector<32x64xbf16>
    %cst_79 = arith.constant dense<0.000000e+00> : vector<8x64xf32>
    %151 = tpu.matmul %149, %150, %cst_79 {dimension_numbers = #tpu.dot_dimension_numbers<[1], [0], [0], [1], [0, 0, 1, 1], [], []>} : vector<8x32xbf16>, vector<32x64xbf16>, vector<8x64xf32> -> vector<8x64xf32>
    %152 = vector.broadcast %24 : vector<1x64xf32> to vector<8x64xf32>
    %153 = arith.addf %151, %152 : vector<8x64xf32>
    %cst_80 = arith.constant 0.000000e+00 : f32
    %154 = vector.broadcast %cst_80 : f32 to vector<8x64xf32>
    %155 = arith.maximumf %153, %154 : vector<8x64xf32>
    %156 = arith.truncf %155 : vector<8x64xf32> to vector<8x64xbf16>
    %c0_81 = arith.constant 0 : index
    %c0_82 = arith.constant 0 : index
    %157 = vector.load %arg11[%c0_81, %c0_82] : memref<64x32xbf16, #tpu.memory_space<vmem>>, vector<64x32xbf16>
    %cst_83 = arith.constant dense<0.000000e+00> : vector<8x32xf32>
    %158 = tpu.matmul %156, %157, %cst_83 {dimension_numbers = #tpu.dot_dimension_numbers<[1], [0], [0], [1], [0, 0, 1, 1], [], []>} : vector<8x64xbf16>, vector<64x32xbf16>, vector<8x32xf32> -> vector<8x32xf32>
    %159 = vector.broadcast %25 : vector<1x32xf32> to vector<8x32xf32>
    %160 = arith.addf %158, %159 : vector<8x32xf32>
    %161 = arith.addf %160, %148 : vector<8x32xf32>
    %cst_84 = arith.constant dense<0.000000e+00> : vector<8xf32>
    %162 = vector.multi_reduction <add>, %161, %cst_84 [1] : vector<8x32xf32> to vector<8xf32>
    %163 = vector.shape_cast %162 : vector<8xf32> to vector<8x1xf32>
    %cst_85 = arith.constant 3.200000e+01 : f32
    %164 = vector.broadcast %cst_85 : f32 to vector<8x1xf32>
    %165 = arith.divf %163, %164 : vector<8x1xf32>
    %166 = vector.broadcast %165 : vector<8x1xf32> to vector<8x32xf32>
    %167 = arith.subf %161, %166 : vector<8x32xf32>
    %168 = arith.mulf %167, %167 : vector<8x32xf32>
    %cst_86 = arith.constant dense<0.000000e+00> : vector<8xf32>
    %169 = vector.multi_reduction <add>, %168, %cst_86 [1] : vector<8x32xf32> to vector<8xf32>
    %170 = vector.shape_cast %169 : vector<8xf32> to vector<8x1xf32>
    %cst_87 = arith.constant 3.200000e+01 : f32
    %171 = vector.broadcast %cst_87 : f32 to vector<8x1xf32>
    %172 = arith.divf %170, %171 : vector<8x1xf32>
    %173 = vector.broadcast %165 : vector<8x1xf32> to vector<8x32xf32>
    %174 = arith.subf %161, %173 : vector<8x32xf32>
    %cst_88 = arith.constant 9.99999996E-13 : f32
    %175 = vector.broadcast %cst_88 : f32 to vector<8x1xf32>
    %176 = arith.addf %172, %175 : vector<8x1xf32>
    %177 = math.rsqrt %176 : vector<8x1xf32>
    %178 = vector.broadcast %177 : vector<8x1xf32> to vector<8x32xf32>
    %179 = arith.mulf %174, %178 : vector<8x32xf32>
    %180 = vector.broadcast %26 : vector<1x32xf32> to vector<8x32xf32>
    %181 = arith.mulf %179, %180 : vector<8x32xf32>
    %182 = vector.broadcast %27 : vector<1x32xf32> to vector<8x32xf32>
    %183 = arith.addf %181, %182 : vector<8x32xf32>
    %c0_89 = arith.constant 0 : index
    %c0_90 = arith.constant 0 : index
    %c0_91 = arith.constant 0 : index
    %184 = vector.load %arg13[%c0_89, %c0_90, %c0_91] : memref<1x8x32xf32, #tpu.memory_space<vmem>>, vector<1x8x32xf32>
    %185 = vector.shape_cast %184 : vector<1x8x32xf32> to vector<8x32xf32>
    %186 = vector.shape_cast %183 : vector<8x32xf32> to vector<1x8x32xf32>
    tpu.vector_store %arg13[%c0_89, %c0_90, %c0_91], %186 {strides = array<i32>} : memref<1x8x32xf32, #tpu.memory_space<vmem>>, vector<1x8x32xf32>,
    return
  }
  func.func @transform_0(%arg0: i32) -> (i32, i32, i32) {
    %c0_i32 = arith.constant 0 : i32
    %c0_i32_0 = arith.constant 0 : i32
    %c0_i32_1 = arith.constant 0 : i32
    return %arg0, %c0_i32, %c0_i32_0 : i32, i32, i32
  }
  func.func @transform_1(%arg0: i32) -> (i32, i32, i32) {
    %c0_i32 = arith.constant 0 : i32
    %c0_i32_0 = arith.constant 0 : i32
    %c0_i32_1 = arith.constant 0 : i32
    return %arg0, %c0_i32, %c0_i32_0 : i32, i32, i32
  }
  func.func @transform_2(%arg0: i32) -> (i32, i32, i32, i32) {
    %c0_i32 = arith.constant 0 : i32
    %c0_i32_0 = arith.constant 0 : i32
    %c0_i32_1 = arith.constant 0 : i32
    %c0_i32_2 = arith.constant 0 : i32
    return %arg0, %c0_i32, %c0_i32_0, %c0_i32_1 : i32, i32, i32, i32
  }
  func.func @transform_3(%arg0: i32) -> (i32, i32, i32, i32) {
    %c0_i32 = arith.constant 0 : i32
    %c0_i32_0 = arith.constant 0 : i32
    %c0_i32_1 = arith.constant 0 : i32
    %c0_i32_2 = arith.constant 0 : i32
    return %arg0, %c0_i32, %c0_i32_0, %c0_i32_1 : i32, i32, i32, i32
  }
  func.func @transform_4(%arg0: i32) -> (i32, i32, i32) {
    %c0_i32 = arith.constant 0 : i32
    %c0_i32_0 = arith.constant 0 : i32
    %c0_i32_1 = arith.constant 0 : i32
    %c0_i32_2 = arith.constant 0 : i32
    return %c0_i32, %c0_i32_0, %c0_i32_1 : i32, i32, i32
  }
  func.func @transform_5(%arg0: i32) -> (i32, i32, i32) {
    %c0_i32 = arith.constant 0 : i32
    %c0_i32_0 = arith.constant 0 : i32
    %c0_i32_1 = arith.constant 0 : i32
    %c0_i32_2 = arith.constant 0 : i32
    return %c0_i32, %c0_i32_0, %c0_i32_1 : i32, i32, i32
  }
  func.func @transform_6(%arg0: i32) -> (i32, i32, i32) {
    %c0_i32 = arith.constant 0 : i32
    %c0_i32_0 = arith.constant 0 : i32
    %c0_i32_1 = arith.constant 0 : i32
    %c0_i32_2 = arith.constant 0 : i32
    return %c0_i32, %c0_i32_0, %c0_i32_1 : i32, i32, i32
  }
  func.func @transform_7(%arg0: i32) -> (i32, i32, i32) {
    %c0_i32 = arith.constant 0 : i32
    %c0_i32_0 = arith.constant 0 : i32
    %c0_i32_1 = arith.constant 0 : i32
    %c0_i32_2 = arith.constant 0 : i32
    return %c0_i32, %c0_i32_0, %c0_i32_1 : i32, i32, i32
  }
  func.func @transform_8(%arg0: i32) -> (i32, i32, i32) {
    %c0_i32 = arith.constant 0 : i32
    %c0_i32_0 = arith.constant 0 : i32
    %c0_i32_1 = arith.constant 0 : i32
    %c0_i32_2 = arith.constant 0 : i32
    return %c0_i32, %c0_i32_0, %c0_i32_1 : i32, i32, i32
  }
  func.func @transform_9(%arg0: i32) -> (i32, i32) {
    %c0_i32 = arith.constant 0 : i32
    %c0_i32_0 = arith.constant 0 : i32
    %c0_i32_1 = arith.constant 0 : i32
    return %c0_i32, %c0_i32_0 : i32, i32
  }
  func.func @transform_10(%arg0: i32) -> (i32, i32) {
    %c0_i32 = arith.constant 0 : i32
    %c0_i32_0 = arith.constant 0 : i32
    %c0_i32_1 = arith.constant 0 : i32
    return %c0_i32, %c0_i32_0 : i32, i32
  }
  func.func @transform_11(%arg0: i32) -> (i32, i32) {
    %c0_i32 = arith.constant 0 : i32
    %c0_i32_0 = arith.constant 0 : i32
    %c0_i32_1 = arith.constant 0 : i32
    return %c0_i32, %c0_i32_0 : i32, i32
  }
  func.func @transform_12(%arg0: i32) -> (i32, i32, i32) {
    %c0_i32 = arith.constant 0 : i32
    %c0_i32_0 = arith.constant 0 : i32
    %c0_i32_1 = arith.constant 0 : i32
    return %arg0, %c0_i32, %c0_i32_0 : i32, i32, i32
  }
  func.func @transform_13(%arg0: i32) -> (i32, i32, i32, i32) {
    %c0_i32 = arith.constant 0 : i32
    %c0_i32_0 = arith.constant 0 : i32
    %c0_i32_1 = arith.constant 0 : i32
    %c0_i32_2 = arith.constant 0 : i32
    return %arg0, %c0_i32, %c0_i32_0, %c0_i32_1 : i32, i32, i32, i32
  }
  func.func @transform_14(%arg0: i32) -> (i32, i32, i32, i32) {
    %c0_i32 = arith.constant 0 : i32
    %c0_i32_0 = arith.constant 0 : i32
    %c0_i32_1 = arith.constant 0 : i32
    %c0_i32_2 = arith.constant 0 : i32
    return %arg0, %c0_i32, %c0_i32_0, %c0_i32_1 : i32, i32, i32, i32
  }
}

module attributes {stable_mosaic.version = 11 : i64} {
  func.func @_final_kernel(%arg0: i32, %arg1: memref<1x8x32xf32, #tpu.memory_space<vmem>>, %arg2: memref<32x128xbf16, #tpu.memory_space<vmem>>, %arg3: memref<1x128xf32, #tpu.memory_space<vmem>>, %arg4: memref<1x8x128xf32, #tpu.memory_space<vmem>>, %arg5: memref<1x8x128xf32, #tpu.memory_space<vmem>>) attributes {dimension_semantics = [#tpu.dimension_semantics<parallel>], iteration_bounds = array<i64: 2>, scalar_prefetch = 0 : i64, scratch_operands = 0 : i64, tpu.core_type = #tpu.core_type<tc>, window_params = [{transform_indices = @transform_0, window_bounds = array<i64: 1, 8, 32>}, {pipeline_mode = #tpu.pipeline_mode<synchronous>, transform_indices = @transform_1, window_bounds = array<i64: 32, 128>}, {pipeline_mode = #tpu.pipeline_mode<synchronous>, transform_indices = @transform_2, window_bounds = array<i64: 1, 128>}, {transform_indices = @transform_3, window_bounds = array<i64: 1, 8, 128>}, {transform_indices = @transform_4, window_bounds = array<i64: 1, 8, 128>}]} {
    %c0 = arith.constant 0 : index
    %c0_0 = arith.constant 0 : index
    %c0_1 = arith.constant 0 : index
    %0 = vector.load %arg1[%c0, %c0_0, %c0_1] : memref<1x8x32xf32, #tpu.memory_space<vmem>>, vector<1x8x32xf32>
    %1 = vector.shape_cast %0 : vector<1x8x32xf32> to vector<8x32xf32>
    %2 = arith.truncf %1 : vector<8x32xf32> to vector<8x32xbf16>
    %c0_2 = arith.constant 0 : index
    %c0_3 = arith.constant 0 : index
    %3 = vector.load %arg2[%c0_2, %c0_3] : memref<32x128xbf16, #tpu.memory_space<vmem>>, vector<32x128xbf16>
    %cst = arith.constant dense<0.000000e+00> : vector<8x128xf32>
    %4 = tpu.matmul %2, %3, %cst {dimension_numbers = #tpu.dot_dimension_numbers<[1], [0], [0], [1], [0, 0, 1, 1], [], []>} : vector<8x32xbf16>, vector<32x128xbf16>, vector<8x128xf32> -> vector<8x128xf32>
    %c0_4 = arith.constant 0 : index
    %c0_5 = arith.constant 0 : index
    %5 = vector.load %arg3[%c0_4, %c0_5] : memref<1x128xf32, #tpu.memory_space<vmem>>, vector<1x128xf32>
    %6 = vector.broadcast %5 : vector<1x128xf32> to vector<8x128xf32>
    %7 = arith.addf %4, %6 : vector<8x128xf32>
    %c0_6 = arith.constant 0 : index
    %c0_7 = arith.constant 0 : index
    %c0_8 = arith.constant 0 : index
    %8 = vector.load %arg4[%c0_6, %c0_7, %c0_8] : memref<1x8x128xf32, #tpu.memory_space<vmem>>, vector<1x8x128xf32>
    %9 = vector.shape_cast %8 : vector<1x8x128xf32> to vector<8x128xf32>
    %10 = vector.shape_cast %7 : vector<8x128xf32> to vector<1x8x128xf32>
    tpu.vector_store %arg4[%c0_6, %c0_7, %c0_8], %10 {strides = array<i32>} : memref<1x8x128xf32, #tpu.memory_space<vmem>>, vector<1x8x128xf32>,
    %cst_9 = arith.constant dense<0xFF800000> : vector<8xf32>
    %11 = vector.multi_reduction <maximumf>, %7, %cst_9 [1] : vector<8x128xf32> to vector<8xf32>
    %12 = vector.shape_cast %11 : vector<8xf32> to vector<8x1xf32>
    %13 = vector.broadcast %12 : vector<8x1xf32> to vector<8x128xf32>
    %14 = arith.subf %7, %13 : vector<8x128xf32>
    %15 = math.exp %14 : vector<8x128xf32>
    %cst_10 = arith.constant dense<0.000000e+00> : vector<8xf32>
    %16 = vector.multi_reduction <add>, %15, %cst_10 [1] : vector<8x128xf32> to vector<8xf32>
    %17 = vector.shape_cast %16 : vector<8xf32> to vector<8x1xf32>
    %18 = vector.broadcast %17 : vector<8x1xf32> to vector<8x128xf32>
    %19 = arith.divf %15, %18 : vector<8x128xf32>
    %c0_11 = arith.constant 0 : index
    %c0_12 = arith.constant 0 : index
    %c0_13 = arith.constant 0 : index
    %20 = vector.load %arg5[%c0_11, %c0_12, %c0_13] : memref<1x8x128xf32, #tpu.memory_space<vmem>>, vector<1x8x128xf32>
    %21 = vector.shape_cast %20 : vector<1x8x128xf32> to vector<8x128xf32>
    %22 = vector.shape_cast %19 : vector<8x128xf32> to vector<1x8x128xf32>
    tpu.vector_store %arg5[%c0_11, %c0_12, %c0_13], %22 {strides = array<i32>} : memref<1x8x128xf32, #tpu.memory_space<vmem>>, vector<1x8x128xf32>,
    return
  }
  func.func @transform_0(%arg0: i32) -> (i32, i32, i32) {
    %c0_i32 = arith.constant 0 : i32
    %c0_i32_0 = arith.constant 0 : i32
    %c0_i32_1 = arith.constant 0 : i32
    return %arg0, %c0_i32, %c0_i32_0 : i32, i32, i32
  }
  func.func @transform_1(%arg0: i32) -> (i32, i32) {
    %c0_i32 = arith.constant 0 : i32
    %c0_i32_0 = arith.constant 0 : i32
    %c0_i32_1 = arith.constant 0 : i32
    return %c0_i32, %c0_i32_0 : i32, i32
  }
  func.func @transform_2(%arg0: i32) -> (i32, i32) {
    %c0_i32 = arith.constant 0 : i32
    %c0_i32_0 = arith.constant 0 : i32
    %c0_i32_1 = arith.constant 0 : i32
    return %c0_i32, %c0_i32_0 : i32, i32
  }
  func.func @transform_3(%arg0: i32) -> (i32, i32, i32) {
    %c0_i32 = arith.constant 0 : i32
    %c0_i32_0 = arith.constant 0 : i32
    %c0_i32_1 = arith.constant 0 : i32
    return %arg0, %c0_i32, %c0_i32_0 : i32, i32, i32
  }
  func.func @transform_4(%arg0: i32) -> (i32, i32, i32) {
    %c0_i32 = arith.constant 0 : i32
    %c0_i32_0 = arith.constant 0 : i32
    %c0_i32_1 = arith.constant 0 : i32
    return %arg0, %c0_i32, %c0_i32_0 : i32, i32, i32
  }
}

</mosaic_0001>

<bundles_post_ra>
// kernel: transformer_forward.9
= control target key start
LH: loop header
LB: loop body
LE: loop exit
PB: predicated region body
PF: predicated region fallthrough
CT: control target
= control target key end

     0   :  { %10 = vsyncpa [#allocation3], 0  ;;  %s733_s0 = inlined_call_operand.vmem [shape: f32[2,8,32], index: 0, kind: input, shape index: {}]   ;;  %s734_s1 = inlined_call_operand.vmem [shape: bf16[32,128], index: 1, kind: input, shape index: {}]   ;;  %s735_s2 = inlined_call_operand.vmem [shape: f32[1,128], index: 2, kind: input, shape index: {}]   ;;  %s736_s3 = inlined_call_operand.hbm [shape: f32[2,8,128], index: 3, kind: output, shape index: {0}]   ;;  %s737_s4 = inlined_call_operand.hbm [shape: f32[2,8,128], index: 4, kind: output, shape index: {1}]  }
   0x1   :  { %12 = vsyncpa [#allocation3 + $0x1], 0 }
   0x2   :  { %13 = vsyncpa [#allocation5], 0 }
   0x3   :  { %15 = vsyncpa [#allocation5 + $0x1], 0  ;;  %s609_s15 = smov 0   ;;  %s611_s16 = smov 0  }
   0x4   :  { %s613_s17 = smov 0   ;;  %s615_s18 = smov 0  }
   0x5 LB: > { %s630_s19 = sadd.s32 4294967295, %s578_s18   ;;  %s408_s20 = sadd.s32 4294967294, %s578_s18   ;;  %s578_s18 = sphi %s615_s18, %s743_s18   ;;  %s574_s17 = sphi %s613_s17, %s742_s17   ;;  %s570_s16 = sphi %s611_s16, %s741_s16   ;;  %s566_s15 = sphi %s609_s15, %s740_s15  }
   0x6   : > { %s634_s21 = sadd.s32 1, %s578_s18   ;;  %s96_s22 = sadd.s32 1, %s574_s17 }
   0x7   : > { %s93_s23 = ssub.s32 %s578_s18, %s634_s21  ;;  %p106_p0 = scmp.ne.s32.totalorder %s574_s17, %s570_s16 }
   0x8   : > { %p94_p1 = scmp.eq.s32.totalorder %s93_s23, 0  ;;  %p107_p2 = scmp.eq.s32.totalorder %s630_s19, 1 }
   0x9   : > { %p112_p3 = scmp.ne.s32.totalorder %s570_s16, %s566_s15  ;;  %p113_p4 = scmp.eq.s32.totalorder %s408_s20, 1 }
   0xa   : > { %s645_s24 = scalar_select %p94_p1, %s574_s17, %s96_s22  }
   0xb   : > { %p647_p5 = por %p107_p2, %p106_p0  ;;  %p651_p6 = por %p113_p4, %p112_p3 }
   0xc   : > { %p411_p7 = scmp.ge.s32.totalorder %s578_s18, 1  ;;  %p170_p8 = scmp.lt.s32.totalorder %s578_s18, 3 }
   0xe   : > { %p171_p9 = pnand %p411_p7, %p170_p8 }
   0xf   : > { %p200_p10 = scmp.lt.s32.totalorder (!%p171_p9), %s630_s19, 1  ;;  %s669_s10 = sand.u32 (!%p171_p9), 1, %s570_s16  }
  0x10   : > { %174 = sbr.rel (%p171_p9) target bundleno = 548 (0x224), region = 32  ;;  %s412_s11 = sshll.u32 (!%p171_p9), %s669_s10, 3 }
  0x11   : > { %s192_s14 = scalar_lea.vmem (!%p171_p9), [#allocation2], %s412_s11  ;;  %s421_s20 = sshll.u32 (!%p171_p9), %s630_s19, 7 }
  0x12   : > { %s302_s27 = scalar_lea.hbm (!%p171_p9), %s736_s3, %s421_s20  ;;  %s304_s28 = sshll.u32 (!%p171_p9), %s192_s14, 4  ;;  %s305_s28 = int_to_ptr.vmem [resolvable:$true] %s304_s28 }
  0x13   : > { %s286_s29 = scalar_lea.sflag (!%p171_p9), [#allocation3], %s669_s10  ;;  %s488_s30 = scalar_lea.vmem (!%p171_p9), %s305_s28, 128 }
  0x14   : > { %p489_p11 = scmp.ne.s32.totalorder (!%p171_p9), %s305_s28, %s488_s30 }
  0x15   : > { %v482_v0 = vld [vmem:[%s734_s1 + $0x8] sm:$0xff]   ;;  %v580_v1 = vmov 0.0   ;;  %v483_v2 = vld [vmem:[%s734_s1] sm:$0xff]   ;;  %vm581_vm0 = vmmov 0   ;;  %s201_s5 = scalar_select %p200_p10, %s630_s19, 1  ;;  %vm230_vm1 = vcmask 261120  }
  0x16   : > { %428 = vmatprep.subr.bf16.mxu0 %v580_v1  ;;  %432 = vmatprep.mubr.msk.bf16.mxu0 %vm581_vm0, %v580_v1  ;;  %v415_v5 = vld [vmem:[%s735_s2] ss:$0 sm:$0xff]  ;;  %p490_p12 = pnand %p489_p11, %p647_p5 }
  0x17   : > { %429 = vmatpush3.bf16.msra.mxu0 %v482_v0  ;;  %s414_s6 = sshll.u32 %s201_s5, 3  ;;  %s582_s5 = smov [#allocation2]  }
  0x18   : > { %430 = vmatprep.subr.bf16.mxu0 %v580_v1  ;;  %s203_s9 = scalar_lea.vmem %s733_s0, %s414_s6  ;;  %p491_p13 = pneg %p490_p12 }
  0x19   : > { %v205_v3 = vld [vmem:[%s203_s9] sm:$0xff]  ;;  %s492_s6 = sshll.u32 %s582_s5, 4  ;;  %s493_s6 = int_to_ptr.vmem [resolvable:$false] %s492_s6 }
  0x1a   : > { %v206_v4 = vpack.c.bf16 %v205_v3, %v205_v3  ;;  %s494_s7 = scalar_lea.vmem %s493_s6, 256  ;;  %p495_p0 = scmp.lt.s32.totalorder %s305_s28, %s493_s6 }
  0x1b   : > { %431 = vmatpush3.bf16.msra.mxu0 %v483_v2  ;;  %p496_p1 = scmp.lt.s32.totalorder %s494_s7, %s488_s30 }
  0x1d   : > { %p497_p2 = por %p496_p1, %p495_p0 }
  0x1e   : > { %433 = vmatmul.mubr.msk.bf16.vlgmr.msra.gmra.mxu0 %vm230_vm1, %v206_v4 }
  0x1f   : > { %p498_p3 = pnand %p497_p2, %p491_p13 }
  0xde   : > { %v268_v6 = vpop.f32.mrf.mxu0 }
  0xdf   : > { %v269_v7 = vadd.f32 %v415_v5, %v268_v6 }
  0xe0   : > { %v434_v8 = vpop.f32.mrf.mxu0 }
  0xe1   : > { %275 = vmax.xlane.f32.xlu0 %v269_v7  ;;  %274 = vst [vmem:[%s192_s14] sm:$0xff] %v269_v7 }
  0xe2   : > { %v271_v9 = vpop.f32.mrf.mxu0 }
  0xe4   : > { %v435_v10 = vpop.f32.mrf.mxu0 }
 0x16a   : > { %v276_v11 = vpop.xlane.xlu0 %275 }
 0x16b   : > { %v277_v12 = vsub.f32 %v269_v7, %v276_v11 }
 0x16d   : > { %v278_v13 = vmul.f32 1.442695, %v277_v12 }
 0x16f   : > { %484 = vpow2.f32 %v278_v13 }
 0x17c   : > { %v485_v14 = vpop.eup %484 }
 0x17d   : > { %280 = vadd.xlane.f32.xlu0 %v485_v14 }
 0x17e   : > { %501 = shalt.err (!%p498_p3)
}
 0x17f   : > { %s502_s8 = scalar_lea.hbm %s302_s27, 128  ;;  %s506_s13 = scalar_lea.hbm %s736_s3, 256 }
 0x180   : > { %p503_p4 = scmp.ne.s32.totalorder %s302_s27, %s502_s8  ;;  %p507_p9 = scmp.lt.s32.totalorder %s302_s27, %s736_s3 }
 0x181   : > { %p508_p10 = scmp.lt.s32.totalorder %s506_s13, %s502_s8 }
 0x182   : > { %p504_p7 = pnand %p503_p4, %p647_p5 }
 0x183   : > { %p509_p11 = por %p508_p10, %p507_p9 }
 0x184   : > { %p505_p8 = pneg %p504_p7 }
 0x186   : > { %p510_p12 = pnand %p509_p11, %p505_p8 }
 0x188   : > { %513 = shalt.err (!%p510_p12)
}
 0x189   : > { %436 = dma.vmem_to_hbm [thread:$0]  (%p647_p5), %s305_s28, 128, %s302_s27, %s286_s29  }
 0x18a   : > { %s199_s23 = scalar_lea.vmem [#allocation4], %s412_s11  ;;  %s315_s7 = scalar_lea.hbm %s737_s4, %s421_s20 }
 0x18b   : > { %s317_s30 = sshll.u32 %s199_s23, 4  ;;  %s291_s8 = scalar_lea.sflag [#allocation5], %s669_s10  ;;  %s318_s30 = int_to_ptr.vmem [resolvable:$true] %s317_s30 }
 0x18c   : > { %s514_s9 = scalar_lea.vmem %s318_s30, 128  ;;  %s583_s27 = smov [#allocation4]  }
 0x18d   : > { %p515_p13 = scmp.ne.s32.totalorder %s318_s30, %s514_s9  ;;  %s518_s28 = sshll.u32 %s583_s27, 4  ;;  %s519_s28 = int_to_ptr.vmem [resolvable:$false] %s518_s28 }
 0x18e   : > { %s520_s11 = scalar_lea.vmem %s519_s28, 256  ;;  %p521_p2 = scmp.lt.s32.totalorder %s318_s30, %s519_s28 }
 0x18f   : > { %p516_p0 = pnand %p515_p13, %p647_p5  ;;  %p522_p3 = scmp.lt.s32.totalorder %s520_s11, %s514_s9 }
 0x191   : > { %p517_p1 = pneg %p516_p0  ;;  %p523_p4 = por %p522_p3, %p521_p2 }
 0x193   : > { %p524_p7 = pnand %p523_p4, %p517_p1 }
 0x206   : > { %v281_v15 = vpop.xlane.xlu0 %280 }
 0x207   : > { %486 = vrcp.f32 %v281_v15 }
 0x214   : > { %v487_v16 = vpop.eup %486 }
 0x215   : > { %v283_v17 = vmul.f32 %v487_v16, %v485_v14 }
 0x217   : > { %284 = vst [vmem:[%s199_s23] sm:$0xff] %v283_v17 }
 0x218   : > { %527 = shalt.err (!%p524_p7)
}
 0x219   : > { %s528_s19 = scalar_lea.hbm %s315_s7, 128  ;;  %s532_s29 = scalar_lea.hbm %s737_s4, 256 }
 0x21a   : > { %p529_p8 = scmp.ne.s32.totalorder %s315_s7, %s528_s19  ;;  %p533_p11 = scmp.lt.s32.totalorder %s315_s7, %s737_s4 }
 0x21b   : > { %p534_p12 = scmp.lt.s32.totalorder %s532_s29, %s528_s19 }
 0x21c   : > { %p530_p9 = pnand %p529_p8, %p647_p5 }
 0x21d   : > { %p535_p13 = por %p534_p12, %p533_p11 }
 0x21e   : > { %p531_p10 = pneg %p530_p9 }
 0x220   : > { %p536_p0 = pnand %p535_p13, %p531_p10 }
 0x222   : > { %539 = shalt.err (!%p536_p0)
}
 0x223   : > { %437 = dma.vmem_to_hbm [thread:$0]  (%p647_p5), %s318_s30, 128, %s315_s7, %s291_s8  }
 0x224 PF: > { %p447_p1 = scmp.ge.s32.totalorder %s578_s18, 2  ;;  %s329_s14 = sand.u32 1, %s566_s15  }
 0x225   : > { %s330_s22 = scalar_lea.sflag [#allocation3], %s329_s14 }
 0x226   : > { %p441_p2 = pnand %p447_p1, %p651_p6 }
 0x228   : > { %p442_p3 = pneg %p441_p2 }
 0x22a   : > { %557 = dma.done.wait (%p442_p3), %s330_s22, 128  }
 0x22b   : > { %559 = vsyncadd (%p442_p3), %s330_s22, 4294967168  ;;  %s339_s23 = scalar_lea.sflag [#allocation5], %s329_s14 }
 0x22c   : > { %561 = dma.done.wait (%p442_p3), %s339_s23, 128  }
 0x22d   : > { %563 = vsyncadd (%p442_p3), %s339_s23, 4294967168  ;;  %p18_p5 = scmp.ge.s32.totalorder %s634_s21, 4   ;;  %s740_s15 = smov %s570_s16 }
 0x22e   : > { %s741_s16 = smov %s574_s17  ;;  %s742_s17 = smov %s645_s24 }
 0x22f   : > { %s743_s18 = smov %s634_s21  ;;  %20 = sbr.rel (!%p18_p5) target bundleno = 5 (0x5), region = 84 }
 0x234   :  { %344 = vsyncpa [#allocation3], 1 }
 0x235   :  { %346 = vsyncpa [#allocation3 + $0x1], 1 }
 0x236   :  { %347 = vsyncpa [#allocation5], 1 }
 0x237   :  { %349 = vsyncpa [#allocation5 + $0x1], 1 }

// kernel: transformer_forward.5
= control target key start
LH: loop header
LB: loop body
LE: loop exit
PB: predicated region body
PF: predicated region fallthrough
CT: control target
= control target key end

     0   :  { %14 = vsyncpa [#allocation3], 0  ;;  %s2936_s0 = inlined_call_operand.vmem [shape: f32[2,8,32], index: 0, kind: input, shape index: {}]   ;;  %s2937_s1 = inlined_call_operand.vmem [shape: f32[2,1,1,8], index: 1, kind: input, shape index: {}]   ;;  %s2938_s2 = inlined_call_operand.vmem [shape: bf16[12,32,8], index: 2, kind: input, shape index: {}]   ;;  %s2939_s3 = inlined_call_operand.vmem [shape: bf16[4,8,32], index: 3, kind: input, shape index: {}]   ;;  %s2940_s4 = inlined_call_operand.vmem [shape: bf16[32,64], index: 4, kind: input, shape index: {}]   ;;  %s2941_s5 = inlined_call_operand.vmem [shape: bf16[64,32], index: 5, kind: input, shape index: {}]   ;;  %s2942_s6 = inlined_call_operand.vmem [shape: f32[6,64], index: 6, kind: input, shape index: {}]   ;;  %s2943_s7 = inlined_call_operand.vmem [shape: f32[2,8,32], index: 7, kind: output, shape index: {0}]   ;;  %s2944_s8 = inlined_call_operand.hbm [shape: f32[2,4,8,8], index: 8, kind: output, shape index: {1}]  }
   0x1   :  { %16 = vsyncpa [#allocation3 + $0x1], 0  ;;  %s2509_s27 = smov 0   ;;  %s2511_s28 = smov 0  }
   0x2   :  { %s2513_s29 = smov 0   ;;  %s2515_s30 = smov 0  }
   0x3 LB: > { %s2530_s9 = sadd.s32 4294967295, %s2457_s30   ;;  %s1973_s10 = sadd.s32 4294967294, %s2457_s30   ;;  %s2457_s30 = sphi %s2515_s30, %s2950_s30   ;;  %s2453_s29 = sphi %s2513_s29, %s2949_s29   ;;  %s2449_s28 = sphi %s2511_s28, %s2948_s28   ;;  %s2445_s27 = sphi %s2509_s27, %s2947_s27  }
   0x4   : > { %s2534_s11 = sadd.s32 1, %s2457_s30   ;;  %s212_s12 = sadd.s32 1, %s2453_s29 }
   0x5   : > { %s209_s13 = ssub.s32 %s2457_s30, %s2534_s11  ;;  %p222_p0 = scmp.ne.s32.totalorder %s2453_s29, %s2449_s28 }
   0x6   : > { %p210_p1 = scmp.eq.s32.totalorder %s209_s13, 0  ;;  %p223_p2 = scmp.eq.s32.totalorder %s2530_s9, 1 }
   0x7   : > { %p228_p3 = scmp.ne.s32.totalorder %s2449_s28, %s2445_s27  ;;  %p229_p4 = scmp.eq.s32.totalorder %s1973_s10, 1 }
   0x8   : > { %s2545_s14 = scalar_select %p210_p1, %s2453_s29, %s212_s12  }
   0x9   : > { %p2547_p5 = por %p223_p2, %p222_p0  ;;  %p2551_p6 = por %p229_p4, %p228_p3 }
   0xa   : > { %p1976_p7 = scmp.ge.s32.totalorder %s2457_s30, 1  ;;  %p275_p8 = scmp.lt.s32.totalorder %s2457_s30, 3 }
   0xc   : > { %p276_p9 = pnand %p1976_p7, %p275_p8 }
   0xd   : > { %p315_p10 = scmp.lt.s32.totalorder (!%p276_p9), %s2530_s9, 1  ;;  %s312_s13 = sand.u32 (!%p276_p9), 1, %s2449_s28  }
   0xe   : > { %279 = sbr.rel (%p276_p9) target bundleno = 2178 (0x882), region = 48  ;;  %s1977_s17 = sshll.u32 (!%p276_p9), %s312_s13, 5 }
   0xf   : > { %s2047_s20 = sshll.u32 (!%p276_p9), %s2530_s9, 9  ;;  %s2884_s10 = scalar_lea.sflag (!%p276_p9), [#allocation3], %s312_s13 }
  0x10   : > { %s2878_s24 = scalar_lea.hbm (!%p276_p9), %s2944_s8, %s2047_s20 }
  0x13   : > { %v2347_v0 = vld [vmem:[%s2938_s2 + $0x8] sm:$0xff]   ;;  %v2459_v1 = vmov 0.0   ;;  %v2348_v2 = vld [vmem:[%s2938_s2 + $0x18] sm:$0xff]   ;;  %v2349_v3 = vld [vmem:[%s2938_s2] sm:$0xff]   ;;  %vm2460_vm0 = vmmov 0   ;;  %s2579_s25 = scalar_select %p315_p10, %s2530_s9, 1 }
  0x14   : > { %2116 = vmatprep.subr.bf16.mxu0 %v2459_v1  ;;  %2124 = vmatprep.subr.bf16.mxu1 %v2459_v1  ;;  %v2350_v4 = vld [vmem:[%s2938_s2 + $0x10] sm:$0xff]   ;;  %v2351_v5 = vld [vmem:[%s2938_s2 + $0x28] sm:$0xff]   ;;  %v2352_v6 = vld [vmem:[%s2938_s2 + $0x38] sm:$0xff]   ;;  %vm392_vm1 = vcmask 261120   ;;  %vm1016_vm2 = vcmask 64512   ;;  %vm1274_vm3 = vcmask 1043456  }
  0x15   : > { %2117 = vmatpush3.bf16.msra.mxu0 %v2347_v0  ;;  %2120 = vmatprep.mubr.msk.bf16.mxu0 %vm2460_vm0, %v2459_v1  ;;  %s1978_s26 = sshll.u32 %s2579_s25, 3  ;;  %v2353_v9 = vld [vmem:[%s2938_s2 + $0x20] sm:$0xff]   ;;  %v2354_v10 = vld [vmem:[%s2938_s2 + $0x30] sm:$0xff]   ;;  %v2355_v11 = vld [vmem:[%s2938_s2 + $0x48] sm:$0xff]   ;;  %s321_s12 = scalar_lea.vmem %s2937_s1, %s2579_s25  ;;  %vm1788_vm5 = vcmask 523264  }
  0x16   : > { %2125 = vmatpush3.bf16.msra.mxu1 %v2348_v2  ;;  %2118 = vmatprep.subr.bf16.mxu0 %v2459_v1  ;;  %s318_s18 = scalar_lea.vmem %s2936_s0, %s1978_s26  ;;  %v2356_v12 = vld [vmem:[%s2938_s2 + $0x58] sm:$0xff]   ;;  %v2357_v13 = vld [vmem:[%s2938_s2 + $0x40] sm:$0xff]   ;;  %v2358_v14 = vld [vmem:[%s2938_s2 + $0x50] sm:$0xff]   ;;  %s2461_s9 = smov [#allocation2]  }
  0x17   : > { %2126 = vmatprep.subr.bf16.mxu1 %v2459_v1  ;;  %2128 = vmatprep.mubr.msk.bf16.mxu1 %vm2460_vm0, %v2459_v1  ;;  %v2594_v7 = vld [vmem:[%s318_s18] sm:$0xff]  ;;  %v2359_v15 = vld [vmem:[%s2938_s2 + $0x68] sm:$0xff]   ;;  %v2360_v16 = vld [vmem:[%s2938_s2 + $0x78] sm:$0xff]   ;;  %s2769_s18 = scalar_lea.vmem [#allocation2], %s1977_s17 }
  0x18   : > { %v2599_v8 = vpack.c.bf16 %v2594_v7, %v2594_v7  ;;  %v2361_v17 = vld [vmem:[%s2938_s2 + $0x60] sm:$0xff]   ;;  %v2362_v18 = vld [vmem:[%s2938_s2 + $0x70] sm:$0xff]   ;;  %v2363_v19 = vld [vmem:[%s2938_s2 + $0x88] sm:$0xff]   ;;  %s1878_s21 = sshll.u32 %s2769_s18, 4  ;;  %s2880_s21 = int_to_ptr.vmem [resolvable:$true] %s1878_s21 }
  0x19   : > { %2119 = vmatpush3.bf16.msra.mxu0 %v2349_v3  ;;  %v2364_v20 = vld [vmem:[%s2938_s2 + $0x80] sm:$0xff]   ;;  %v2365_v21 = vld [vmem:[%s2938_s2 + $0x98] sm:$0xff]   ;;  %v2366_v22 = vld [vmem:[%s2938_s2 + $0x90] sm:$0xff]  }
  0x1a   : > { %2127 = vmatpush3.bf16.msra.mxu1 %v2350_v4  ;;  %2132 = vmatprep.subr.bf16.mxu0 %v2459_v1  ;;  %v2367_v23 = vld [vmem:[%s2938_s2 + $0xa8] sm:$0xff]   ;;  %v2368_v24 = vld [vmem:[%s2938_s2 + $0xa0] sm:$0xff]   ;;  %v2369_v25 = vld [vmem:[%s2938_s2 + $0xb8] sm:$0xff]  }
  0x1b   : > { %2140 = vmatprep.subr.bf16.mxu1 %v2459_v1  ;;  %v2370_v26 = vld [vmem:[%s2938_s2 + $0xb0] sm:$0xff]  }
  0x1c   : > { %2121 = vmatmul.mubr.msk.bf16.vlgmr.msra.gmra.mxu0 %vm392_vm1, %v2599_v8 }
  0x1d   : > { %2129 = vmatmul.mubr.msk.bf16.vlgmr.msra.gmra.mxu1 %vm392_vm1, %v2599_v8  ;;  %2133 = vmatpush3.bf16.msra.mxu0 %v2351_v5 }
  0x1e   : > { %2141 = vmatpush3.bf16.msra.mxu1 %v2352_v6  ;;  %2134 = vmatprep.subr.bf16.mxu0 %v2459_v1 }
  0x1f   : > { %2142 = vmatprep.subr.bf16.mxu1 %v2459_v1  ;;  %2136 = vmatprep.mubr.msk.bf16.mxu0 %vm2460_vm0, %v2459_v1 }
  0x20   : > { %2144 = vmatprep.mubr.msk.bf16.mxu1 %vm2460_vm0, %v2459_v1 }
  0x21   : > { %2135 = vmatpush3.bf16.msra.mxu0 %v2353_v9 }
  0x22   : > { %2143 = vmatpush3.bf16.msra.mxu1 %v2354_v10  ;;  %2148 = vmatprep.subr.bf16.mxu0 %v2459_v1 }
  0x23   : > { %2156 = vmatprep.subr.bf16.mxu1 %v2459_v1 }
  0x24   : > { %2137 = vmatmul.mubr.msk.bf16.vlgmr.msra.gmra.mxu0 %vm392_vm1, %v2599_v8 }
  0x25   : > { %2145 = vmatmul.mubr.msk.bf16.vlgmr.msra.gmra.mxu1 %vm392_vm1, %v2599_v8  ;;  %2149 = vmatpush3.bf16.msra.mxu0 %v2355_v11 }
  0x26   : > { %2157 = vmatpush3.bf16.msra.mxu1 %v2356_v12  ;;  %2150 = vmatprep.subr.bf16.mxu0 %v2459_v1 }
  0x27   : > { %2158 = vmatprep.subr.bf16.mxu1 %v2459_v1  ;;  %2152 = vmatprep.mubr.msk.bf16.mxu0 %vm2460_vm0, %v2459_v1 }
  0x28   : > { %2160 = vmatprep.mubr.msk.bf16.mxu1 %vm2460_vm0, %v2459_v1 }
  0x29   : > { %2151 = vmatpush3.bf16.msra.mxu0 %v2357_v13 }
  0x2a   : > { %2159 = vmatpush3.bf16.msra.mxu1 %v2358_v14  ;;  %2164 = vmatprep.subr.bf16.mxu0 %v2459_v1 }
  0x2b   : > { %2172 = vmatprep.subr.bf16.mxu1 %v2459_v1 }
  0x2c   : > { %2153 = vmatmul.mubr.msk.bf16.vlgmr.msra.gmra.mxu0 %vm392_vm1, %v2599_v8 }
  0x2d   : > { %2161 = vmatmul.mubr.msk.bf16.vlgmr.msra.gmra.mxu1 %vm392_vm1, %v2599_v8  ;;  %2165 = vmatpush3.bf16.msra.mxu0 %v2359_v15 }
  0x2e   : > { %2173 = vmatpush3.bf16.msra.mxu1 %v2360_v16  ;;  %2166 = vmatprep.subr.bf16.mxu0 %v2459_v1 }
  0x2f   : > { %2174 = vmatprep.subr.bf16.mxu1 %v2459_v1  ;;  %2168 = vmatprep.mubr.msk.bf16.mxu0 %vm2460_vm0, %v2459_v1 }
  0x30   : > { %2176 = vmatprep.mubr.msk.bf16.mxu1 %vm2460_vm0, %v2459_v1 }
  0x31   : > { %2167 = vmatpush3.bf16.msra.mxu0 %v2361_v17 }
  0x32   : > { %2175 = vmatpush3.bf16.msra.mxu1 %v2362_v18  ;;  %2180 = vmatprep.subr.bf16.mxu0 %v2459_v1 }
  0x33   : > { %2188 = vmatprep.subr.bf16.mxu1 %v2459_v1 }
  0x34   : > { %2169 = vmatmul.mubr.msk.bf16.vlgmr.msra.gmra.mxu0 %vm392_vm1, %v2599_v8 }
  0x35   : > { %2177 = vmatmul.mubr.msk.bf16.vlgmr.msra.gmra.mxu1 %vm392_vm1, %v2599_v8  ;;  %2181 = vmatpush3.bf16.msra.mxu0 %v2363_v19 }
  0x36   : > { %2184 = vmatprep.mubr.msk.bf16.mxu0 %vm2460_vm0, %v2459_v1  ;;  %2182 = vmatprep.subr.bf16.mxu0 %v2459_v1 }
  0x37   : > { %2192 = vmatprep.mubr.msk.bf16.mxu1 %vm2460_vm0, %v2459_v1  ;;  %2189 = vmatpush3.bf16.msra.mxu1 %v2365_v21 }
  0x38   : > { %2190 = vmatprep.subr.bf16.mxu1 %v2459_v1 }
  0x39   : > { %2183 = vmatpush3.bf16.msra.mxu0 %v2364_v20 }
  0x3a   : > { %2196 = vmatprep.subr.bf16.mxu0 %v2459_v1 }
  0x3b   : > { %2191 = vmatpush3.bf16.msra.mxu1 %v2366_v22 }
  0x3c   : > { %2185 = vmatmul.mubr.msk.bf16.vlgmr.msra.gmra.mxu0 %vm392_vm1, %v2599_v8  ;;  %2204 = vmatprep.subr.bf16.mxu1 %v2459_v1 }
  0x3d   : > { %2197 = vmatpush3.bf16.msra.mxu0 %v2367_v23  ;;  %2200 = vmatprep.mubr.msk.bf16.mxu0 %vm2460_vm0, %v2459_v1 }
  0x3e   : > { %2198 = vmatprep.subr.bf16.mxu0 %v2459_v1  ;;  %2193 = vmatmul.mubr.msk.bf16.vlgmr.msra.gmra.mxu1 %vm392_vm1, %v2599_v8 }
  0x3f   : > { %2205 = vmatpush3.bf16.msra.mxu1 %v2369_v25  ;;  %2208 = vmatprep.mubr.msk.bf16.mxu1 %vm2460_vm0, %v2459_v1 }
  0x40   : > { %2206 = vmatprep.subr.bf16.mxu1 %v2459_v1 }
  0x41   : > { %2199 = vmatpush3.bf16.msra.mxu0 %v2368_v24 }
  0x42   : > { %2212 = vmatprep.subr.bf16.mxu0 %v2459_v1 }
  0x43   : > { %2207 = vmatpush3.bf16.msra.mxu1 %v2370_v26 }
  0x44   : > { %2201 = vmatmul.mubr.msk.bf16.vlgmr.msra.gmra.mxu0 %vm392_vm1, %v2599_v8  ;;  %2218 = vmatprep.subr.bf16.mxu1 %v2459_v1 }
  0x45   : > { %2214 = vmatprep.mubr.msk.bf16.mxu0 %vm2460_vm0, %v2459_v1 }
  0x46   : > { %2209 = vmatmul.mubr.msk.bf16.vlgmr.msra.gmra.mxu1 %vm392_vm1, %v2599_v8 }
  0x47   : > { %2220 = vmatprep.mubr.msk.bf16.mxu1 %vm2460_vm0, %v2459_v1 }
  0xdc   : > { %v430_v27 = vpop.f32.mrf.mxu0 }
  0xdd   : > { %v482_v28 = vpop.f32.mrf.mxu1  ;;  %v1008_v57 = vpack.c.bf16 %v430_v27, %v430_v27 }
  0xde   : > { %v2122_v29 = vpop.f32.mrf.mxu0  ;;  %v1009_v58 = vpack.c.bf16 %v482_v28, %v482_v28 }
  0xdf   : > { %v2130_v30 = vpop.f32.mrf.mxu1  ;;  %v1206_v29 = vlaneseq }
  0xe0   : > { %v433_v31 = vpop.f32.mrf.mxu0  ;;  %v328_v30 = vld [vmem:[%s321_s12] sm:$0x1]  ;;  %s2397_s12 = scalar_lea.vmem %s2880_s21, 512 }
  0xe1   : > { %v485_v32 = vpop.f32.mrf.mxu1  ;;  %v1207_v31 = vshrl.u32 %v1206_v29, 7  ;;  %vm329_vm4 = vcmp.gt.f32.partialorder %v328_v30, 0.0  ;;  %p2398_p11 = scmp.ne.s32.totalorder %s2880_s21, %s2397_s12 }
  0xe2   : > { %v2123_v33 = vpop.f32.mrf.mxu0 }
  0xe3   : > { %v2131_v34 = vpop.f32.mrf.mxu1  ;;  %v1208_v32 = vsub.s32 0, %v1207_v31  ;;  %v330_v33 = vsel %vm329_vm4, -1e+30, %v2459_v1  ;;  %p2399_p12 = pnand %p2398_p11, %p2547_p5 }
  0xe4   : > { %v534_v35 = vpop.f32.mrf.mxu0 }
  0xe5   : > { %v586_v36 = vpop.f32.mrf.mxu1  ;;  %v1010_v6 = vpack.c.bf16 %v534_v35, %v534_v35  ;;  %v1209_v34 = vrot.slane %v330_v33, %v1208_v32  ;;  %p2400_p13 = pneg %p2399_p12 }
  0xe6   : > { %v2138_v37 = vpop.f32.mrf.mxu0  ;;  %v1011_v8 = vpack.c.bf16 %v586_v36, %v586_v36 }
  0xe7   : > { %v2146_v38 = vpop.f32.mrf.mxu1 }
  0xe8   : > { %v537_v39 = vpop.f32.mrf.mxu0 }
  0xe9   : > { %v589_v40 = vpop.f32.mrf.mxu1 }
  0xea   : > { %v2139_v41 = vpop.f32.mrf.mxu0 }
  0xeb   : > { %v2147_v42 = vpop.f32.mrf.mxu1 }
  0xec   : > { %v638_v43 = vpop.f32.mrf.mxu0 }
  0xed   : > { %v690_v44 = vpop.f32.mrf.mxu1  ;;  %v1012_v45 = vpack.c.bf16 %v638_v43, %v638_v43 }
  0xee   : > { %v1013_v46 = vpack.c.bf16 %v690_v44, %v690_v44  ;;  %v2154_v47 = vpop.f32.mrf.mxu0 }
  0xef   : > { %v2162_v48 = vpop.f32.mrf.mxu1  ;;  %v1021_v49 = vsel %vm1016_vm2, %v1012_v45, 0 }
  0xf0   : > { %v1067_v50 = vsel %vm1016_vm2, %v1013_v46, 0  ;;  %v641_v51 = vpop.f32.mrf.mxu0  ;;  %2213 = vmatpush3.bf16.xpose.msra.mxu0 %v1021_v49 }
  0xf1   : > { %v693_v52 = vpop.f32.mrf.mxu1  ;;  %2219 = vmatpush3.bf16.xpose.msra.mxu1 %v1067_v50  ;;  %2224 = vmatprep.subr.bf16.mxu0 %v2459_v1 }
  0xf2   : > { %2230 = vmatprep.subr.bf16.mxu1 %v2459_v1  ;;  %v2155_v53 = vpop.f32.mrf.mxu0 }
  0xf3   : > { %v2163_v54 = vpop.f32.mrf.mxu1 }
  0xf4   : > { %v742_v55 = vpop.f32.mrf.mxu0 }
  0xf5   : > { %v794_v56 = vpop.f32.mrf.mxu1  ;;  %v1014_v59 = vpack.c.bf16 %v742_v55, %v742_v55 }
  0xf6   : > { %v1015_v60 = vpack.c.bf16 %v794_v56, %v794_v56  ;;  %v2170_v61 = vpop.f32.mrf.mxu0 }
  0xf7   : > { %v2178_v62 = vpop.f32.mrf.mxu1  ;;  %v1113_v63 = vsel %vm1016_vm2, %v1014_v59, 0  ;;  %2215 = vmatmul.mubr.msk.bf16.vlgmr.msra.gmra.mxu0 %vm1016_vm2, %v1008_v57 }
  0xf8   : > { %v1159_v0 = vsel %vm1016_vm2, %v1015_v60, 0  ;;  %2221 = vmatmul.mubr.msk.bf16.vlgmr.msra.gmra.mxu1 %vm1016_vm2, %v1009_v58  ;;  %v745_v2 = vpop.f32.mrf.mxu0  ;;  %2225 = vmatpush3.bf16.xpose.msra.mxu0 %v1113_v63 }
  0xf9   : > { %v797_v3 = vpop.f32.mrf.mxu1  ;;  %2231 = vmatpush3.bf16.xpose.msra.mxu1 %v1159_v0  ;;  %2226 = vmatprep.mubr.msk.bf16.mxu0 %vm2460_vm0, %v2459_v1 }
  0xfa   : > { %2232 = vmatprep.mubr.msk.bf16.mxu1 %vm2460_vm0, %v2459_v1  ;;  %v2171_v4 = vpop.f32.mrf.mxu0  ;;  %2236 = vmatprep.subr.bf16.mxu0 %v2459_v1 }
  0xfb   : > { %v2179_v5 = vpop.f32.mrf.mxu1  ;;  %2242 = vmatprep.subr.bf16.mxu1 %v2459_v1 }
  0xfc   : > { %v846_v9 = vpop.f32.mrf.mxu0 }
  0xfd   : > { %v1267_v10 = vpack.c.bf16 %v846_v9, %v846_v9 }
  0xfe   : > { %v2186_v11 = vpop.f32.mrf.mxu0  ;;  %v898_v14 = vpop.f32.mrf.mxu1 }
  0xff   : > { %2227 = vmatmul.mubr.msk.bf16.vlgmr.msra.gmra.mxu0 %vm1016_vm2, %v1010_v6  ;;  %v1276_v12 = vsel %vm1274_vm3, %v1267_v10, 0  ;;  %v1268_v15 = vpack.c.bf16 %v898_v14, %v898_v14 }
 0x100   : > { %2233 = vmatmul.mubr.msk.bf16.vlgmr.msra.gmra.mxu1 %vm1016_vm2, %v1011_v8  ;;  %2238 = vmatprep.mubr.msk.bf16.mxu0 %vm2460_vm0, %v2459_v1  ;;  %v849_v13 = vpop.f32.mrf.mxu0  ;;  %v2194_v17 = vpop.f32.mrf.mxu1 }
 0x101   : > { %2244 = vmatprep.mubr.msk.bf16.mxu1 %vm2460_vm0, %v2459_v1  ;;  %2237 = vmatpush3.bf16.msra.mxu0 %v1276_v12  ;;  %v1322_v18 = vsel %vm1274_vm3, %v1268_v15, 0 }
 0x102   : > { %2248 = vmatprep.subr.bf16.mxu0 %v2459_v1  ;;  %v2187_v16 = vpop.f32.mrf.mxu0  ;;  %v901_v19 = vpop.f32.mrf.mxu1  ;;  %2243 = vmatpush3.bf16.msra.mxu1 %v1322_v18 }
 0x103   : > { %2254 = vmatprep.subr.bf16.mxu1 %v2459_v1 }
 0x104   : > { %v2746_v20 = vpop.f32.mrf.mxu0  ;;  %v2195_v21 = vpop.f32.mrf.mxu1 }
 0x106   : > { %v2202_v22 = vpop.f32.mrf.mxu0  ;;  %v2749_v24 = vpop.f32.mrf.mxu1 }
 0x107   : > { %v1270_v33 = vpack.c.bf16 %v2749_v24, %v2749_v24 }
 0x108   : > { %v953_v23 = vpop.f32.mrf.mxu0  ;;  %v2210_v26 = vpop.f32.mrf.mxu1 }
 0x109   : > { %v1414_v24 = vsel %vm1274_vm3, %v1270_v33, 0 }
 0x10a   : > { %v2203_v25 = vpop.f32.mrf.mxu0  ;;  %v1005_v27 = vpop.f32.mrf.mxu1 }
 0x10c   : > { %v2211_v28 = vpop.f32.mrf.mxu1 }
 0x10d   : > { %v1269_v28 = vpack.c.bf16 %v2746_v20, %v2746_v20 }
 0x10f   : > { %v1368_v32 = vsel %vm1274_vm3, %v1269_v28, 0 }
 0x1b7   : > { %v1057_v35 = vpop.f32.mrf.mxu0 }
 0x1b8   : > { %v1103_v36 = vpop.f32.mrf.mxu1  ;;  %v1201_v37 = vmul.f32 0.35355338, %v1057_v35 }
 0x1b9   : > { %v1202_v38 = vmul.f32 0.35355338, %v1103_v36  ;;  %v2216_v39 = vpop.f32.mrf.mxu0  ;;  %v1460_v36 = vld [vmem:[%s2939_s3] sm:$0xf] }
 0x1ba   : > { %v2222_v40 = vpop.f32.mrf.mxu1  ;;  %v1211_v41 = vadd.f32 %v1209_v34, %v1201_v37  ;;  %v1468_v39 = vsel %vm1274_vm3, %v1460_v36, 0 }
 0x1bb   : > { %v1060_v42 = vpop.f32.mrf.mxu0  ;;  %v1212_v45 = vadd.f32 %v1209_v34, %v1202_v38 }
 0x1bc   : > { %v1106_v43 = vpop.f32.mrf.mxu1  ;;  %v1215_v44 = vsel %vm1016_vm2, %v1211_v41, -inf }
 0x1bd   : > { %1216 = vmax.xlane.f32.xlu0 %v1215_v44  ;;  %v2217_v47 = vpop.f32.mrf.mxu0  ;;  %v1218_v52 = vsel %vm1016_vm2, %v1212_v45, -inf  ;;  %v1461_v43 = vld [vmem:[%s2939_s3 + $0x4] sm:$0xf] }
 0x1be   : > { %v2223_v46 = vpop.f32.mrf.mxu1  ;;  %v1514_v44 = vsel %vm1274_vm3, %v1461_v43, 0 }
 0x1bf   : > { %v1149_v48 = vpop.f32.mrf.mxu0 }
 0x1c0   : > { %v1195_v49 = vpop.f32.mrf.mxu1  ;;  %v1203_v50 = vmul.f32 0.35355338, %v1149_v48 }
 0x1c1   : > { %v1204_v51 = vmul.f32 0.35355338, %v1195_v49  ;;  %1219 = vmax.xlane.f32.xlu0 %v1218_v52  ;;  %v2228_v54 = vpop.f32.mrf.mxu0 }
 0x1c2   : > { %v2234_v53 = vpop.f32.mrf.mxu1  ;;  %v1213_v55 = vadd.f32 %v1209_v34, %v1203_v50  ;;  %v1463_v50 = vld [vmem:[%s2939_s3 + $0xc] sm:$0xf] }
 0x1c3   : > { %v1152_v56 = vpop.f32.mrf.mxu0  ;;  %v1214_v59 = vadd.f32 %v1209_v34, %v1204_v51  ;;  %v1606_v54 = vsel %vm1274_vm3, %v1463_v50, 0  ;;  %v2375_v50 = vld [vmem:[%s2941_s5 + $0x8] sm:$0xff]  }
 0x1c4   : > { %v1198_v57 = vpop.f32.mrf.mxu1  ;;  %v1221_v58 = vsel %vm1016_vm2, %v1213_v55, -inf }
 0x1c5   : > { %1222 = vmax.xlane.f32.xlu1 %v1221_v58  ;;  %v2229_v61 = vpop.f32.mrf.mxu0  ;;  %v1224_v62 = vsel %vm1016_vm2, %v1214_v59, -inf }
 0x1c6   : > { %v2235_v60 = vpop.f32.mrf.mxu1 }
 0x1c9   : > { %1225 = vmax.xlane.f32.xlu1 %v1224_v62 }
 0x246   : > { %v1217_v63 = vpop.xlane.xlu0 %1216 }
 0x247   : > { %v1227_v0 = vsub.f32 %v1211_v41, %v1217_v63 }
 0x249   : > { %v1231_v2 = vmul.f32 1.442695, %v1227_v0 }
 0x24a   : > { %v1220_v3 = vpop.xlane.xlu0 %1219 }
 0x24b   : > { %2377 = vpow2.f32 %v1231_v2  ;;  %v1228_v4 = vsub.f32 %v1212_v45, %v1220_v3  ;;  %v1462_v45 = vld [vmem:[%s2939_s3 + $0x8] sm:$0xf] }
 0x24c   : > { %v1560_v48 = vsel %vm1274_vm3, %v1462_v45, 0 }
 0x24d   : > { %v1233_v5 = vmul.f32 1.442695, %v1228_v4 }
 0x24e   : > { %v1223_v6 = vpop.xlane.xlu1 %1222 }
 0x24f   : > { %2379 = vpow2.f32 %v1233_v5  ;;  %v1229_v8 = vsub.f32 %v1213_v55, %v1223_v6 }
 0x251   : > { %v1235_v9 = vmul.f32 1.442695, %v1229_v8 }
 0x252   : > { %v1226_v10 = vpop.xlane.xlu1 %1225 }
 0x253   : > { %2381 = vpow2.f32 %v1235_v9  ;;  %v1230_v11 = vsub.f32 %v1214_v59, %v1226_v10 }
 0x255   : > { %v1237_v12 = vmul.f32 1.442695, %v1230_v11 }
 0x257   : > { %2383 = vpow2.f32 %v1237_v12 }
 0x258   : > { %v2378_v13 = vpop.eup %2377 }
 0x259   : > { %v1239_v14 = vsel %vm1016_vm2, %v2378_v13, 0.0 }
 0x25a   : > { %1240 = vadd.xlane.f32.xlu0 %v1239_v14 }
 0x25c   : > { %v2380_v15 = vpop.eup %2379 }
 0x25d   : > { %v1242_v16 = vsel %vm1016_vm2, %v2380_v15, 0.0 }
 0x25e   : > { %1243 = vadd.xlane.f32.xlu1 %v1242_v16 }
 0x260   : > { %v2382_v17 = vpop.eup %2381 }
 0x261   : > { %v1245_v18 = vsel %vm1016_vm2, %v2382_v17, 0.0 }
 0x262   : > { %1246 = vadd.xlane.f32.xlu0 %v1245_v18 }
 0x264   : > { %v2384_v19 = vpop.eup %2383 }
 0x265   : > { %v1248_v21 = vsel %vm1016_vm2, %v2384_v19, 0.0 }
 0x266   : > { %1249 = vadd.xlane.f32.xlu1 %v1248_v21 }
 0x2e3   : > { %v1241_v22 = vpop.xlane.xlu0 %1240 }
 0x2e4   : > { %2385 = vrcp.f32 %v1241_v22 }
 0x2e7   : > { %v1244_v23 = vpop.xlane.xlu1 %1243 }
 0x2e8   : > { %2387 = vrcp.f32 %v1244_v23 }
 0x2eb   : > { %v1247_v25 = vpop.xlane.xlu0 %1246 }
 0x2ec   : > { %2389 = vrcp.f32 %v1247_v25 }
 0x2ef   : > { %v1250_v26 = vpop.xlane.xlu1 %1249 }
 0x2f0   : > { %2391 = vrcp.f32 %v1250_v26 }
 0x2f1   : > { %v2386_v27 = vpop.eup %2385 }
 0x2f2   : > { %v1252_v29 = vmul.f32 %v2386_v27, %v2378_v13 }
 0x2f4   : > { %1259 = vst.msk [vmem:[%s2769_s18] sm:$0xff] %vm1016_vm2, %v1252_v29  ;;  %v1263_v30 = vpack.c.bf16 %v1252_v29, %v1252_v29 }
 0x2f5   : > { %v2388_v31 = vpop.eup %2387 }
 0x2f6   : > { %2239 = vmatmul.mubr.msk.bf16.vlgmr.msra.gmra.mxu0 %vm1016_vm2, %v1263_v30  ;;  %v1254_v34 = vmul.f32 %v2388_v31, %v2380_v15 }
 0x2f7   : > { %2249 = vmatpush3.bf16.msra.mxu0 %v1368_v32  ;;  %2250 = vmatprep.mubr.msk.bf16.mxu0 %vm2460_vm0, %v2459_v1 }
 0x2f8   : > { %1260 = vst.msk [vmem:[%s2769_s18 + $0x8] sm:$0xff] %vm1016_vm2, %v1254_v34  ;;  %v1264_v20 = vpack.c.bf16 %v1254_v34, %v1254_v34  ;;  %2260 = vmatprep.subr.bf16.mxu0 %v2459_v1 }
 0x2f9   : > { %v2390_v35 = vpop.eup %2389 }
 0x2fa   : > { %2245 = vmatmul.mubr.msk.bf16.vlgmr.msra.gmra.mxu1 %vm1016_vm2, %v1264_v20  ;;  %v1256_v37 = vmul.f32 %v2390_v35, %v2382_v17 }
 0x2fb   : > { %2255 = vmatpush3.bf16.msra.mxu1 %v1414_v24  ;;  %2256 = vmatprep.mubr.msk.bf16.mxu1 %vm2460_vm0, %v2459_v1 }
 0x2fc   : > { %1261 = vst.msk [vmem:[%s2769_s18 + $0x10] sm:$0xff] %vm1016_vm2, %v1256_v37  ;;  %v1265_v38 = vpack.c.bf16 %v1256_v37, %v1256_v37  ;;  %2266 = vmatprep.subr.bf16.mxu1 %v2459_v1  ;;  %v2371_v37 = vld [vmem:[%s2940_s4 + $0x8] sm:$0xff]  }
 0x2fd   : > { %v2392_v40 = vpop.eup %2391 }
 0x2fe   : > { %2251 = vmatmul.mubr.msk.bf16.vlgmr.msra.gmra.mxu0 %vm1016_vm2, %v1265_v38  ;;  %v1258_v41 = vmul.f32 %v2392_v40, %v2384_v19  ;;  %v2373_v38 = vld [vmem:[%s2941_s5 + $0x18] sm:$0xff]  }
 0x2ff   : > { %2261 = vmatpush3.bf16.msra.mxu0 %v1468_v39  ;;  %2262 = vmatprep.mubr.msk.bf16.mxu0 %vm2460_vm0, %v2459_v1  ;;  %v2374_v39 = vld [vmem:[%s2941_s5 + $0x10] sm:$0xff]  }
 0x300   : > { %1262 = vst.msk [vmem:[%s2769_s18 + $0x18] sm:$0xff] %vm1016_vm2, %v1258_v41  ;;  %v1266_v42 = vpack.c.bf16 %v1258_v41, %v1258_v41  ;;  %2272 = vmatprep.subr.bf16.mxu0 %v2459_v1  ;;  %s2401_s18 = sshll.u32 %s2461_s9, 4  ;;  %s2402_s18 = int_to_ptr.vmem [resolvable:$false] %s2401_s18 }
 0x301   : > { %s2403_s17 = scalar_lea.vmem %s2402_s18, 1024  ;;  %p2404_p0 = scmp.lt.s32.totalorder %s2880_s21, %s2402_s18 }
 0x302   : > { %2257 = vmatmul.mubr.msk.bf16.vlgmr.msra.gmra.mxu1 %vm1016_vm2, %v1266_v42  ;;  %p2405_p1 = scmp.lt.s32.totalorder %s2403_s17, %s2397_s12 }
 0x303   : > { %2268 = vmatprep.mubr.msk.bf16.mxu1 %vm2460_vm0, %v2459_v1  ;;  %2267 = vmatpush3.bf16.msra.mxu1 %v1514_v44  ;;  %v2028_v44 = vld [vmem:[%s2942_s6] ss:$0 sm:$0xff] }
 0x304   : > { %2278 = vmatprep.subr.bf16.mxu1 %v2459_v1  ;;  %p2406_p2 = por %p2405_p1, %p2404_p0 }
 0x306   : > { %p2407_p3 = pnand %p2406_p2, %p2400_p13 }
 0x3b6   : > { %v1312_v46 = vpop.f32.mrf.mxu0 }
 0x3b7   : > { %v1456_v47 = vpack.c.bf16 %v1312_v46, %v1312_v46  ;;  %v2029_v46 = vld [vmem:[%s2942_s6 + $0x1] ss:$0 sm:$0xff] }
 0x3b8   : > { %v2240_v49 = vpop.f32.mrf.mxu0 }
 0x3b9   : > { %2263 = vmatmul.mubr.msk.bf16.vlgmr.msra.gmra.mxu0 %vm1016_vm2, %v1456_v47 }
 0x3ba   : > { %v1315_v51 = vpop.f32.mrf.mxu0  ;;  %v1358_v52 = vpop.f32.mrf.mxu1  ;;  %2273 = vmatpush3.bf16.msra.mxu0 %v1560_v48  ;;  %2274 = vmatprep.mubr.msk.bf16.mxu0 %vm2460_vm0, %v2459_v1 }
 0x3bb   : > { %v1457_v53 = vpack.c.bf16 %v1358_v52, %v1358_v52  ;;  %2284 = vmatprep.subr.bf16.mxu0 %v2459_v1  ;;  %v2376_v51 = vld [vmem:[%s2941_s5] sm:$0xff]  }
 0x3bc   : > { %v2241_v55 = vpop.f32.mrf.mxu0  ;;  %v2246_v56 = vpop.f32.mrf.mxu1  ;;  %v2030_v52 = vld [vmem:[%s2942_s6 + $0x2] ss:$0 sm:$0xff] }
 0x3bd   : > { %2269 = vmatmul.mubr.msk.bf16.vlgmr.msra.gmra.mxu1 %vm1016_vm2, %v1457_v53 }
 0x3be   : > { %v1361_v57 = vpop.f32.mrf.mxu1  ;;  %v1404_v58 = vpop.f32.mrf.mxu0  ;;  %2279 = vmatpush3.bf16.msra.mxu1 %v1606_v54  ;;  %2280 = vmatprep.mubr.msk.bf16.mxu1 %vm2460_vm0, %v2459_v1 }
 0x3bf   : > { %v1458_v59 = vpack.c.bf16 %v1404_v58, %v1404_v58  ;;  %2292 = vmatprep.subr.bf16.mxu1 %v2459_v1 }
 0x3c0   : > { %v2247_v60 = vpop.f32.mrf.mxu1  ;;  %v2252_v61 = vpop.f32.mrf.mxu0 }
 0x3c1   : > { %2275 = vmatmul.mubr.msk.bf16.vlgmr.msra.gmra.mxu0 %vm1016_vm2, %v1458_v59 }
 0x3c2   : > { %v1407_v62 = vpop.f32.mrf.mxu0  ;;  %v1450_v63 = vpop.f32.mrf.mxu1  ;;  %2288 = vmatprep.mubr.msk.bf16.mxu0 %vm2460_vm0, %v2459_v1  ;;  %2285 = vmatpush3.bf16.msra.mxu0 %v2371_v37 }
 0x3c3   : > { %v1459_v0 = vpack.c.bf16 %v1450_v63, %v1450_v63  ;;  %2286 = vmatprep.subr.bf16.mxu0 %v2459_v1 }
 0x3c4   : > { %v2253_v2 = vpop.f32.mrf.mxu0  ;;  %v2258_v3 = vpop.f32.mrf.mxu1 }
 0x3c5   : > { %2281 = vmatmul.mubr.msk.bf16.vlgmr.msra.gmra.mxu1 %vm1016_vm2, %v1459_v0 }
 0x3c6   : > { %v1453_v4 = vpop.f32.mrf.mxu1  ;;  %2300 = vmatprep.mubr.msk.bf16.mxu1 %vm2460_vm0, %v2459_v1  ;;  %2293 = vmatpush3.bf16.msra.mxu1 %v2373_v38 }
 0x3c7   : > { %2294 = vmatprep.subr.bf16.mxu1 %v2459_v1 }
 0x3c8   : > { %v2259_v5 = vpop.f32.mrf.mxu1 }
 0x3ca   : > { %2295 = vmatpush3.bf16.msra.mxu1 %v2374_v39 }
 0x3cb   : > { %2296 = vmatprep.subr.bf16.mxu1 %v2459_v1 }
 0x3ce   : > { %2297 = vmatpush3.bf16.msra.mxu1 %v2375_v50 }
 0x3cf   : > { %2298 = vmatprep.subr.bf16.mxu1 %v2459_v1  ;;  %v2034_v1 = vld [vmem:[%s2942_s6 + $0x3] ss:$0 sm:$0xff] }
 0x3d2   : > { %2299 = vmatpush3.bf16.msra.mxu1 %v2376_v51 }
 0x479   : > { %v1504_v6 = vpop.f32.mrf.mxu0 }
 0x47a   : > { %v1648_v16 = vsel %vm392_vm1, %v1504_v6, 0.0 }
 0x47b   : > { %v2264_v8 = vpop.f32.mrf.mxu0 }
 0x47d   : > { %v1507_v9 = vpop.f32.mrf.mxu0  ;;  %v1550_v10 = vpop.f32.mrf.mxu1 }
 0x47e   : > { %v1649_v13 = vsel %vm392_vm1, %v1550_v10, 0.0 }
 0x47f   : > { %v2265_v11 = vpop.f32.mrf.mxu0  ;;  %v2270_v12 = vpop.f32.mrf.mxu1  ;;  %v1650_v18 = vadd.f32 %v1649_v13, %v1648_v16 }
 0x481   : > { %v1553_v14 = vpop.f32.mrf.mxu1  ;;  %v1596_v15 = vpop.f32.mrf.mxu0 }
 0x482   : > { %v1651_v17 = vsel %vm392_vm1, %v1596_v15, 0.0 }
 0x483   : > { %v2271_v19 = vpop.f32.mrf.mxu1  ;;  %v2276_v21 = vpop.f32.mrf.mxu0  ;;  %v1652_v22 = vadd.f32 %v1651_v17, %v1650_v18 }
 0x485   : > { %v1599_v23 = vpop.f32.mrf.mxu0  ;;  %v1642_v25 = vpop.f32.mrf.mxu1 }
 0x486   : > { %v1653_v26 = vsel %vm392_vm1, %v1642_v25, 0.0 }
 0x487   : > { %v1654_v27 = vadd.f32 %v1653_v26, %v1652_v22  ;;  %v2277_v28 = vpop.f32.mrf.mxu0  ;;  %v2282_v29 = vpop.f32.mrf.mxu1 }
 0x489   : > { %v1645_v30 = vpop.f32.mrf.mxu1  ;;  %v1661_v31 = vadd.f32 %v1654_v27, %v2594_v7  ;;  %v2372_v7 = vld [vmem:[%s2940_s4] sm:$0xff]  }
 0x48a   : > { %2287 = vmatpush3.bf16.msra.mxu0 %v2372_v7 }
 0x48b   : > { %v2283_v32 = vpop.f32.mrf.mxu1  ;;  %v1662_v33 = vsel %vm392_vm1, %v1661_v31, 0.0 }
 0x48c   : > { %1663 = vadd.xlane.f32.xlu0 %v1662_v33 }
 0x515   : > { %v1664_v34 = vpop.xlane.xlu0 %1663 }
 0x516   : > { %v1666_v20 = vmul.f32 0.03125, %v1664_v34 }
 0x518   : > { %v1667_v35 = vsub.f32 %v1661_v31, %v1666_v20 }
 0x51a   : > { %v1668_v36 = vmul.f32 %v1667_v35, %v1667_v35 }
 0x51c   : > { %v1669_v24 = vsel %vm392_vm1, %v1668_v36, 0.0 }
 0x51d   : > { %1670 = vadd.xlane.f32.xlu1 %v1669_v24 }
 0x5a6   : > { %v1671_v40 = vpop.xlane.xlu1 %1670 }
 0x5a7   : > { %v1672_v41 = vmul.f32 0.03125, %v1671_v40 }
 0x5a9   : > { %v1673_v42 = vadd.f32 1e-12, %v1672_v41 }
 0x5ab   : > { %2393 = vrsqrt.f32 %v1673_v42 }
 0x5b8   : > { %v2394_v43 = vpop.eup %2393 }
 0x5b9   : > { %v1675_v45 = vmul.f32 %v2394_v43, %v1667_v35 }
 0x5bb   : > { %v1680_v47 = vmul.f32 %v2028_v44, %v1675_v45 }
 0x5bd   : > { %v1685_v48 = vadd.f32 %v2029_v46, %v1680_v47 }
 0x5bf   : > { %v1686_v49 = vpack.c.bf16 %v1685_v48, %v1685_v48 }
 0x5c1   : > { %2289 = vmatmul.mubr.msk.bf16.vlgmr.msra.gmra.mxu0 %vm392_vm1, %v1686_v49 }
 0x681   : > { %v1744_v53 = vpop.f32.mrf.mxu0 }
 0x682   : > { %v1745_v54 = vadd.f32 %v2030_v52, %v1744_v53 }
 0x683   : > { %v2290_v55 = vpop.f32.mrf.mxu0 }
 0x684   : > { %v1750_v56 = vmax.f32 %v1745_v54, 0.0 }
 0x685   : > { %v1747_v57 = vpop.f32.mrf.mxu0 }
 0x686   : > { %v1751_v58 = vpack.c.bf16 %v1750_v56, %v1750_v56 }
 0x687   : > { %v2291_v59 = vpop.f32.mrf.mxu0 }
 0x688   : > { %2301 = vmatmul.mubr.msk.bf16.vlgmr.msra.gmra.mxu1 %vm1788_vm5, %v1751_v58 }
 0x748   : > { %v1826_v60 = vpop.f32.mrf.mxu1 }
 0x749   : > { %v1827_v61 = vadd.f32 %v2034_v1, %v1826_v60 }
 0x74a   : > { %v2302_v62 = vpop.f32.mrf.mxu1 }
 0x74b   : > { %v1832_v63 = vadd.f32 %v1827_v61, %v1685_v48 }
 0x74c   : > { %v1829_v0 = vpop.f32.mrf.mxu1 }
 0x74d   : > { %v1833_v2 = vsel %vm392_vm1, %v1832_v63, 0.0 }
 0x74e   : > { %1834 = vadd.xlane.f32.xlu0 %v1833_v2  ;;  %v2303_v3 = vpop.f32.mrf.mxu1 }
 0x7d7   : > { %v1835_v4 = vpop.xlane.xlu0 %1834 }
 0x7d8   : > { %v1836_v5 = vmul.f32 0.03125, %v1835_v4 }
 0x7da   : > { %v1837_v6 = vsub.f32 %v1832_v63, %v1836_v5 }
 0x7dc   : > { %v1838_v8 = vmul.f32 %v1837_v6, %v1837_v6 }
 0x7de   : > { %v1839_v9 = vsel %vm392_vm1, %v1838_v8, 0.0 }
 0x7df   : > { %1840 = vadd.xlane.f32.xlu1 %v1839_v9 }
 0x7e0   : > { %2410 = shalt.err (!%p2407_p3)
}
 0x7e1   : > { %s2411_s13 = scalar_lea.hbm %s2878_s24, 512  ;;  %s2415_s22 = scalar_lea.hbm %s2944_s8, 1024 }
 0x7e2   : > { %p2412_p4 = scmp.ne.s32.totalorder %s2878_s24, %s2411_s13  ;;  %p2416_p9 = scmp.lt.s32.totalorder %s2878_s24, %s2944_s8 }
 0x7e3   : > { %p2417_p10 = scmp.lt.s32.totalorder %s2415_s22, %s2411_s13 }
 0x7e4   : > { %p2413_p7 = pnand %p2412_p4, %p2547_p5 }
 0x7e5   : > { %p2418_p11 = por %p2417_p10, %p2416_p9 }
 0x7e6   : > { %p2414_p8 = pneg %p2413_p7 }
 0x7e8   : > { %p2419_p12 = pnand %p2418_p11, %p2414_p8 }
 0x7ea   : > { %2422 = shalt.err (!%p2419_p12)
}
 0x7eb   : > { %s2462_s12 = smov 128   ;;  %s2463_s18 = smov 8   ;;  %v2040_v14 = vld [vmem:[%s2942_s6 + $0x4] ss:$0 sm:$0xff]  ;;  %v2041_v16 = vld [vmem:[%s2942_s6 + $0x5] ss:$0 sm:$0xff] }
 0x7ec   : > { %2304 = dma.vmem_to_hbm [thread:$0]  (%p2547_p5), %s2880_s21, 512, %s2878_s24, %s2884_s10, %s2462_s12, %s2462_s12, %s2463_s18  }
 0x7ed   : > { %s325_s15 = scalar_lea.vmem %s2943_s7, %s1978_s26 }
 0x868   : > { %v1841_v10 = vpop.xlane.xlu1 %1840 }
 0x869   : > { %v1842_v11 = vmul.f32 0.03125, %v1841_v10 }
 0x86b   : > { %v1843_v12 = vadd.f32 1e-12, %v1842_v11 }
 0x86d   : > { %2395 = vrsqrt.f32 %v1843_v12 }
 0x87a   : > { %v2396_v13 = vpop.eup %2395 }
 0x87b   : > { %v1845_v15 = vmul.f32 %v2396_v13, %v1837_v6 }
 0x87d   : > { %v1850_v17 = vmul.f32 %v2040_v14, %v1845_v15 }
 0x87f   : > { %v1855_v18 = vadd.f32 %v2041_v16, %v1850_v17 }
 0x881   : > { %1856 = vst.msk [vmem:[%s325_s15] sm:$0xff] %vm392_vm1, %v1855_v18 }
 0x882 PF: > { %p2310_p5 = scmp.ge.s32.totalorder %s2457_s30, 2  ;;  %s1900_s21 = sand.u32 1, %s2445_s27  }
 0x883   : > { %s1901_s24 = scalar_lea.sflag [#allocation3], %s1900_s21 }
 0x884   : > { %p2307_p13 = pnand %p2310_p5, %p2551_p6 }
 0x886   : > { %p2308_p0 = pneg %p2307_p13 }
 0x888   : > { %2440 = dma.done.wait (%p2308_p0), %s1901_s24, 512  }
 0x889   : > { %2442 = vsyncadd (%p2308_p0), %s1901_s24, 4294966784  ;;  %p19_p1 = scmp.ge.s32.totalorder %s2534_s11, 4   ;;  %s2947_s27 = smov %s2449_s28 }
 0x88a   : > { %s2948_s28 = smov %s2453_s29  ;;  %s2949_s29 = smov %s2545_s14 }
 0x88b   : > { %s2950_s30 = smov %s2534_s11  ;;  %21 = sbr.rel (!%p19_p1) target bundleno = 3 (0x3), region = 98 }
 0x890   :  { %1906 = vsyncpa [#allocation3], 1 }
 0x891   :  { %1908 = vsyncpa [#allocation3 + $0x1], 1 }

// kernel: transformer_forward.7
= control target key start
LH: loop header
LB: loop body
LE: loop exit
PB: predicated region body
PF: predicated region fallthrough
CT: control target
= control target key end

     0   :  { %s5264_s0 = inlined_call_operand.vmem [shape: f32[2,8,32], index: 0, kind: input, shape index: {}]   ;;  %s5265_s1 = inlined_call_operand.vmem [shape: f32[2,8,32], index: 1, kind: input, shape index: {}]   ;;  %s5266_s2 = inlined_call_operand.vmem [shape: f32[2,1,8,8], index: 2, kind: input, shape index: {}]   ;;  %s5267_s3 = inlined_call_operand.vmem [shape: f32[2,1,1,8], index: 3, kind: input, shape index: {}]   ;;  %s5268_s4 = inlined_call_operand.vmem [shape: bf16[12,32,8], index: 4, kind: input, shape index: {}]   ;;  %s5269_s5 = inlined_call_operand.vmem [shape: bf16[4,8,32], index: 5, kind: input, shape index: {}]   ;;  %s5270_s6 = inlined_call_operand.vmem [shape: bf16[4,32,8], index: 6, kind: input, shape index: {}]   ;;  %s5271_s7 = inlined_call_operand.vmem [shape: bf16[8,32,8], index: 7, kind: input, shape index: {}]   ;;  %s5272_s8 = inlined_call_operand.vmem [shape: bf16[4,8,32], index: 8, kind: input, shape index: {}]   ;;  %s5273_s9 = inlined_call_operand.vmem [shape: bf16[32,64], index: 9, kind: input, shape index: {}]   ;;  %s5274_s10 = inlined_call_operand.vmem [shape: bf16[64,32], index: 10, kind: input, shape index: {}]   ;;  %s5275_s11 = inlined_call_operand.vmem [shape: f32[8,64], index: 11, kind: input, shape index: {}]   ;;  %s5276_s12 = inlined_call_operand.vmem [shape: f32[2,8,32], index: 12, kind: output, shape index: {0}]   ;;  %s5277_s13 = inlined_call_operand.hbm [shape: f32[2,4,8,8], index: 13, kind: output, shape index: {1}]   ;;  %s5278_s14 = inlined_call_operand.hbm [shape: f32[2,4,8,8], index: 14, kind: output, shape index: {2}]  }
   0x1   :  { %5282 = sst [smem:[#allocation10_spill]] %s5264_s0 }
   0x2   :  { %5283 = sst [smem:[#allocation11_spill]] %s5265_s1 }
   0x3   :  { %5284 = sst [smem:[#allocation12_spill]] %s5266_s2 }
   0x4   :  { %5285 = sst [smem:[#allocation13_spill]] %s5267_s3 }
   0x5   :  { %5286 = sst [smem:[#allocation14_spill]] %s5268_s4 }
   0x6   :  { %5287 = sst [smem:[#allocation15_spill]] %s5269_s5 }
   0x7   :  { %5288 = sst [smem:[#allocation16_spill]] %s5270_s6 }
   0x8   :  { %20 = vsyncpa [#allocation3], 0 }
   0x9   :  { %22 = vsyncpa [#allocation3 + $0x1], 0 }
   0xa   :  { %23 = vsyncpa [#allocation5], 0 }
   0xb   :  { %25 = vsyncpa [#allocation5 + $0x1], 0  ;;  %s4534_s29 = smov 0   ;;  %s4536_s30 = smov 0  }
   0xc   :  { %s4538_s15 = smov 0   ;;  %s4540_s16 = smov 0  }
   0xd LB: > { %5289 = sst [smem:[#allocation8_spill]] %s4447_s15  ;;  %s4555_s17 = sadd.s32 4294967295, %s4451_s16   ;;  %s4451_s16 = sphi %s4540_s16, %s5307_s16   ;;  %s4447_s15 = sphi %s4538_s15, %s5304_s15   ;;  %s4443_s30 = sphi %s4536_s30, %s5306_s30   ;;  %s4439_s29 = sphi %s4534_s29, %s5305_s29  }
   0xe   : > { %s3605_s18 = sadd.s32 4294967294, %s4451_s16   ;;  %s4559_s19 = sadd.s32 1, %s4451_s16  }
   0xf   : > { %s336_s20 = sadd.s32 1, %s4447_s15  ;;  %s333_s21 = ssub.s32 %s4451_s16, %s4559_s19 }
  0x10   : > { %p346_p0 = scmp.ne.s32.totalorder %s4447_s15, %s4443_s30  ;;  %p334_p1 = scmp.eq.s32.totalorder %s333_s21, 0 }
  0x11   : > { %p347_p2 = scmp.eq.s32.totalorder %s4555_s17, 1  ;;  %p352_p3 = scmp.ne.s32.totalorder %s4443_s30, %s4439_s29 }
  0x12   : > { %p353_p4 = scmp.eq.s32.totalorder %s3605_s18, 1  ;;  %p3608_p7 = scmp.ge.s32.totalorder %s4451_s16, 1 }
  0x13   : > { %s4570_s22 = scalar_select %p334_p1, %s4447_s15, %s336_s20  }
  0x14   : > { %p4572_p5 = por %p347_p2, %p346_p0  ;;  %p4576_p6 = por %p353_p4, %p352_p3 }
  0x15   : > { %5290 = sst [smem:[#allocation9_spill]] %s4570_s22  ;;  %p448_p8 = scmp.lt.s32.totalorder %s4451_s16, 3 }
  0x17   : > { %p449_p9 = pnand %p3608_p7, %p448_p8 }
  0x18   : > { %s5293_s4 = sld [smem:[#allocation14_spill]] (!%p449_p9)  ;;  %p513_p10 = scmp.lt.s32.totalorder (!%p449_p9), %s4555_s17, 1 }
  0x19   : > { %452 = sbr.rel (%p449_p9) target bundleno = 3633 (0xe31), region = 68  ;;  %s5294_s0 = sld [smem:[#allocation10_spill]] (!%p449_p9) }
  0x1a   : > { %s5295_s2 = sld [smem:[#allocation12_spill]] (!%p449_p9)  ;;  %s5281_s22 = sshll.u32 (!%p449_p9), %s4555_s17, 9 }
  0x1b   : > { %s5296_s5 = sld [smem:[#allocation15_spill]] (!%p449_p9)  ;;  %s4455_s15 = smov (!%p449_p9), [#allocation2]  }
  0x1c   : > { %s5297_s6 = sld [smem:[#allocation16_spill]] (!%p449_p9) }
  0x1d   : > { %s5298_s1 = sld [smem:[#allocation11_spill]] (!%p449_p9) }
  0x1e   : > { %v4269_v0 = vld [vmem:[%s5293_s4 + $0x8] sm:$0xff]   ;;  %v4453_v1 = vmov 0.0   ;;  %v4270_v2 = vld [vmem:[%s5293_s4 + $0x18] sm:$0xff]   ;;  %v4271_v3 = vld [vmem:[%s5293_s4] sm:$0xff]   ;;  %vm4454_vm0 = vmmov 0   ;;  %s4604_s26 = scalar_select %p513_p10, %s4555_s17, 1 }
  0x1f   : > { %3865 = vmatprep.subr.bf16.mxu0 %v4453_v1  ;;  %3873 = vmatprep.subr.bf16.mxu1 %v4453_v1  ;;  %v4272_v4 = vld [vmem:[%s5293_s4 + $0x10] sm:$0xff]   ;;  %v4273_v5 = vld [vmem:[%s5293_s4 + $0x28] sm:$0xff]   ;;  %v4274_v6 = vld [vmem:[%s5293_s4 + $0x38] sm:$0xff]   ;;  %vm610_vm1 = vcmask 261120   ;;  %vm1234_vm2 = vcmask 64512   ;;  %vm1486_vm3 = vcmask 1043456  }
  0x20   : > { %3866 = vmatpush3.bf16.msra.mxu0 %v4269_v0  ;;  %3869 = vmatprep.mubr.msk.bf16.mxu0 %vm4454_vm0, %v4453_v1  ;;  %s4607_s27 = sshll.u32 %s4604_s26, 3  ;;  %v4275_v9 = vld [vmem:[%s5293_s4 + $0x20] sm:$0xff]   ;;  %v4276_v10 = vld [vmem:[%s5293_s4 + $0x30] sm:$0xff]   ;;  %v4277_v11 = vld [vmem:[%s5293_s4 + $0x48] sm:$0xff]   ;;  %s5299_s3 = sld [smem:[#allocation13_spill]]  ;;  %vm3343_vm6 = vcmask 523264  }
  0x21   : > { %3874 = vmatpush3.bf16.msra.mxu1 %v4270_v2  ;;  %3867 = vmatprep.subr.bf16.mxu0 %v4453_v1  ;;  %s516_s25 = scalar_lea.vmem %s5294_s0, %s4607_s27  ;;  %v4278_v12 = vld [vmem:[%s5293_s4 + $0x58] sm:$0xff]   ;;  %v4279_v13 = vld [vmem:[%s5293_s4 + $0x40] sm:$0xff]   ;;  %v4280_v14 = vld [vmem:[%s5293_s4 + $0x50] sm:$0xff]   ;;  %s524_s21 = scalar_lea.vmem %s5295_s2, %s4607_s27 }
  0x22   : > { %3875 = vmatprep.subr.bf16.mxu1 %v4453_v1  ;;  %3877 = vmatprep.mubr.msk.bf16.mxu1 %vm4454_vm0, %v4453_v1  ;;  %v4620_v7 = vld [vmem:[%s516_s25] sm:$0xff]  ;;  %v4281_v15 = vld [vmem:[%s5293_s4 + $0x68] sm:$0xff]   ;;  %v4282_v16 = vld [vmem:[%s5293_s4 + $0x78] sm:$0xff]   ;;  %s4791_s25 = sand.u32 1, %s4443_s30  }
  0x23   : > { %v4625_v8 = vpack.c.bf16 %v4620_v7, %v4620_v7  ;;  %v4283_v17 = vld [vmem:[%s5293_s4 + $0x60] sm:$0xff]   ;;  %v4284_v18 = vld [vmem:[%s5293_s4 + $0x70] sm:$0xff]   ;;  %v4285_v19 = vld [vmem:[%s5293_s4 + $0x88] sm:$0xff]   ;;  %s5280_s28 = sshll.u32 %s4791_s25, 5  ;;  %s520_s2 = scalar_lea.vmem %s5298_s1, %s4607_s27 }
  0x24   : > { %3868 = vmatpush3.bf16.msra.mxu0 %v4271_v3  ;;  %v4286_v20 = vld [vmem:[%s5293_s4 + $0x80] sm:$0xff]   ;;  %v4287_v21 = vld [vmem:[%s5293_s4 + $0x98] sm:$0xff]   ;;  %v4288_v22 = vld [vmem:[%s5293_s4 + $0x90] sm:$0xff]   ;;  %s4798_s18 = scalar_lea.vmem [#allocation2], %s5280_s28  ;;  %s4365_s1 = sshll.u32 %s4455_s15, 4  ;;  %s4366_s1 = int_to_ptr.vmem [resolvable:$false] %s4365_s1 }
  0x25   : > { %3876 = vmatpush3.bf16.msra.mxu1 %v4272_v4  ;;  %3881 = vmatprep.subr.bf16.mxu0 %v4453_v1  ;;  %v4289_v23 = vld [vmem:[%s5293_s4 + $0xa8] sm:$0xff]   ;;  %v4290_v24 = vld [vmem:[%s5293_s4 + $0xa0] sm:$0xff]   ;;  %v4291_v25 = vld [vmem:[%s5293_s4 + $0xb8] sm:$0xff]   ;;  %s3438_s28 = sshll.u32 %s4798_s18, 4  ;;  %s5173_s28 = int_to_ptr.vmem [resolvable:$true] %s3438_s28 }
  0x26   : > { %3889 = vmatprep.subr.bf16.mxu1 %v4453_v1  ;;  %v4292_v26 = vld [vmem:[%s5293_s4 + $0xb0] sm:$0xff]   ;;  %s527_s0 = scalar_lea.vmem %s5299_s3, %s4604_s26  ;;  %s5300_s26 = sshll.u32 %s4791_s25, 5 }
  0x27   : > { %3870 = vmatmul.mubr.msk.bf16.vlgmr.msra.gmra.mxu0 %vm610_vm1, %v4625_v8  ;;  %s5058_s4 = scalar_lea.vmem [#allocation4], %s5300_s26  ;;  %p4368_p0 = scmp.lt.s32.totalorder %s5173_s28, %s4366_s1 }
  0x28   : > { %3878 = vmatmul.mubr.msk.bf16.vlgmr.msra.gmra.mxu1 %vm610_vm1, %v4625_v8  ;;  %3882 = vmatpush3.bf16.msra.mxu0 %v4273_v5 }
  0x29   : > { %3890 = vmatpush3.bf16.msra.mxu1 %v4274_v6  ;;  %3883 = vmatprep.subr.bf16.mxu0 %v4453_v1 }
  0x2a   : > { %3891 = vmatprep.subr.bf16.mxu1 %v4453_v1  ;;  %3885 = vmatprep.mubr.msk.bf16.mxu0 %vm4454_vm0, %v4453_v1 }
  0x2b   : > { %3893 = vmatprep.mubr.msk.bf16.mxu1 %vm4454_vm0, %v4453_v1 }
  0x2c   : > { %3884 = vmatpush3.bf16.msra.mxu0 %v4275_v9 }
  0x2d   : > { %3892 = vmatpush3.bf16.msra.mxu1 %v4276_v10  ;;  %3897 = vmatprep.subr.bf16.mxu0 %v4453_v1 }
  0x2e   : > { %3905 = vmatprep.subr.bf16.mxu1 %v4453_v1 }
  0x2f   : > { %3886 = vmatmul.mubr.msk.bf16.vlgmr.msra.gmra.mxu0 %vm610_vm1, %v4625_v8 }
  0x30   : > { %3894 = vmatmul.mubr.msk.bf16.vlgmr.msra.gmra.mxu1 %vm610_vm1, %v4625_v8  ;;  %3898 = vmatpush3.bf16.msra.mxu0 %v4277_v11 }
  0x31   : > { %3906 = vmatpush3.bf16.msra.mxu1 %v4278_v12  ;;  %3899 = vmatprep.subr.bf16.mxu0 %v4453_v1 }
  0x32   : > { %3907 = vmatprep.subr.bf16.mxu1 %v4453_v1  ;;  %3901 = vmatprep.mubr.msk.bf16.mxu0 %vm4454_vm0, %v4453_v1 }
  0x33   : > { %3909 = vmatprep.mubr.msk.bf16.mxu1 %vm4454_vm0, %v4453_v1 }
  0x34   : > { %3900 = vmatpush3.bf16.msra.mxu0 %v4279_v13 }
  0x35   : > { %3908 = vmatpush3.bf16.msra.mxu1 %v4280_v14  ;;  %3913 = vmatprep.subr.bf16.mxu0 %v4453_v1 }
  0x36   : > { %3921 = vmatprep.subr.bf16.mxu1 %v4453_v1 }
  0x37   : > { %3902 = vmatmul.mubr.msk.bf16.vlgmr.msra.gmra.mxu0 %vm610_vm1, %v4625_v8 }
  0x38   : > { %3910 = vmatmul.mubr.msk.bf16.vlgmr.msra.gmra.mxu1 %vm610_vm1, %v4625_v8  ;;  %3914 = vmatpush3.bf16.msra.mxu0 %v4281_v15 }
  0x39   : > { %3922 = vmatpush3.bf16.msra.mxu1 %v4282_v16  ;;  %3915 = vmatprep.subr.bf16.mxu0 %v4453_v1 }
  0x3a   : > { %3923 = vmatprep.subr.bf16.mxu1 %v4453_v1  ;;  %3917 = vmatprep.mubr.msk.bf16.mxu0 %vm4454_vm0, %v4453_v1 }
  0x3b   : > { %3925 = vmatprep.mubr.msk.bf16.mxu1 %vm4454_vm0, %v4453_v1 }
  0x3c   : > { %3916 = vmatpush3.bf16.msra.mxu0 %v4283_v17 }
  0x3d   : > { %3924 = vmatpush3.bf16.msra.mxu1 %v4284_v18  ;;  %3929 = vmatprep.subr.bf16.mxu0 %v4453_v1 }
  0x3e   : > { %3937 = vmatprep.subr.bf16.mxu1 %v4453_v1 }
  0x3f   : > { %3918 = vmatmul.mubr.msk.bf16.vlgmr.msra.gmra.mxu0 %vm610_vm1, %v4625_v8 }
  0x40   : > { %3926 = vmatmul.mubr.msk.bf16.vlgmr.msra.gmra.mxu1 %vm610_vm1, %v4625_v8  ;;  %3930 = vmatpush3.bf16.msra.mxu0 %v4285_v19 }
  0x41   : > { %3933 = vmatprep.mubr.msk.bf16.mxu0 %vm4454_vm0, %v4453_v1  ;;  %3931 = vmatprep.subr.bf16.mxu0 %v4453_v1 }
  0x42   : > { %3941 = vmatprep.mubr.msk.bf16.mxu1 %vm4454_vm0, %v4453_v1  ;;  %3938 = vmatpush3.bf16.msra.mxu1 %v4287_v21 }
  0x43   : > { %3939 = vmatprep.subr.bf16.mxu1 %v4453_v1 }
  0x44   : > { %3932 = vmatpush3.bf16.msra.mxu0 %v4286_v20 }
  0x45   : > { %3945 = vmatprep.subr.bf16.mxu0 %v4453_v1 }
  0x46   : > { %3940 = vmatpush3.bf16.msra.mxu1 %v4288_v22 }
  0x47   : > { %3934 = vmatmul.mubr.msk.bf16.vlgmr.msra.gmra.mxu0 %vm610_vm1, %v4625_v8  ;;  %3953 = vmatprep.subr.bf16.mxu1 %v4453_v1 }
  0x48   : > { %3946 = vmatpush3.bf16.msra.mxu0 %v4289_v23  ;;  %3949 = vmatprep.mubr.msk.bf16.mxu0 %vm4454_vm0, %v4453_v1 }
  0x49   : > { %3947 = vmatprep.subr.bf16.mxu0 %v4453_v1  ;;  %3942 = vmatmul.mubr.msk.bf16.vlgmr.msra.gmra.mxu1 %vm610_vm1, %v4625_v8 }
  0x4a   : > { %3954 = vmatpush3.bf16.msra.mxu1 %v4291_v25  ;;  %3957 = vmatprep.mubr.msk.bf16.mxu1 %vm4454_vm0, %v4453_v1 }
  0x4b   : > { %3955 = vmatprep.subr.bf16.mxu1 %v4453_v1 }
  0x4c   : > { %3948 = vmatpush3.bf16.msra.mxu0 %v4290_v24 }
  0x4d   : > { %3961 = vmatprep.subr.bf16.mxu0 %v4453_v1 }
  0x4e   : > { %3956 = vmatpush3.bf16.msra.mxu1 %v4292_v26 }
  0x4f   : > { %3950 = vmatmul.mubr.msk.bf16.vlgmr.msra.gmra.mxu0 %vm610_vm1, %v4625_v8  ;;  %3967 = vmatprep.subr.bf16.mxu1 %v4453_v1 }
  0x50   : > { %3963 = vmatprep.mubr.msk.bf16.mxu0 %vm4454_vm0, %v4453_v1 }
  0x51   : > { %3958 = vmatmul.mubr.msk.bf16.vlgmr.msra.gmra.mxu1 %vm610_vm1, %v4625_v8 }
  0x52   : > { %3969 = vmatprep.mubr.msk.bf16.mxu1 %vm4454_vm0, %v4453_v1 }
  0xe7   : > { %v648_v27 = vpop.f32.mrf.mxu0 }
  0xe8   : > { %v700_v28 = vpop.f32.mrf.mxu1  ;;  %v1226_v57 = vpack.c.bf16 %v648_v27, %v648_v27 }
  0xe9   : > { %v3871_v29 = vpop.f32.mrf.mxu0  ;;  %v1227_v58 = vpack.c.bf16 %v700_v28, %v700_v28 }
  0xea   : > { %v3879_v30 = vpop.f32.mrf.mxu1  ;;  %v535_v29 = vld [vmem:[%s524_s21] sm:$0xff]  ;;  %s4361_s21 = scalar_lea.vmem %s5173_s28, 512 }
  0xeb   : > { %v651_v31 = vpop.f32.mrf.mxu0  ;;  %vm536_vm4 = vcmp.gt.f32.partialorder %v535_v29, 0.0  ;;  %p4362_p11 = scmp.ne.s32.totalorder %s5173_s28, %s4361_s21 }
  0xec   : > { %v703_v32 = vpop.f32.mrf.mxu1 }
  0xed   : > { %v3872_v33 = vpop.f32.mrf.mxu0  ;;  %v537_v32 = vsel %vm536_vm4, -1e+30, %v4453_v1  ;;  %p4363_p12 = pnand %p4362_p11, %p4572_p5 }
  0xee   : > { %v3880_v34 = vpop.f32.mrf.mxu1 }
  0xef   : > { %v752_v35 = vpop.f32.mrf.mxu0  ;;  %p4364_p13 = pneg %p4363_p12 }
  0xf0   : > { %v804_v36 = vpop.f32.mrf.mxu1  ;;  %v1228_v6 = vpack.c.bf16 %v752_v35, %v752_v35 }
  0xf1   : > { %v3887_v37 = vpop.f32.mrf.mxu0  ;;  %v1229_v8 = vpack.c.bf16 %v804_v36, %v804_v36 }
  0xf2   : > { %v3895_v38 = vpop.f32.mrf.mxu1 }
  0xf3   : > { %v755_v39 = vpop.f32.mrf.mxu0 }
  0xf4   : > { %v807_v40 = vpop.f32.mrf.mxu1 }
  0xf5   : > { %v3888_v41 = vpop.f32.mrf.mxu0 }
  0xf6   : > { %v3896_v42 = vpop.f32.mrf.mxu1 }
  0xf7   : > { %v856_v43 = vpop.f32.mrf.mxu0 }
  0xf8   : > { %v908_v44 = vpop.f32.mrf.mxu1  ;;  %v1230_v45 = vpack.c.bf16 %v856_v43, %v856_v43 }
  0xf9   : > { %v1231_v46 = vpack.c.bf16 %v908_v44, %v908_v44  ;;  %v3903_v47 = vpop.f32.mrf.mxu0 }
  0xfa   : > { %v3911_v48 = vpop.f32.mrf.mxu1  ;;  %v1239_v49 = vsel %vm1234_vm2, %v1230_v45, 0 }
  0xfb   : > { %v1285_v50 = vsel %vm1234_vm2, %v1231_v46, 0  ;;  %v859_v51 = vpop.f32.mrf.mxu0  ;;  %3962 = vmatpush3.bf16.xpose.msra.mxu0 %v1239_v49 }
  0xfc   : > { %v911_v52 = vpop.f32.mrf.mxu1  ;;  %3968 = vmatpush3.bf16.xpose.msra.mxu1 %v1285_v50  ;;  %3973 = vmatprep.subr.bf16.mxu0 %v4453_v1 }
  0xfd   : > { %3979 = vmatprep.subr.bf16.mxu1 %v4453_v1  ;;  %v3904_v53 = vpop.f32.mrf.mxu0 }
  0xfe   : > { %v3912_v54 = vpop.f32.mrf.mxu1 }
  0xff   : > { %v960_v55 = vpop.f32.mrf.mxu0 }
 0x100   : > { %v1012_v56 = vpop.f32.mrf.mxu1  ;;  %v1232_v59 = vpack.c.bf16 %v960_v55, %v960_v55 }
 0x101   : > { %v1233_v60 = vpack.c.bf16 %v1012_v56, %v1012_v56  ;;  %v3919_v61 = vpop.f32.mrf.mxu0 }
 0x102   : > { %v3927_v62 = vpop.f32.mrf.mxu1  ;;  %v1331_v63 = vsel %vm1234_vm2, %v1232_v59, 0  ;;  %3964 = vmatmul.mubr.msk.bf16.vlgmr.msra.gmra.mxu0 %vm1234_vm2, %v1226_v57 }
 0x103   : > { %v1377_v0 = vsel %vm1234_vm2, %v1233_v60, 0  ;;  %3970 = vmatmul.mubr.msk.bf16.vlgmr.msra.gmra.mxu1 %vm1234_vm2, %v1227_v58  ;;  %v963_v2 = vpop.f32.mrf.mxu0  ;;  %3974 = vmatpush3.bf16.xpose.msra.mxu0 %v1331_v63 }
 0x104   : > { %v1015_v3 = vpop.f32.mrf.mxu1  ;;  %3980 = vmatpush3.bf16.xpose.msra.mxu1 %v1377_v0  ;;  %3975 = vmatprep.mubr.msk.bf16.mxu0 %vm4454_vm0, %v4453_v1 }
 0x105   : > { %3981 = vmatprep.mubr.msk.bf16.mxu1 %vm4454_vm0, %v4453_v1  ;;  %v3920_v4 = vpop.f32.mrf.mxu0  ;;  %3985 = vmatprep.subr.bf16.mxu0 %v4453_v1 }
 0x106   : > { %v3928_v5 = vpop.f32.mrf.mxu1  ;;  %3991 = vmatprep.subr.bf16.mxu1 %v4453_v1 }
 0x107   : > { %v1064_v9 = vpop.f32.mrf.mxu0 }
 0x108   : > { %v1479_v10 = vpack.c.bf16 %v1064_v9, %v1064_v9 }
 0x109   : > { %v3935_v11 = vpop.f32.mrf.mxu0  ;;  %v1116_v14 = vpop.f32.mrf.mxu1 }
 0x10a   : > { %3976 = vmatmul.mubr.msk.bf16.vlgmr.msra.gmra.mxu0 %vm1234_vm2, %v1228_v6  ;;  %v1488_v12 = vsel %vm1486_vm3, %v1479_v10, 0  ;;  %v1480_v15 = vpack.c.bf16 %v1116_v14, %v1116_v14 }
 0x10b   : > { %3982 = vmatmul.mubr.msk.bf16.vlgmr.msra.gmra.mxu1 %vm1234_vm2, %v1229_v8  ;;  %3987 = vmatprep.mubr.msk.bf16.mxu0 %vm4454_vm0, %v4453_v1  ;;  %v1067_v13 = vpop.f32.mrf.mxu0  ;;  %v3943_v17 = vpop.f32.mrf.mxu1 }
 0x10c   : > { %3993 = vmatprep.mubr.msk.bf16.mxu1 %vm4454_vm0, %v4453_v1  ;;  %3986 = vmatpush3.bf16.msra.mxu0 %v1488_v12  ;;  %v1534_v18 = vsel %vm1486_vm3, %v1480_v15, 0 }
 0x10d   : > { %3997 = vmatprep.subr.bf16.mxu0 %v4453_v1  ;;  %v3936_v16 = vpop.f32.mrf.mxu0  ;;  %v1119_v19 = vpop.f32.mrf.mxu1  ;;  %3992 = vmatpush3.bf16.msra.mxu1 %v1534_v18 }
 0x10e   : > { %4003 = vmatprep.subr.bf16.mxu1 %v4453_v1 }
 0x10f   : > { %v4772_v20 = vpop.f32.mrf.mxu0  ;;  %v3944_v21 = vpop.f32.mrf.mxu1 }
 0x111   : > { %v3951_v22 = vpop.f32.mrf.mxu0  ;;  %v4775_v24 = vpop.f32.mrf.mxu1 }
 0x112   : > { %v1482_v29 = vpack.c.bf16 %v4775_v24, %v4775_v24 }
 0x113   : > { %v1171_v23 = vpop.f32.mrf.mxu0  ;;  %v3959_v26 = vpop.f32.mrf.mxu1 }
 0x114   : > { %v1481_v23 = vpack.c.bf16 %v4772_v20, %v4772_v20  ;;  %v1626_v24 = vsel %vm1486_vm3, %v1482_v29, 0 }
 0x115   : > { %v3952_v25 = vpop.f32.mrf.mxu0  ;;  %v1223_v27 = vpop.f32.mrf.mxu1 }
 0x117   : > { %v3960_v28 = vpop.f32.mrf.mxu1 }
 0x118   : > { %v1580_v28 = vsel %vm1486_vm3, %v1481_v23, 0 }
 0x1c2   : > { %v1275_v30 = vpop.f32.mrf.mxu0 }
 0x1c3   : > { %v1321_v31 = vpop.f32.mrf.mxu1  ;;  %v1419_v33 = vmul.f32 0.35355338, %v1275_v30 }
 0x1c4   : > { %v1420_v34 = vmul.f32 0.35355338, %v1321_v31  ;;  %v3965_v35 = vpop.f32.mrf.mxu0 }
 0x1c5   : > { %v3971_v36 = vpop.f32.mrf.mxu1  ;;  %v1423_v37 = vadd.f32 %v1419_v33, %v537_v32 }
 0x1c6   : > { %v1278_v38 = vpop.f32.mrf.mxu0  ;;  %v1424_v41 = vadd.f32 %v1420_v34, %v537_v32 }
 0x1c7   : > { %v1324_v39 = vpop.f32.mrf.mxu1  ;;  %v1427_v40 = vsel %vm1234_vm2, %v1423_v37, -inf }
 0x1c8   : > { %1428 = vmax.xlane.f32.xlu0 %v1427_v40  ;;  %v3966_v43 = vpop.f32.mrf.mxu0  ;;  %v1430_v48 = vsel %vm1234_vm2, %v1424_v41, -inf  ;;  %v1673_v39 = vld [vmem:[%s5296_s5 + $0x4] sm:$0xf] }
 0x1c9   : > { %v3972_v42 = vpop.f32.mrf.mxu1  ;;  %v1726_v40 = vsel %vm1486_vm3, %v1673_v39, 0 }
 0x1ca   : > { %v1367_v44 = vpop.f32.mrf.mxu0 }
 0x1cb   : > { %v1413_v45 = vpop.f32.mrf.mxu1  ;;  %v1421_v46 = vmul.f32 0.35355338, %v1367_v44 }
 0x1cc   : > { %v1422_v47 = vmul.f32 0.35355338, %v1413_v45  ;;  %1431 = vmax.xlane.f32.xlu0 %v1430_v48  ;;  %v3977_v50 = vpop.f32.mrf.mxu0 }
 0x1cd   : > { %v3983_v49 = vpop.f32.mrf.mxu1  ;;  %v1425_v51 = vadd.f32 %v1421_v46, %v537_v32  ;;  %v1675_v46 = vld [vmem:[%s5296_s5 + $0xc] sm:$0xf] }
 0x1ce   : > { %v1370_v52 = vpop.f32.mrf.mxu0  ;;  %v1426_v55 = vadd.f32 %v1422_v47, %v537_v32  ;;  %v1672_v32 = vld [vmem:[%s5296_s5] sm:$0xf]  ;;  %v1818_v50 = vsel %vm1486_vm3, %v1675_v46, 0  ;;  %v4298_v46 = vld [vmem:[%s5297_s6 + $0x38] sm:$0xff]  }
 0x1cf   : > { %v1416_v53 = vpop.f32.mrf.mxu1  ;;  %v1433_v54 = vsel %vm1234_vm2, %v1425_v51, -inf  ;;  %v1680_v35 = vsel %vm1486_vm3, %v1672_v32, 0 }
 0x1d0   : > { %1434 = vmax.xlane.f32.xlu1 %v1433_v54  ;;  %v3978_v57 = vpop.f32.mrf.mxu0  ;;  %v1436_v58 = vsel %vm1234_vm2, %v1426_v55, -inf }
 0x1d1   : > { %v3984_v56 = vpop.f32.mrf.mxu1 }
 0x1d4   : > { %1437 = vmax.xlane.f32.xlu1 %v1436_v58 }
 0x251   : > { %v1429_v59 = vpop.xlane.xlu0 %1428 }
 0x252   : > { %v1439_v60 = vsub.f32 %v1423_v37, %v1429_v59 }
 0x254   : > { %v1443_v61 = vmul.f32 1.442695, %v1439_v60 }
 0x255   : > { %v1432_v62 = vpop.xlane.xlu0 %1431 }
 0x256   : > { %4323 = vpow2.f32 %v1443_v61  ;;  %v1440_v63 = vsub.f32 %v1424_v41, %v1432_v62  ;;  %v1674_v41 = vld [vmem:[%s5296_s5 + $0x8] sm:$0xf] }
 0x257   : > { %v1772_v44 = vsel %vm1486_vm3, %v1674_v41, 0 }
 0x258   : > { %v1445_v0 = vmul.f32 1.442695, %v1440_v63 }
 0x259   : > { %v1435_v2 = vpop.xlane.xlu1 %1434 }
 0x25a   : > { %4325 = vpow2.f32 %v1445_v0  ;;  %v1441_v3 = vsub.f32 %v1425_v51, %v1435_v2 }
 0x25c   : > { %v1447_v4 = vmul.f32 1.442695, %v1441_v3 }
 0x25d   : > { %v1438_v5 = vpop.xlane.xlu1 %1437 }
 0x25e   : > { %4327 = vpow2.f32 %v1447_v4  ;;  %v1442_v6 = vsub.f32 %v1426_v55, %v1438_v5 }
 0x260   : > { %v1449_v8 = vmul.f32 1.442695, %v1442_v6 }
 0x262   : > { %4329 = vpow2.f32 %v1449_v8 }
 0x263   : > { %v4324_v9 = vpop.eup %4323 }
 0x264   : > { %v1451_v10 = vsel %vm1234_vm2, %v4324_v9, 0.0 }
 0x265   : > { %1452 = vadd.xlane.f32.xlu0 %v1451_v10 }
 0x267   : > { %v4326_v11 = vpop.eup %4325 }
 0x268   : > { %v1454_v12 = vsel %vm1234_vm2, %v4326_v11, 0.0 }
 0x269   : > { %1455 = vadd.xlane.f32.xlu1 %v1454_v12 }
 0x26b   : > { %v4328_v13 = vpop.eup %4327 }
 0x26c   : > { %v1457_v14 = vsel %vm1234_vm2, %v4328_v13, 0.0 }
 0x26d   : > { %1458 = vadd.xlane.f32.xlu0 %v1457_v14 }
 0x26f   : > { %v4330_v15 = vpop.eup %4329 }
 0x270   : > { %v1460_v16 = vsel %vm1234_vm2, %v4330_v15, 0.0 }
 0x271   : > { %1461 = vadd.xlane.f32.xlu1 %v1460_v16 }
 0x2ee   : > { %v1453_v17 = vpop.xlane.xlu0 %1452 }
 0x2ef   : > { %4331 = vrcp.f32 %v1453_v17 }
 0x2f2   : > { %v1456_v18 = vpop.xlane.xlu1 %1455 }
 0x2f3   : > { %4333 = vrcp.f32 %v1456_v18 }
 0x2f6   : > { %v1459_v19 = vpop.xlane.xlu0 %1458 }
 0x2f7   : > { %4335 = vrcp.f32 %v1459_v19 }
 0x2fa   : > { %v1462_v21 = vpop.xlane.xlu1 %1461 }
 0x2fb   : > { %4337 = vrcp.f32 %v1462_v21 }
 0x2fc   : > { %v4332_v22 = vpop.eup %4331 }
 0x2fd   : > { %v1464_v25 = vmul.f32 %v4332_v22, %v4324_v9 }
 0x2ff   : > { %1471 = vst.msk [vmem:[%s4798_s18] sm:$0xff] %vm1234_vm2, %v1464_v25  ;;  %v1475_v26 = vpack.c.bf16 %v1464_v25, %v1464_v25 }
 0x300   : > { %v4334_v27 = vpop.eup %4333 }
 0x301   : > { %3988 = vmatmul.mubr.msk.bf16.vlgmr.msra.gmra.mxu0 %vm1234_vm2, %v1475_v26  ;;  %v1466_v30 = vmul.f32 %v4334_v27, %v4326_v11 }
 0x302   : > { %3998 = vmatpush3.bf16.msra.mxu0 %v1580_v28  ;;  %3999 = vmatprep.mubr.msk.bf16.mxu0 %vm4454_vm0, %v4453_v1 }
 0x303   : > { %1472 = vst.msk [vmem:[%s4798_s18 + $0x8] sm:$0xff] %vm1234_vm2, %v1466_v30  ;;  %v1476_v20 = vpack.c.bf16 %v1466_v30, %v1466_v30  ;;  %4009 = vmatprep.subr.bf16.mxu0 %v4453_v1 }
 0x304   : > { %v4336_v31 = vpop.eup %4335 }
 0x305   : > { %3994 = vmatmul.mubr.msk.bf16.vlgmr.msra.gmra.mxu1 %vm1234_vm2, %v1476_v20  ;;  %v1468_v33 = vmul.f32 %v4336_v31, %v4328_v13 }
 0x306   : > { %4004 = vmatpush3.bf16.msra.mxu1 %v1626_v24  ;;  %4005 = vmatprep.mubr.msk.bf16.mxu1 %vm4454_vm0, %v4453_v1 }
 0x307   : > { %1473 = vst.msk [vmem:[%s4798_s18 + $0x10] sm:$0xff] %vm1234_vm2, %v1468_v33  ;;  %v1477_v34 = vpack.c.bf16 %v1468_v33, %v1468_v33  ;;  %4015 = vmatprep.subr.bf16.mxu1 %v4453_v1  ;;  %v4293_v33 = vld [vmem:[%s5297_s6 + $0x8] sm:$0xff]  }
 0x308   : > { %v4338_v36 = vpop.eup %4337 }
 0x309   : > { %4000 = vmatmul.mubr.msk.bf16.vlgmr.msra.gmra.mxu0 %vm1234_vm2, %v1477_v34  ;;  %v1470_v37 = vmul.f32 %v4338_v36, %v4330_v15  ;;  %v4294_v34 = vld [vmem:[%s5297_s6 + $0x18] sm:$0xff]  }
 0x30a   : > { %4010 = vmatpush3.bf16.msra.mxu0 %v1680_v35  ;;  %4011 = vmatprep.mubr.msk.bf16.mxu0 %vm4454_vm0, %v4453_v1  ;;  %v4296_v35 = vld [vmem:[%s5297_s6 + $0x10] sm:$0xff]  }
 0x30b   : > { %1474 = vst.msk [vmem:[%s4798_s18 + $0x18] sm:$0xff] %vm1234_vm2, %v1470_v37  ;;  %v1478_v38 = vpack.c.bf16 %v1470_v37, %v1470_v37  ;;  %4021 = vmatprep.subr.bf16.mxu0 %v4453_v1  ;;  %s4367_s18 = scalar_lea.vmem %s4366_s1, 1024 }
 0x30c   : > { %p4369_p1 = scmp.lt.s32.totalorder %s4367_s18, %s4361_s21 }
 0x30d   : > { %4006 = vmatmul.mubr.msk.bf16.vlgmr.msra.gmra.mxu1 %vm1234_vm2, %v1478_v38 }
 0x30e   : > { %4017 = vmatprep.mubr.msk.bf16.mxu1 %vm4454_vm0, %v4453_v1  ;;  %4016 = vmatpush3.bf16.msra.mxu1 %v1726_v40  ;;  %v3663_v40 = vld [vmem:[%s5275_s11] ss:$0 sm:$0xff]  ;;  %p4370_p2 = por %p4369_p1, %p4368_p0 }
 0x30f   : > { %4027 = vmatprep.subr.bf16.mxu1 %v4453_v1 }
 0x310   : > { %p4371_p3 = pnand %p4370_p2, %p4364_p13 }
 0x3c1   : > { %v1524_v42 = vpop.f32.mrf.mxu0 }
 0x3c2   : > { %v1668_v43 = vpack.c.bf16 %v1524_v42, %v1524_v42  ;;  %v3664_v42 = vld [vmem:[%s5275_s11 + $0x1] ss:$0 sm:$0xff] }
 0x3c3   : > { %v3989_v45 = vpop.f32.mrf.mxu0 }
 0x3c4   : > { %4012 = vmatmul.mubr.msk.bf16.vlgmr.msra.gmra.mxu0 %vm1234_vm2, %v1668_v43  ;;  %v4297_v45 = vld [vmem:[%s5297_s6 + $0x28] sm:$0xff]  }
 0x3c5   : > { %v1527_v47 = vpop.f32.mrf.mxu0  ;;  %v1570_v48 = vpop.f32.mrf.mxu1  ;;  %4022 = vmatpush3.bf16.msra.mxu0 %v1772_v44  ;;  %4023 = vmatprep.mubr.msk.bf16.mxu0 %vm4454_vm0, %v4453_v1 }
 0x3c6   : > { %v1669_v49 = vpack.c.bf16 %v1570_v48, %v1570_v48  ;;  %4033 = vmatprep.subr.bf16.mxu0 %v4453_v1  ;;  %v4299_v48 = vld [vmem:[%s5297_s6 + $0x20] sm:$0xff]  }
 0x3c7   : > { %v3990_v51 = vpop.f32.mrf.mxu0  ;;  %v3995_v52 = vpop.f32.mrf.mxu1 }
 0x3c8   : > { %4018 = vmatmul.mubr.msk.bf16.vlgmr.msra.gmra.mxu1 %vm1234_vm2, %v1669_v49  ;;  %v4300_v49 = vld [vmem:[%s5297_s6 + $0x30] sm:$0xff]   ;;  %v4302_v51 = vld [vmem:[%s5271_s7 + $0x18] sm:$0xff]   ;;  %v4303_v52 = vld [vmem:[%s5271_s7] sm:$0xff]  }
 0x3c9   : > { %v1573_v53 = vpop.f32.mrf.mxu1  ;;  %v1616_v54 = vpop.f32.mrf.mxu0  ;;  %4028 = vmatpush3.bf16.msra.mxu1 %v1818_v50  ;;  %4029 = vmatprep.mubr.msk.bf16.mxu1 %vm4454_vm0, %v4453_v1  ;;  %v4301_v50 = vld [vmem:[%s5271_s7 + $0x8] sm:$0xff]  }
 0x3ca   : > { %v1670_v55 = vpack.c.bf16 %v1616_v54, %v1616_v54  ;;  %4041 = vmatprep.subr.bf16.mxu1 %v4453_v1  ;;  %v4304_v53 = vld [vmem:[%s5271_s7 + $0x10] sm:$0xff]   ;;  %v534_v54 = vld [vmem:[%s520_s2] sm:$0xff]  ;;  %s5171_s2 = scalar_lea.hbm %s5277_s13, %s5281_s22 }
 0x3cb   : > { %v3996_v56 = vpop.f32.mrf.mxu1  ;;  %v4001_v57 = vpop.f32.mrf.mxu0 }
 0x3cc   : > { %4024 = vmatmul.mubr.msk.bf16.vlgmr.msra.gmra.mxu0 %vm1234_vm2, %v1670_v55  ;;  %v2120_v55 = vpack.c.bf16 %v534_v54, %v534_v54  ;;  %v4305_v56 = vld [vmem:[%s5271_s7 + $0x28] sm:$0xff]   ;;  %v4306_v57 = vld [vmem:[%s5271_s7 + $0x38] sm:$0xff]  }
 0x3cd   : > { %v1619_v58 = vpop.f32.mrf.mxu0  ;;  %v1662_v59 = vpop.f32.mrf.mxu1  ;;  %4037 = vmatprep.mubr.msk.bf16.mxu0 %vm4454_vm0, %v4453_v1  ;;  %4034 = vmatpush3.bf16.msra.mxu0 %v4293_v33 }
 0x3ce   : > { %v1671_v60 = vpack.c.bf16 %v1662_v59, %v1662_v59  ;;  %4035 = vmatprep.subr.bf16.mxu0 %v4453_v1  ;;  %v4307_v58 = vld [vmem:[%s5271_s7 + $0x20] sm:$0xff]   ;;  %v4308_v59 = vld [vmem:[%s5271_s7 + $0x30] sm:$0xff]  }
 0x3cf   : > { %v4002_v61 = vpop.f32.mrf.mxu0  ;;  %v4007_v62 = vpop.f32.mrf.mxu1 }
 0x3d0   : > { %4030 = vmatmul.mubr.msk.bf16.vlgmr.msra.gmra.mxu1 %vm1234_vm2, %v1671_v60  ;;  %v4309_v60 = vld [vmem:[%s5271_s7 + $0x48] sm:$0xff]   ;;  %v4310_v61 = vld [vmem:[%s5271_s7 + $0x58] sm:$0xff]   ;;  %v4311_v62 = vld [vmem:[%s5271_s7 + $0x40] sm:$0xff]  }
 0x3d1   : > { %v1665_v63 = vpop.f32.mrf.mxu1  ;;  %4045 = vmatprep.mubr.msk.bf16.mxu1 %vm4454_vm0, %v4453_v1  ;;  %4042 = vmatpush3.bf16.msra.mxu1 %v4294_v34 }
 0x3d2   : > { %4043 = vmatprep.subr.bf16.mxu1 %v4453_v1  ;;  %v4312_v63 = vld [vmem:[%s5271_s7 + $0x50] sm:$0xff]  }
 0x3d3   : > { %v4008_v0 = vpop.f32.mrf.mxu1 }
 0x3d4   : > { %v4313_v0 = vld [vmem:[%s5271_s7 + $0x68] sm:$0xff]  }
 0x3d5   : > { %4044 = vmatpush3.bf16.msra.mxu1 %v4296_v35 }
 0x3d6   : > { %4057 = vmatprep.subr.bf16.mxu1 %v4453_v1 }
 0x484   : > { %v1716_v2 = vpop.f32.mrf.mxu0 }
 0x485   : > { %v1860_v12 = vsel %vm610_vm1, %v1716_v2, 0.0  ;;  %v4314_v2 = vld [vmem:[%s5271_s7 + $0x78] sm:$0xff]  }
 0x486   : > { %v4013_v3 = vpop.f32.mrf.mxu0 }
 0x487   : > { %v4315_v3 = vld [vmem:[%s5271_s7 + $0x60] sm:$0xff]  }
 0x488   : > { %v1719_v4 = vpop.f32.mrf.mxu0  ;;  %v1762_v5 = vpop.f32.mrf.mxu1 }
 0x489   : > { %v1861_v9 = vsel %vm610_vm1, %v1762_v5, 0.0  ;;  %v4316_v4 = vld [vmem:[%s5271_s7 + $0x70] sm:$0xff]  }
 0x48a   : > { %v4014_v6 = vpop.f32.mrf.mxu0  ;;  %v4019_v8 = vpop.f32.mrf.mxu1  ;;  %v1862_v14 = vadd.f32 %v1861_v9, %v1860_v12 }
 0x48c   : > { %v1765_v10 = vpop.f32.mrf.mxu1  ;;  %v1808_v11 = vpop.f32.mrf.mxu0 }
 0x48d   : > { %v1863_v13 = vsel %vm610_vm1, %v1808_v11, 0.0 }
 0x48e   : > { %v4020_v15 = vpop.f32.mrf.mxu1  ;;  %v4025_v16 = vpop.f32.mrf.mxu0  ;;  %v1864_v17 = vadd.f32 %v1863_v13, %v1862_v14 }
 0x490   : > { %v1811_v18 = vpop.f32.mrf.mxu0  ;;  %v1854_v19 = vpop.f32.mrf.mxu1 }
 0x491   : > { %v1865_v21 = vsel %vm610_vm1, %v1854_v19, 0.0 }
 0x492   : > { %v1866_v22 = vadd.f32 %v1865_v21, %v1864_v17  ;;  %v4026_v23 = vpop.f32.mrf.mxu0  ;;  %v4031_v25 = vpop.f32.mrf.mxu1 }
 0x494   : > { %v1857_v26 = vpop.f32.mrf.mxu1  ;;  %v1867_v27 = vadd.f32 %v1866_v22, %v4620_v7  ;;  %v4295_v7 = vld [vmem:[%s5297_s6] sm:$0xff]  }
 0x495   : > { %4036 = vmatpush3.bf16.msra.mxu0 %v4295_v7 }
 0x496   : > { %v4032_v28 = vpop.f32.mrf.mxu1  ;;  %v1868_v29 = vsel %vm610_vm1, %v1867_v27, 0.0  ;;  %4049 = vmatprep.subr.bf16.mxu0 %v4453_v1 }
 0x497   : > { %1869 = vadd.xlane.f32.xlu0 %v1868_v29 }
 0x520   : > { %v1870_v30 = vpop.xlane.xlu0 %1869 }
 0x521   : > { %v1872_v20 = vmul.f32 0.03125, %v1870_v30 }
 0x523   : > { %v1873_v31 = vsub.f32 %v1867_v27, %v1872_v20 }
 0x525   : > { %v1874_v32 = vmul.f32 %v1873_v31, %v1873_v31 }
 0x527   : > { %v1875_v24 = vsel %vm610_vm1, %v1874_v32, 0.0 }
 0x528   : > { %1876 = vadd.xlane.f32.xlu1 %v1875_v24 }
 0x5b1   : > { %v1877_v36 = vpop.xlane.xlu1 %1876 }
 0x5b2   : > { %v1878_v37 = vmul.f32 0.03125, %v1877_v36 }
 0x5b4   : > { %v1879_v38 = vadd.f32 1e-12, %v1878_v37 }
 0x5b6   : > { %4339 = vrsqrt.f32 %v1879_v38 }
 0x5c3   : > { %v4340_v39 = vpop.eup %4339 }
 0x5c4   : > { %v1881_v41 = vmul.f32 %v4340_v39, %v1873_v31 }
 0x5c6   : > { %v1886_v43 = vmul.f32 %v3663_v40, %v1881_v41 }
 0x5c8   : > { %v4887_v44 = vadd.f32 %v3664_v42, %v1886_v43 }
 0x5ca   : > { %v1892_v47 = vpack.c.bf16 %v4887_v44, %v4887_v44 }
 0x5cc   : > { %4038 = vmatmul.mubr.msk.bf16.vlgmr.msra.gmra.mxu0 %vm610_vm1, %v1892_v47  ;;  %4046 = vmatmul.mubr.msk.bf16.vlgmr.msra.gmra.mxu1 %vm610_vm1, %v1892_v47 }
 0x5cd   : > { %4050 = vmatpush3.bf16.msra.mxu0 %v4297_v45  ;;  %4058 = vmatpush3.bf16.msra.mxu1 %v4298_v46 }
 0x5ce   : > { %4051 = vmatprep.subr.bf16.mxu0 %v4453_v1  ;;  %4059 = vmatprep.subr.bf16.mxu1 %v4453_v1 }
 0x5cf   : > { %4053 = vmatprep.mubr.msk.bf16.mxu0 %vm4454_vm0, %v4453_v1  ;;  %4061 = vmatprep.mubr.msk.bf16.mxu1 %vm4454_vm0, %v4453_v1 }
 0x5d1   : > { %4052 = vmatpush3.bf16.msra.mxu0 %v4299_v48  ;;  %4060 = vmatpush3.bf16.msra.mxu1 %v4300_v49 }
 0x5d2   : > { %4065 = vmatprep.subr.bf16.mxu0 %v4453_v1  ;;  %4073 = vmatprep.subr.bf16.mxu1 %v4453_v1 }
 0x5d4   : > { %4054 = vmatmul.mubr.msk.bf16.vlgmr.msra.gmra.mxu0 %vm610_vm1, %v1892_v47  ;;  %4062 = vmatmul.mubr.msk.bf16.vlgmr.msra.gmra.mxu1 %vm610_vm1, %v1892_v47 }
 0x5d5   : > { %4066 = vmatpush3.bf16.msra.mxu0 %v4301_v50  ;;  %4074 = vmatpush3.bf16.msra.mxu1 %v4302_v51 }
 0x5d6   : > { %4067 = vmatprep.subr.bf16.mxu0 %v4453_v1  ;;  %4075 = vmatprep.subr.bf16.mxu1 %v4453_v1 }
 0x5d7   : > { %4069 = vmatprep.mubr.msk.bf16.mxu0 %vm4454_vm0, %v4453_v1  ;;  %4077 = vmatprep.mubr.msk.bf16.mxu1 %vm4454_vm0, %v4453_v1 }
 0x5d9   : > { %4068 = vmatpush3.bf16.msra.mxu0 %v4303_v52  ;;  %4076 = vmatpush3.bf16.msra.mxu1 %v4304_v53 }
 0x5da   : > { %4081 = vmatprep.subr.bf16.mxu0 %v4453_v1  ;;  %4089 = vmatprep.subr.bf16.mxu1 %v4453_v1 }
 0x5dc   : > { %4070 = vmatmul.mubr.msk.bf16.vlgmr.msra.gmra.mxu0 %vm610_vm1, %v2120_v55  ;;  %4078 = vmatmul.mubr.msk.bf16.vlgmr.msra.gmra.mxu1 %vm610_vm1, %v2120_v55 }
 0x5dd   : > { %4082 = vmatpush3.bf16.msra.mxu0 %v4305_v56  ;;  %4090 = vmatpush3.bf16.msra.mxu1 %v4306_v57 }
 0x5de   : > { %4083 = vmatprep.subr.bf16.mxu0 %v4453_v1  ;;  %4091 = vmatprep.subr.bf16.mxu1 %v4453_v1 }
 0x5df   : > { %4085 = vmatprep.mubr.msk.bf16.mxu0 %vm4454_vm0, %v4453_v1  ;;  %4093 = vmatprep.mubr.msk.bf16.mxu1 %vm4454_vm0, %v4453_v1 }
 0x5e1   : > { %4084 = vmatpush3.bf16.msra.mxu0 %v4307_v58  ;;  %4092 = vmatpush3.bf16.msra.mxu1 %v4308_v59 }
 0x5e2   : > { %4097 = vmatprep.subr.bf16.mxu0 %v4453_v1  ;;  %4105 = vmatprep.subr.bf16.mxu1 %v4453_v1 }
 0x5e4   : > { %4086 = vmatmul.mubr.msk.bf16.vlgmr.msra.gmra.mxu0 %vm610_vm1, %v2120_v55  ;;  %4094 = vmatmul.mubr.msk.bf16.vlgmr.msra.gmra.mxu1 %vm610_vm1, %v2120_v55 }
 0x5e5   : > { %4098 = vmatpush3.bf16.msra.mxu0 %v4309_v60  ;;  %4101 = vmatprep.mubr.msk.bf16.mxu0 %vm4454_vm0, %v4453_v1 }
 0x5e6   : > { %4099 = vmatprep.subr.bf16.mxu0 %v4453_v1  ;;  %4109 = vmatprep.mubr.msk.bf16.mxu1 %vm4454_vm0, %v4453_v1 }
 0x5e7   : > { %4106 = vmatpush3.bf16.msra.mxu1 %v4310_v61 }
 0x5e8   : > { %4107 = vmatprep.subr.bf16.mxu1 %v4453_v1 }
 0x5e9   : > { %4100 = vmatpush3.bf16.msra.mxu0 %v4311_v62 }
 0x5ea   : > { %4113 = vmatprep.subr.bf16.mxu0 %v4453_v1 }
 0x5eb   : > { %4108 = vmatpush3.bf16.msra.mxu1 %v4312_v63 }
 0x5ec   : > { %4102 = vmatmul.mubr.msk.bf16.vlgmr.msra.gmra.mxu0 %vm610_vm1, %v2120_v55  ;;  %4121 = vmatprep.subr.bf16.mxu1 %v4453_v1 }
 0x5ed   : > { %4114 = vmatpush3.bf16.msra.mxu0 %v4313_v0  ;;  %4117 = vmatprep.mubr.msk.bf16.mxu0 %vm4454_vm0, %v4453_v1 }
 0x5ee   : > { %4110 = vmatmul.mubr.msk.bf16.vlgmr.msra.gmra.mxu1 %vm610_vm1, %v2120_v55  ;;  %4115 = vmatprep.subr.bf16.mxu0 %v4453_v1 }
 0x5ef   : > { %4122 = vmatpush3.bf16.msra.mxu1 %v4314_v2  ;;  %4125 = vmatprep.mubr.msk.bf16.mxu1 %vm4454_vm0, %v4453_v1 }
 0x5f0   : > { %4123 = vmatprep.subr.bf16.mxu1 %v4453_v1 }
 0x5f1   : > { %4116 = vmatpush3.bf16.msra.mxu0 %v4315_v3 }
 0x5f2   : > { %4129 = vmatprep.subr.bf16.mxu0 %v4453_v1 }
 0x5f3   : > { %4124 = vmatpush3.bf16.msra.mxu1 %v4316_v4 }
 0x5f4   : > { %4118 = vmatmul.mubr.msk.bf16.vlgmr.msra.gmra.mxu0 %vm610_vm1, %v2120_v55  ;;  %4135 = vmatprep.subr.bf16.mxu1 %v4453_v1 }
 0x5f5   : > { %4131 = vmatprep.mubr.msk.bf16.mxu0 %vm4454_vm0, %v4453_v1 }
 0x5f6   : > { %4126 = vmatmul.mubr.msk.bf16.vlgmr.msra.gmra.mxu1 %vm610_vm1, %v2120_v55 }
 0x5f7   : > { %4137 = vmatprep.mubr.msk.bf16.mxu1 %vm4454_vm0, %v4453_v1 }
 0x68c   : > { %v1958_v5 = vpop.f32.mrf.mxu0  ;;  %v2010_v6 = vpop.f32.mrf.mxu1 }
 0x68d   : > { %v2572_v35 = vpack.c.bf16 %v1958_v5, %v1958_v5  ;;  %v2573_v36 = vpack.c.bf16 %v2010_v6, %v2010_v6 }
 0x68e   : > { %v4039_v8 = vpop.f32.mrf.mxu0  ;;  %v4047_v9 = vpop.f32.mrf.mxu1 }
 0x68f   : > { %v2769_v8 = vlaneseq  ;;  %v538_v9 = vld [vmem:[%s527_s0] sm:$0x1] }
 0x690   : > { %v1961_v10 = vpop.f32.mrf.mxu0  ;;  %v2013_v11 = vpop.f32.mrf.mxu1  ;;  %vm539_vm5 = vcmp.gt.f32.partialorder %v538_v9, 0.0 }
 0x691   : > { %v2770_v10 = vshrl.u32 %v2769_v8, 7 }
 0x692   : > { %v4040_v12 = vpop.f32.mrf.mxu0  ;;  %v4048_v13 = vpop.f32.mrf.mxu1 }
 0x693   : > { %v2771_v11 = vsub.s32 0, %v2770_v10  ;;  %v540_v12 = vsel %vm539_vm5, -1e+30, %v4453_v1 }
 0x694   : > { %v2062_v14 = vpop.f32.mrf.mxu0  ;;  %v2114_v15 = vpop.f32.mrf.mxu1 }
 0x695   : > { %v2574_v48 = vpack.c.bf16 %v2062_v14, %v2062_v14  ;;  %v2575_v49 = vpack.c.bf16 %v2114_v15, %v2114_v15  ;;  %v2772_v13 = vrot.slane %v540_v12, %v2771_v11 }
 0x696   : > { %v4055_v16 = vpop.f32.mrf.mxu0  ;;  %v4063_v17 = vpop.f32.mrf.mxu1 }
 0x698   : > { %v2065_v18 = vpop.f32.mrf.mxu0  ;;  %v2117_v19 = vpop.f32.mrf.mxu1 }
 0x69a   : > { %v4056_v21 = vpop.f32.mrf.mxu0  ;;  %v4064_v22 = vpop.f32.mrf.mxu1 }
 0x69c   : > { %v2202_v23 = vpop.f32.mrf.mxu0  ;;  %v2254_v25 = vpop.f32.mrf.mxu1 }
 0x69d   : > { %v2576_v26 = vpack.c.bf16 %v2202_v23, %v2202_v23  ;;  %v2577_v27 = vpack.c.bf16 %v2254_v25, %v2254_v25 }
 0x69e   : > { %v4071_v28 = vpop.f32.mrf.mxu0  ;;  %v4079_v29 = vpop.f32.mrf.mxu1 }
 0x69f   : > { %v2584_v30 = vsel %vm1234_vm2, %v2576_v26, 0  ;;  %v2630_v20 = vsel %vm1234_vm2, %v2577_v27, 0 }
 0x6a0   : > { %v2205_v31 = vpop.f32.mrf.mxu0  ;;  %v2257_v32 = vpop.f32.mrf.mxu1  ;;  %4130 = vmatpush3.bf16.xpose.msra.mxu0 %v2584_v30  ;;  %4136 = vmatpush3.bf16.xpose.msra.mxu1 %v2630_v20 }
 0x6a1   : > { %4141 = vmatprep.subr.bf16.mxu0 %v4453_v1  ;;  %4147 = vmatprep.subr.bf16.mxu1 %v4453_v1 }
 0x6a2   : > { %v4072_v24 = vpop.f32.mrf.mxu0  ;;  %v4080_v33 = vpop.f32.mrf.mxu1 }
 0x6a4   : > { %v2306_v34 = vpop.f32.mrf.mxu0  ;;  %v2358_v7 = vpop.f32.mrf.mxu1 }
 0x6a5   : > { %v2578_v37 = vpack.c.bf16 %v2306_v34, %v2306_v34  ;;  %v2579_v38 = vpack.c.bf16 %v2358_v7, %v2358_v7 }
 0x6a6   : > { %v4087_v39 = vpop.f32.mrf.mxu0  ;;  %v4095_v40 = vpop.f32.mrf.mxu1 }
 0x6a7   : > { %v2676_v41 = vsel %vm1234_vm2, %v2578_v37, 0  ;;  %v2722_v42 = vsel %vm1234_vm2, %v2579_v38, 0  ;;  %4132 = vmatmul.mubr.msk.bf16.vlgmr.msra.gmra.mxu0 %vm1234_vm2, %v2572_v35  ;;  %4138 = vmatmul.mubr.msk.bf16.vlgmr.msra.gmra.mxu1 %vm1234_vm2, %v2573_v36 }
 0x6a8   : > { %v2309_v43 = vpop.f32.mrf.mxu0  ;;  %v2361_v45 = vpop.f32.mrf.mxu1  ;;  %4142 = vmatpush3.bf16.xpose.msra.mxu0 %v2676_v41  ;;  %4148 = vmatpush3.bf16.xpose.msra.mxu1 %v2722_v42 }
 0x6a9   : > { %4143 = vmatprep.mubr.msk.bf16.mxu0 %vm4454_vm0, %v4453_v1  ;;  %4149 = vmatprep.mubr.msk.bf16.mxu1 %vm4454_vm0, %v4453_v1 }
 0x6aa   : > { %v4088_v46 = vpop.f32.mrf.mxu0  ;;  %v4096_v47 = vpop.f32.mrf.mxu1  ;;  %4153 = vmatprep.subr.bf16.mxu0 %v4453_v1  ;;  %4159 = vmatprep.subr.bf16.mxu1 %v4453_v1 }
 0x6ac   : > { %v2410_v50 = vpop.f32.mrf.mxu0 }
 0x6ad   : > { %v2830_v51 = vpack.c.bf16 %v2410_v50, %v2410_v50 }
 0x6ae   : > { %v4103_v52 = vpop.f32.mrf.mxu0  ;;  %v2462_v53 = vpop.f32.mrf.mxu1 }
 0x6af   : > { %4144 = vmatmul.mubr.msk.bf16.vlgmr.msra.gmra.mxu0 %vm1234_vm2, %v2574_v48  ;;  %4150 = vmatmul.mubr.msk.bf16.vlgmr.msra.gmra.mxu1 %vm1234_vm2, %v2575_v49  ;;  %v2838_v54 = vsel %vm1486_vm3, %v2830_v51, 0  ;;  %v2831_v55 = vpack.c.bf16 %v2462_v53, %v2462_v53 }
 0x6b0   : > { %4155 = vmatprep.mubr.msk.bf16.mxu0 %vm4454_vm0, %v4453_v1  ;;  %4161 = vmatprep.mubr.msk.bf16.mxu1 %vm4454_vm0, %v4453_v1  ;;  %v2413_v56 = vpop.f32.mrf.mxu0  ;;  %v4111_v57 = vpop.f32.mrf.mxu1 }
 0x6b1   : > { %4154 = vmatpush3.bf16.msra.mxu0 %v2838_v54  ;;  %v2884_v58 = vsel %vm1486_vm3, %v2831_v55, 0 }
 0x6b2   : > { %4165 = vmatprep.subr.bf16.mxu0 %v4453_v1  ;;  %v4104_v59 = vpop.f32.mrf.mxu0  ;;  %v2465_v60 = vpop.f32.mrf.mxu1  ;;  %4160 = vmatpush3.bf16.msra.mxu1 %v2884_v58 }
 0x6b3   : > { %4171 = vmatprep.subr.bf16.mxu1 %v4453_v1 }
 0x6b4   : > { %v4112_v61 = vpop.f32.mrf.mxu1  ;;  %v5035_v62 = vpop.f32.mrf.mxu0 }
 0x6b5   : > { %v2832_v10 = vpack.c.bf16 %v5035_v62, %v5035_v62 }
 0x6b6   : > { %v4119_v63 = vpop.f32.mrf.mxu0  ;;  %v5037_v0 = vpop.f32.mrf.mxu1 }
 0x6b7   : > { %v2833_v8 = vpack.c.bf16 %v5037_v0, %v5037_v0  ;;  %v2930_v0 = vsel %vm1486_vm3, %v2832_v10, 0 }
 0x6b8   : > { %v2517_v2 = vpop.f32.mrf.mxu0  ;;  %v4127_v3 = vpop.f32.mrf.mxu1 }
 0x6ba   : > { %v4120_v4 = vpop.f32.mrf.mxu0  ;;  %v2569_v5 = vpop.f32.mrf.mxu1 }
 0x6bc   : > { %v4128_v6 = vpop.f32.mrf.mxu1 }
 0x767   : > { %v2620_v14 = vpop.f32.mrf.mxu0  ;;  %v2666_v15 = vpop.f32.mrf.mxu1 }
 0x768   : > { %v2764_v16 = vmul.f32 0.35355338, %v2620_v14  ;;  %v2765_v17 = vmul.f32 0.35355338, %v2666_v15  ;;  %v2976_v14 = vsel %vm1486_vm3, %v2833_v8, 0 }
 0x769   : > { %v4133_v18 = vpop.f32.mrf.mxu0  ;;  %v4139_v19 = vpop.f32.mrf.mxu1  ;;  %v3023_v15 = vld [vmem:[%s5272_s8 + $0x4] sm:$0xf] }
 0x76a   : > { %v2775_v21 = vadd.f32 %v2772_v13, %v2765_v17  ;;  %v2774_v22 = vadd.f32 %v2772_v13, %v2764_v16  ;;  %v3022_v18 = vld [vmem:[%s5272_s8] sm:$0xf] }
 0x76b   : > { %v2623_v23 = vpop.f32.mrf.mxu0  ;;  %v2669_v25 = vpop.f32.mrf.mxu1 }
 0x76c   : > { %v2781_v26 = vsel %vm1234_vm2, %v2775_v21, -inf  ;;  %v2778_v27 = vsel %vm1234_vm2, %v2774_v22, -inf  ;;  %v3030_v25 = vsel %vm1486_vm3, %v3022_v18, 0  ;;  %v4320_v18 = vld [vmem:[%s5274_s10 + $0x10] sm:$0xff]  }
 0x76d   : > { %2782 = vmax.xlane.f32.xlu1 %v2781_v26  ;;  %v4140_v28 = vpop.f32.mrf.mxu1  ;;  %2779 = vmax.xlane.f32.xlu0 %v2778_v27  ;;  %v4134_v29 = vpop.f32.mrf.mxu0  ;;  %v3025_v26 = vld [vmem:[%s5272_s8 + $0xc] sm:$0xf]  ;;  %v3024_v27 = vld [vmem:[%s5272_s8 + $0x8] sm:$0xf] }
 0x76f   : > { %v2712_v30 = vpop.f32.mrf.mxu0  ;;  %v2758_v20 = vpop.f32.mrf.mxu1 }
 0x770   : > { %v2766_v31 = vmul.f32 0.35355338, %v2712_v30  ;;  %v2767_v32 = vmul.f32 0.35355338, %v2758_v20  ;;  %v3168_v20 = vsel %vm1486_vm3, %v3025_v26, 0 }
 0x771   : > { %v4145_v24 = vpop.f32.mrf.mxu0  ;;  %v4151_v33 = vpop.f32.mrf.mxu1 }
 0x772   : > { %v2777_v34 = vadd.f32 %v2772_v13, %v2767_v32  ;;  %v2776_v7 = vadd.f32 %v2772_v13, %v2766_v31  ;;  %v3122_v24 = vsel %vm1486_vm3, %v3024_v27, 0  ;;  %v3714_v27 = vld [vmem:[%s5275_s11 + $0x3] ss:$0 sm:$0xff] }
 0x773   : > { %v2715_v35 = vpop.f32.mrf.mxu0  ;;  %v2761_v36 = vpop.f32.mrf.mxu1 }
 0x774   : > { %v2787_v37 = vsel %vm1234_vm2, %v2777_v34, -inf  ;;  %v2784_v38 = vsel %vm1234_vm2, %v2776_v7, -inf }
 0x775   : > { %2788 = vmax.xlane.f32.xlu1 %v2787_v37  ;;  %v4152_v39 = vpop.f32.mrf.mxu1  ;;  %2785 = vmax.xlane.f32.xlu0 %v2784_v38  ;;  %v4146_v40 = vpop.f32.mrf.mxu0 }
 0x7f6   : > { %v2783_v41 = vpop.xlane.xlu1 %2782  ;;  %v2780_v42 = vpop.xlane.xlu0 %2779 }
 0x7f7   : > { %v2791_v43 = vsub.f32 %v2775_v21, %v2783_v41  ;;  %v2790_v45 = vsub.f32 %v2774_v22, %v2780_v42  ;;  %v3076_v22 = vsel %vm1486_vm3, %v3023_v15, 0 }
 0x7f9   : > { %v2796_v46 = vmul.f32 1.442695, %v2791_v43  ;;  %v2794_v47 = vmul.f32 1.442695, %v2790_v45 }
 0x7fb   : > { %4341 = vpow2.f32 %v2796_v46 }
 0x7fc   : > { %4343 = vpow2.f32 %v2794_v47 }
 0x7fe   : > { %v2789_v48 = vpop.xlane.xlu1 %2788  ;;  %v2786_v49 = vpop.xlane.xlu0 %2785 }
 0x7ff   : > { %v2793_v50 = vsub.f32 %v2777_v34, %v2789_v48  ;;  %v2792_v51 = vsub.f32 %v2776_v7, %v2786_v49 }
 0x801   : > { %v2800_v52 = vmul.f32 1.442695, %v2793_v50  ;;  %v2798_v53 = vmul.f32 1.442695, %v2792_v51 }
 0x803   : > { %4345 = vpow2.f32 %v2800_v52 }
 0x804   : > { %4347 = vpow2.f32 %v2798_v53 }
 0x808   : > { %v4342_v54 = vpop.eup %4341 }
 0x809   : > { %v4344_v55 = vpop.eup %4343  ;;  %v2805_v56 = vsel %vm1234_vm2, %v4342_v54, 0.0 }
 0x80a   : > { %2806 = vadd.xlane.f32.xlu1 %v2805_v56  ;;  %v2802_v57 = vsel %vm1234_vm2, %v4344_v55, 0.0 }
 0x80b   : > { %2803 = vadd.xlane.f32.xlu0 %v2802_v57 }
 0x810   : > { %v4346_v58 = vpop.eup %4345 }
 0x811   : > { %v4348_v59 = vpop.eup %4347  ;;  %v2811_v60 = vsel %vm1234_vm2, %v4346_v58, 0.0 }
 0x812   : > { %2812 = vadd.xlane.f32.xlu1 %v2811_v60  ;;  %v2808_v61 = vsel %vm1234_vm2, %v4348_v59, 0.0 }
 0x813   : > { %2809 = vadd.xlane.f32.xlu0 %v2808_v61 }
 0x893   : > { %v2807_v63 = vpop.xlane.xlu1 %2806 }
 0x894   : > { %4349 = vrcp.f32 %v2807_v63  ;;  %v2804_v2 = vpop.xlane.xlu0 %2803 }
 0x895   : > { %4351 = vrcp.f32 %v2804_v2 }
 0x89b   : > { %v2813_v3 = vpop.xlane.xlu1 %2812 }
 0x89c   : > { %4353 = vrcp.f32 %v2813_v3  ;;  %v2810_v4 = vpop.xlane.xlu0 %2809 }
 0x89d   : > { %4355 = vrcp.f32 %v2810_v4 }
 0x8a1   : > { %v4350_v5 = vpop.eup %4349 }
 0x8a2   : > { %v4352_v6 = vpop.eup %4351  ;;  %v2817_v9 = vmul.f32 %v4350_v5, %v4342_v54 }
 0x8a3   : > { %v2815_v11 = vmul.f32 %v4352_v6, %v4344_v55 }
 0x8a4   : > { %2823 = vst.msk [vmem:[%s5058_s4 + $0x8] sm:$0xff] %vm1234_vm2, %v2817_v9  ;;  %v2827_v12 = vpack.c.bf16 %v2817_v9, %v2817_v9 }
 0x8a5   : > { %2822 = vst.msk [vmem:[%s5058_s4] sm:$0xff] %vm1234_vm2, %v2815_v11  ;;  %v2826_v13 = vpack.c.bf16 %v2815_v11, %v2815_v11 }
 0x8a6   : > { %4162 = vmatmul.mubr.msk.bf16.vlgmr.msra.gmra.mxu1 %vm1234_vm2, %v2827_v12 }
 0x8a7   : > { %4156 = vmatmul.mubr.msk.bf16.vlgmr.msra.gmra.mxu0 %vm1234_vm2, %v2826_v13  ;;  %4172 = vmatpush3.bf16.msra.mxu1 %v2976_v14 }
 0x8a8   : > { %4166 = vmatpush3.bf16.msra.mxu0 %v2930_v0  ;;  %4167 = vmatprep.mubr.msk.bf16.mxu0 %vm4454_vm0, %v4453_v1 }
 0x8a9   : > { %v4354_v62 = vpop.eup %4353  ;;  %4173 = vmatprep.mubr.msk.bf16.mxu1 %vm4454_vm0, %v4453_v1  ;;  %4177 = vmatprep.subr.bf16.mxu0 %v4453_v1 }
 0x8aa   : > { %v4356_v16 = vpop.eup %4355  ;;  %v2821_v17 = vmul.f32 %v4354_v62, %v4346_v58  ;;  %4183 = vmatprep.subr.bf16.mxu1 %v4453_v1 }
 0x8ab   : > { %v2819_v19 = vmul.f32 %v4356_v16, %v4348_v59  ;;  %v4317_v16 = vld [vmem:[%s5273_s9 + $0x8] sm:$0xff]  }
 0x8ac   : > { %2825 = vst.msk [vmem:[%s5058_s4 + $0x18] sm:$0xff] %vm1234_vm2, %v2821_v17  ;;  %v2829_v21 = vpack.c.bf16 %v2821_v17, %v2821_v17  ;;  %v4318_v17 = vld [vmem:[%s5273_s9] sm:$0xff]  }
 0x8ad   : > { %2824 = vst.msk [vmem:[%s5058_s4 + $0x10] sm:$0xff] %vm1234_vm2, %v2819_v19  ;;  %v2828_v23 = vpack.c.bf16 %v2819_v19, %v2819_v19 }
 0x8ae   : > { %4174 = vmatmul.mubr.msk.bf16.vlgmr.msra.gmra.mxu1 %vm1234_vm2, %v2829_v21 }
 0x8af   : > { %4168 = vmatmul.mubr.msk.bf16.vlgmr.msra.gmra.mxu0 %vm1234_vm2, %v2828_v23  ;;  %4184 = vmatpush3.bf16.msra.mxu1 %v3076_v22 }
 0x8b0   : > { %4178 = vmatpush3.bf16.msra.mxu0 %v3030_v25  ;;  %4179 = vmatprep.mubr.msk.bf16.mxu0 %vm4454_vm0, %v4453_v1  ;;  %v3713_v25 = vld [vmem:[%s5275_s11 + $0x2] ss:$0 sm:$0xff] }
 0x8b1   : > { %4185 = vmatprep.mubr.msk.bf16.mxu1 %vm4454_vm0, %v4453_v1  ;;  %4189 = vmatprep.subr.bf16.mxu0 %v4453_v1 }
 0x8b2   : > { %4195 = vmatprep.subr.bf16.mxu1 %v4453_v1 }
 0x966   : > { %v2920_v28 = vpop.f32.mrf.mxu1 }
 0x967   : > { %v2874_v29 = vpop.f32.mrf.mxu0  ;;  %v3019_v30 = vpack.c.bf16 %v2920_v28, %v2920_v28 }
 0x968   : > { %v3018_v31 = vpack.c.bf16 %v2874_v29, %v2874_v29  ;;  %v4163_v32 = vpop.f32.mrf.mxu1 }
 0x969   : > { %v4157_v33 = vpop.f32.mrf.mxu0  ;;  %4186 = vmatmul.mubr.msk.bf16.vlgmr.msra.gmra.mxu1 %vm1234_vm2, %v3019_v30  ;;  %v3715_v32 = vld [vmem:[%s5275_s11 + $0x4] ss:$0 sm:$0xff] }
 0x96a   : > { %4180 = vmatmul.mubr.msk.bf16.vlgmr.msra.gmra.mxu0 %vm1234_vm2, %v3018_v31  ;;  %v2923_v34 = vpop.f32.mrf.mxu1  ;;  %4196 = vmatpush3.bf16.msra.mxu1 %v3168_v20  ;;  %v4321_v20 = vld [vmem:[%s5274_s10 + $0x8] sm:$0xff]   ;;  %v4322_v31 = vld [vmem:[%s5274_s10] sm:$0xff]  }
 0x96b   : > { %v2877_v7 = vpop.f32.mrf.mxu0  ;;  %4190 = vmatpush3.bf16.msra.mxu0 %v3122_v24  ;;  %4191 = vmatprep.mubr.msk.bf16.mxu0 %vm4454_vm0, %v4453_v1 }
 0x96c   : > { %v4164_v35 = vpop.f32.mrf.mxu1  ;;  %4197 = vmatprep.mubr.msk.bf16.mxu1 %vm4454_vm0, %v4453_v1  ;;  %4201 = vmatprep.subr.bf16.mxu0 %v4453_v1 }
 0x96d   : > { %v4158_v36 = vpop.f32.mrf.mxu0  ;;  %4209 = vmatprep.subr.bf16.mxu1 %v4453_v1 }
 0x96e   : > { %v3012_v37 = vpop.f32.mrf.mxu1 }
 0x96f   : > { %v2966_v38 = vpop.f32.mrf.mxu0  ;;  %v3021_v39 = vpack.c.bf16 %v3012_v37, %v3012_v37 }
 0x970   : > { %v3020_v40 = vpack.c.bf16 %v2966_v38, %v2966_v38  ;;  %v4175_v41 = vpop.f32.mrf.mxu1 }
 0x971   : > { %v4169_v42 = vpop.f32.mrf.mxu0  ;;  %4198 = vmatmul.mubr.msk.bf16.vlgmr.msra.gmra.mxu1 %vm1234_vm2, %v3021_v39 }
 0x972   : > { %4192 = vmatmul.mubr.msk.bf16.vlgmr.msra.gmra.mxu0 %vm1234_vm2, %v3020_v40  ;;  %v3015_v43 = vpop.f32.mrf.mxu1  ;;  %4217 = vmatprep.mubr.msk.bf16.mxu1 %vm4454_vm0, %v4453_v1 }
 0x973   : > { %v2969_v45 = vpop.f32.mrf.mxu0  ;;  %4205 = vmatprep.mubr.msk.bf16.mxu0 %vm4454_vm0, %v4453_v1  ;;  %4202 = vmatpush3.bf16.msra.mxu0 %v4317_v16 }
 0x974   : > { %v4176_v46 = vpop.f32.mrf.mxu1  ;;  %4203 = vmatprep.subr.bf16.mxu0 %v4453_v1 }
 0x975   : > { %v4170_v47 = vpop.f32.mrf.mxu0 }
 0x977   : > { %4204 = vmatpush3.bf16.msra.mxu0 %v4318_v17 }
 0xa29   : > { %v3112_v48 = vpop.f32.mrf.mxu1 }
 0xa2a   : > { %v3066_v49 = vpop.f32.mrf.mxu0  ;;  %v3211_v55 = vsel %vm610_vm1, %v3112_v48, 0.0 }
 0xa2b   : > { %v4187_v50 = vpop.f32.mrf.mxu1  ;;  %v3210_v54 = vsel %vm610_vm1, %v3066_v49, 0.0 }
 0xa2c   : > { %v4181_v51 = vpop.f32.mrf.mxu0  ;;  %v3212_v59 = vadd.f32 %v3211_v55, %v3210_v54 }
 0xa2d   : > { %v3115_v52 = vpop.f32.mrf.mxu1 }
 0xa2e   : > { %v3069_v53 = vpop.f32.mrf.mxu0 }
 0xa2f   : > { %v4188_v56 = vpop.f32.mrf.mxu1 }
 0xa30   : > { %v4182_v57 = vpop.f32.mrf.mxu0 }
 0xa31   : > { %v3204_v58 = vpop.f32.mrf.mxu1 }
 0xa32   : > { %v3158_v60 = vpop.f32.mrf.mxu0  ;;  %v3215_v4 = vsel %vm610_vm1, %v3204_v58, 0.0 }
 0xa33   : > { %v3213_v61 = vsel %vm610_vm1, %v3158_v60, 0.0  ;;  %v4199_v63 = vpop.f32.mrf.mxu1 }
 0xa34   : > { %v3214_v2 = vadd.f32 %v3213_v61, %v3212_v59  ;;  %v4193_v3 = vpop.f32.mrf.mxu0 }
 0xa35   : > { %v3207_v5 = vpop.f32.mrf.mxu1 }
 0xa36   : > { %v3216_v6 = vadd.f32 %v3215_v4, %v3214_v2  ;;  %v3161_v8 = vpop.f32.mrf.mxu0 }
 0xa37   : > { %v4200_v9 = vpop.f32.mrf.mxu1 }
 0xa38   : > { %v4194_v10 = vpop.f32.mrf.mxu0  ;;  %v3217_v11 = vadd.f32 %v3216_v6, %v4887_v44  ;;  %v4319_v44 = vld [vmem:[%s5274_s10 + $0x18] sm:$0xff]  }
 0xa39   : > { %4210 = vmatpush3.bf16.msra.mxu1 %v4319_v44 }
 0xa3a   : > { %v3218_v12 = vsel %vm610_vm1, %v3217_v11, 0.0  ;;  %4211 = vmatprep.subr.bf16.mxu1 %v4453_v1 }
 0xa3b   : > { %3219 = vadd.xlane.f32.xlu0 %v3218_v12 }
 0xa3d   : > { %4212 = vmatpush3.bf16.msra.mxu1 %v4320_v18 }
 0xa3e   : > { %4213 = vmatprep.subr.bf16.mxu1 %v4453_v1 }
 0xa41   : > { %4214 = vmatpush3.bf16.msra.mxu1 %v4321_v20 }
 0xa42   : > { %4215 = vmatprep.subr.bf16.mxu1 %v4453_v1  ;;  %v3719_v1 = vld [vmem:[%s5275_s11 + $0x5] ss:$0 sm:$0xff] }
 0xa45   : > { %4216 = vmatpush3.bf16.msra.mxu1 %v4322_v31 }
 0xac4   : > { %v3220_v13 = vpop.xlane.xlu0 %3219 }
 0xac5   : > { %v3221_v14 = vmul.f32 0.03125, %v3220_v13 }
 0xac7   : > { %v3222_v0 = vsub.f32 %v3217_v11, %v3221_v14 }
 0xac9   : > { %v3223_v62 = vmul.f32 %v3222_v0, %v3222_v0 }
 0xacb   : > { %v3224_v15 = vsel %vm610_vm1, %v3223_v62, 0.0 }
 0xacc   : > { %3225 = vadd.xlane.f32.xlu1 %v3224_v15 }
 0xb55   : > { %v3226_v19 = vpop.xlane.xlu1 %3225 }
 0xb56   : > { %v3227_v21 = vmul.f32 0.03125, %v3226_v19 }
 0xb58   : > { %v3228_v22 = vadd.f32 1e-12, %v3227_v21 }
 0xb5a   : > { %4357 = vrsqrt.f32 %v3228_v22 }
 0xb67   : > { %v4358_v23 = vpop.eup %4357 }
 0xb68   : > { %v3230_v26 = vmul.f32 %v4358_v23, %v3222_v0 }
 0xb6a   : > { %v3235_v28 = vmul.f32 %v3713_v25, %v3230_v26 }
 0xb6c   : > { %v3240_v29 = vadd.f32 %v3714_v27, %v3235_v28 }
 0xb6e   : > { %v3241_v30 = vpack.c.bf16 %v3240_v29, %v3240_v29 }
 0xb70   : > { %4206 = vmatmul.mubr.msk.bf16.vlgmr.msra.gmra.mxu0 %vm610_vm1, %v3241_v30 }
 0xc30   : > { %v3299_v24 = vpop.f32.mrf.mxu0 }
 0xc31   : > { %v3300_v33 = vadd.f32 %v3715_v32, %v3299_v24 }
 0xc32   : > { %v4207_v34 = vpop.f32.mrf.mxu0 }
 0xc33   : > { %v3305_v7 = vmax.f32 %v3300_v33, 0.0 }
 0xc34   : > { %v3302_v35 = vpop.f32.mrf.mxu0 }
 0xc35   : > { %v3306_v36 = vpack.c.bf16 %v3305_v7, %v3305_v7 }
 0xc36   : > { %v4208_v37 = vpop.f32.mrf.mxu0 }
 0xc37   : > { %4218 = vmatmul.mubr.msk.bf16.vlgmr.msra.gmra.mxu1 %vm3343_vm6, %v3306_v36 }
 0xcf7   : > { %v3381_v38 = vpop.f32.mrf.mxu1 }
 0xcf8   : > { %v3382_v39 = vadd.f32 %v3719_v1, %v3381_v38 }
 0xcf9   : > { %v4219_v40 = vpop.f32.mrf.mxu1 }
 0xcfa   : > { %v3387_v41 = vadd.f32 %v3382_v39, %v3240_v29 }
 0xcfb   : > { %v3384_v42 = vpop.f32.mrf.mxu1 }
 0xcfc   : > { %v3388_v43 = vsel %vm610_vm1, %v3387_v41, 0.0 }
 0xcfd   : > { %3389 = vadd.xlane.f32.xlu0 %v3388_v43  ;;  %v4220_v45 = vpop.f32.mrf.mxu1 }
 0xd86   : > { %v3390_v46 = vpop.xlane.xlu0 %3389 }
 0xd87   : > { %v3391_v47 = vmul.f32 0.03125, %v3390_v46 }
 0xd89   : > { %v5159_v48 = vsub.f32 %v3387_v41, %v3391_v47 }
 0xd8b   : > { %v3393_v49 = vmul.f32 %v5159_v48, %v5159_v48 }
 0xd8d   : > { %v3394_v50 = vsel %vm610_vm1, %v3393_v49, 0.0 }
 0xd8e   : > { %3395 = vadd.xlane.f32.xlu1 %v3394_v50 }
 0xd8f   : > { %4374 = shalt.err (!%p4371_p3)
}
 0xd90   : > { %s4375_s0 = scalar_lea.hbm %s5171_s2, 512  ;;  %s4379_s15 = scalar_lea.hbm %s5277_s13, 1024 }
 0xd91   : > { %p4376_p4 = scmp.ne.s32.totalorder %s5171_s2, %s4375_s0  ;;  %p4380_p9 = scmp.lt.s32.totalorder %s5171_s2, %s5277_s13 }
 0xd92   : > { %p4381_p10 = scmp.lt.s32.totalorder %s4379_s15, %s4375_s0 }
 0xd93   : > { %p4377_p7 = pnand %p4376_p4, %p4572_p5 }
 0xd94   : > { %p4382_p11 = por %p4381_p10, %p4380_p9 }
 0xd95   : > { %p4378_p8 = pneg %p4377_p7 }
 0xd97   : > { %p4383_p12 = pnand %p4382_p11, %p4378_p8 }
 0xd99   : > { %4386 = shalt.err (!%p4383_p12)
}
 0xd9a   : > { %s4456_s1 = smov 128   ;;  %s4457_s21 = smov 8  }
 0xd9b   : > { %s5301_s3 = scalar_lea.sflag [#allocation3], %s4791_s25  ;;  %s5302_s22 = sshll.u32 %s4555_s17, 9 }
 0xd9c   : > { %4221 = dma.vmem_to_hbm [thread:$0]  (%p4572_p5), %s5173_s28, 512, %s5171_s2, %s5301_s3, %s4456_s1, %s4456_s1, %s4457_s21  }
 0xd9d   : > { %s5206_s0 = scalar_lea.hbm %s5278_s14, %s5302_s22  ;;  %s3454_s26 = sshll.u32 %s5058_s4, 4  ;;  %s5209_s26 = int_to_ptr.vmem [resolvable:$true] %s3454_s26 }
 0xd9e   : > { %s3422_s15 = scalar_lea.sflag [#allocation5], %s4791_s25  ;;  %s4387_s5 = scalar_lea.vmem %s5209_s26, 512 }
 0xd9f   : > { %p4388_p13 = scmp.ne.s32.totalorder %s5209_s26, %s4387_s5  ;;  %s4458_s6 = smov [#allocation4]  }
 0xda0   : > { %s4391_s28 = sshll.u32 %s4458_s6, 4  ;;  %s4392_s28 = int_to_ptr.vmem [resolvable:$false] %s4391_s28 }
 0xda1   : > { %p4389_p0 = pnand %p4388_p13, %p4572_p5  ;;  %s4393_s17 = scalar_lea.vmem %s4392_s28, 1024 }
 0xda2   : > { %p4394_p2 = scmp.lt.s32.totalorder %s5209_s26, %s4392_s28  ;;  %p4395_p3 = scmp.lt.s32.totalorder %s4393_s17, %s4387_s5 }
 0xda3   : > { %p4390_p1 = pneg %p4389_p0 }
 0xda4   : > { %p4396_p4 = por %p4395_p3, %p4394_p2 }
 0xda6   : > { %p4397_p7 = pnand %p4396_p4, %p4390_p1 }
 0xda8   : > { %4400 = shalt.err (!%p4397_p7)
}
 0xda9   : > { %s4401_s4 = scalar_lea.hbm %s5206_s0, 512  ;;  %s4405_s6 = scalar_lea.hbm %s5278_s14, 1024 }
 0xdaa   : > { %p4402_p8 = scmp.ne.s32.totalorder %s5206_s0, %s4401_s4  ;;  %p4406_p11 = scmp.lt.s32.totalorder %s5206_s0, %s5278_s14 }
 0xdab   : > { %p4407_p12 = scmp.lt.s32.totalorder %s4405_s6, %s4401_s4 }
 0xdac   : > { %p4403_p9 = pnand %p4402_p8, %p4572_p5 }
 0xdad   : > { %p4408_p13 = por %p4407_p12, %p4406_p11 }
 0xdae   : > { %p4404_p10 = pneg %p4403_p9 }
 0xdb0   : > { %p4409_p0 = pnand %p4408_p13, %p4404_p10 }
 0xdb2   : > { %4412 = shalt.err (!%p4409_p0)
}
 0xdb3   : > { %4222 = dma.vmem_to_hbm [thread:$0]  (%p4572_p5), %s5209_s26, 512, %s5206_s0, %s3422_s15, %s4456_s1, %s4456_s1, %s4457_s21  }
 0xdb4   : > { %v3725_v55 = vld [vmem:[%s5275_s11 + $0x6] ss:$0 sm:$0xff]  ;;  %v3726_v57 = vld [vmem:[%s5275_s11 + $0x7] ss:$0 sm:$0xff]  ;;  %s531_s1 = scalar_lea.vmem %s5276_s12, %s4607_s27 }
 0xe17   : > { %v3396_v51 = vpop.xlane.xlu1 %3395 }
 0xe18   : > { %v3397_v52 = vmul.f32 0.03125, %v3396_v51 }
 0xe1a   : > { %v3398_v53 = vadd.f32 1e-12, %v3397_v52 }
 0xe1c   : > { %4359 = vrsqrt.f32 %v3398_v53 }
 0xe29   : > { %v4360_v54 = vpop.eup %4359 }
 0xe2a   : > { %v3400_v56 = vmul.f32 %v4360_v54, %v5159_v48 }
 0xe2c   : > { %v3405_v58 = vmul.f32 %v3725_v55, %v3400_v56 }
 0xe2e   : > { %v3410_v59 = vadd.f32 %v3726_v57, %v3405_v58 }
 0xe30   : > { %3411 = vst.msk [vmem:[%s531_s1] sm:$0xff] %vm610_vm1, %v3410_v59 }
 0xe31 PF: > { %p4232_p5 = scmp.ge.s32.totalorder %s4451_s16, 2  ;;  %s3476_s21 = sand.u32 1, %s4439_s29  }
 0xe32   : > { %s3477_s0 = scalar_lea.sflag [#allocation3], %s3476_s21 }
 0xe33   : > { %p4226_p1 = pnand %p4232_p5, %p4576_p6 }
 0xe35   : > { %p4227_p2 = pneg %p4226_p1 }
 0xe37   : > { %4430 = dma.done.wait (%p4227_p2), %s3477_s0, 512  }
 0xe38   : > { %4432 = vsyncadd (%p4227_p2), %s3477_s0, 4294966784  ;;  %s3486_s26 = scalar_lea.sflag [#allocation5], %s3476_s21 }
 0xe39   : > { %4434 = dma.done.wait (%p4227_p2), %s3486_s26, 512  }
 0xe3a   : > { %4436 = vsyncadd (%p4227_p2), %s3486_s26, 4294966784  ;;  %s5303_s27 = sld [smem:[#allocation8_spill]]  ;;  %p28_p3 = scmp.ge.s32.totalorder %s4559_s19, 4  }
 0xe3b   : > { %s5304_s15 = sld [smem:[#allocation9_spill]]  ;;  %s5305_s29 = smov %s4443_s30 }
 0xe3c   : > { %s5307_s16 = smov %s4559_s19  ;;  %30 = sbr.rel (!%p28_p3) target bundleno = 13 (0xd), region = 141 }
 0xe40   : > { %s5306_s30 = smov %s5303_s27 }
 0xe41   :  { %3491 = vsyncpa [#allocation3], 1 }
 0xe42   :  { %3493 = vsyncpa [#allocation3 + $0x1], 1 }
 0xe43   :  { %3494 = vsyncpa [#allocation5], 1 }
 0xe44   :  { %3496 = vsyncpa [#allocation5 + $0x1], 1 }

</bundles_post_ra>
